<compile_context>
chip_gen: v5e
topology: v5e:2x2
jax: 0.10.0
libtpu: 0.0.40
codegen_flags: <defaults>
</compile_context>

<pallas_src>
import math

import jax
import jax.numpy as jnp
from jax.experimental import pallas as pl
from jax.experimental.pallas import tpu as pltpu

# ----------------------------- model configuration -----------------------------
B = 2        # batch size
C = 3        # input_channels (num vars)
P = 8        # num_patches
LP = 16      # patch_length
D = 32       # model_dim
H = 4        # num_heads
DK = D // H  # head dim
FF = 64      # feedforward_dim
NL = 2       # num transformer layers
F = 12       # target_dim (forecast length)
BN_EPS = 1e-5


# --------------------------------- Pallas kernel --------------------------------
def patchtst_kernel(x_ref, mask_ref, posb_ref, wp_ref, wqkv_ref, bqkv_ref,
                    wo_ref, vecs_ref, w1_ref, b1_ref, w2_ref, wt_ref, bh_ref,
                    out_ref, prev_ref):
    f32 = jnp.float32
    bf16 = jnp.bfloat16

    patches = x_ref[0]                                               # [NR, LP] f32
    mask = mask_ref[...]                                             # [NR, NR] additive

    # shared patch projection; posb = positional encoding + projection bias
    x = jnp.dot(patches.astype(bf16), wp_ref[...],
                preferred_element_type=f32) + posb_ref[...]          # [NR, D]

    scale = f32(1.0 / math.sqrt(DK))

    for l in range(NL):
        # ---------------- multi-head self-attention ----------------
        xb = x.astype(bf16)
        # fused QKV projection: one MXU push per layer
        qkv = jnp.dot(xb, wqkv_ref[l], preferred_element_type=f32) + bqkv_ref[l]
        heads = []
        for h in range(H):
            qh = qkv[:, h * DK:(h + 1) * DK]
            kh = qkv[:, D + h * DK:D + (h + 1) * DK]
            vh = qkv[:, 2 * D + h * DK:2 * D + (h + 1) * DK]

            scores = jax.lax.dot_general(
                qh.astype(bf16), kh.astype(bf16),
                (((1,), (1,)), ((), ())), preferred_element_type=f32) * scale
            if l > 0:                         # residual attention (pre-mask carry)
                scores = scores + prev_ref[h]
            if l < NL - 1:
                prev_ref[h] = scores          # carry in VMEM scratch, not vregs

            s = scores + mask                 # block-diagonal additive mask
            m = jnp.max(s, axis=-1, keepdims=True)
            e = jnp.exp(s - m)
            attn = e * pl.reciprocal(jnp.sum(e, axis=-1, keepdims=True), approx=True)
            heads.append(jnp.dot(attn.astype(bf16), vh.astype(bf16),
                                 preferred_element_type=f32))        # [NR, DK]

        # fused output projection: lane-concat heads, one [NR,D]@[D,D] push
        o_cat = jnp.concatenate(heads, axis=-1).astype(bf16)          # [NR, D]
        attn_out = jnp.dot(o_cat, wo_ref[l], preferred_element_type=f32)

        vecs = vecs_ref[l]                                            # [6, D]
        x = x + attn_out + vecs[0:1, :]                               # + b_out
        x = x * vecs[1:2, :] + vecs[2:3, :]                           # BN1 (gamma folded)

        # ---------------- feed-forward network ----------------
        h1 = jnp.dot(x.astype(bf16), w1_ref[l],
                     preferred_element_type=f32) + b1_ref[l]          # [NR, FF]
        h1 = jax.nn.gelu(h1, approximate=True)
        x = x + jnp.dot(h1.astype(bf16), w2_ref[l],
                        preferred_element_type=f32) + vecs[3:4, :]    # + b_ff2
        x = x * vecs[4:5, :] + vecs[5:6, :]                           # BN2 (gamma folded)

    # ---------------- per-channel prediction head (VPU only, no MXU) ----------------
    # out[seq, f] = sum_{p,d} x[seq*P + p, d] * W_head[seq, d*P + p, f]
    # wt_ref is pre-arranged as [D, NR, F] so each term is a lane-broadcast multiply.
    terms = [x[:, d:d + 1] * wt_ref[d] for d in range(D)]             # each [NR, F]
    while len(terms) > 1:                                             # balanced-tree sum
        nxt = [terms[i] + terms[i + 1] for i in range(0, len(terms) - 1, 2)]
        if len(terms) % 2:
            nxt.append(terms[-1])
        terms = nxt
    partial = terms[0]                                                # [NR, F]

    n_groups = bh_ref.shape[0]                                        # stacked sequences
    rows = [jnp.sum(partial[g * P:(g + 1) * P, :], axis=0, keepdims=True)
            for g in range(n_groups)]
    out_ref[0] = jnp.concatenate(rows, axis=0) + bh_ref[...]          # [SC, F]


# --------------------------- wrapper-side param prep -----------------------------
def _prep_kernel_params(params, s_batches):
    bf16 = jnp.bfloat16
    sc = s_batches * C          # stacked sequences per grid step
    nr = sc * P                 # stacked rows per grid step
    inv = 1.0 / math.sqrt(1.0 + BN_EPS)   # eval-mode BN fold (mean=0, var=1)

    # per-layer 1-row vectors with last dim D, stacked into one operand:
    #   rows = [b_out, bn1_gamma*inv, bn1_beta, b_ff2, bn2_gamma*inv, bn2_beta]
    vecs = jnp.concatenate([
        params["bo"],
        params["bn1"][:, 0:1, :] * inv,
        params["bn1"][:, 1:2, :],
        params["b2"],
        params["bn2"][:, 0:1, :] * inv,
        params["bn2"][:, 1:2, :],
    ], axis=1)                                                        # [NL, 6, D]

    # positional encoding tiled over stacked sequences + projection bias folded in
    posb = jnp.tile(params["pos"], (sc, 1)) + params["bp"]            # [NR, D]

    # additive block-diagonal mask: rows only attend within their own sequence
    row = jnp.arange(nr)[:, None] // P
    col = jnp.arange(nr)[None, :] // P
    mask = jnp.where(row == col, 0.0, -1e30).astype(jnp.float32)      # [NR, NR]

    # head weights: [C, D*P, F] (flat index d*P + p) -> [D, C*P, F] -> tile batches
    wt = params["wh"].reshape(C, D, P, F).transpose(1, 0, 2, 3).reshape(D, C * P, F)
    wt = jnp.tile(wt, (1, s_batches, 1))                              # [D, NR, F]
    bh = jnp.tile(params["bh"][:, 0, :], (s_batches, 1))              # [SC, F]

    return dict(
        mask=mask, posb=posb,
        wp=params["wp"].astype(bf16),
        wqkv=params["wqkv"].astype(bf16), bqkv=params["bqkv"],
        wo=params["wo"].astype(bf16),
        vecs=vecs,
        w1=params["w1"].astype(bf16), b1=params["b1"],
        w2=params["w2"].astype(bf16),
        wt=wt, bh=bh,
    )


def _batches_per_step() -> int:
    """1 batch per step on dual-TensorCore v7x (parallel grid shards across cores);
    fold all batches into a single step on single-core chips (v5e/v6e)."""
    try:
        kind = jax.devices()[0].device_kind.lower()
    except Exception:
        kind = ""
    return 1 if "v7" in kind else B


# --------------------------------- wrapper --------------------------------------
def patchtst_forward(inputs, params):
    """inputs: [B, num_patches, C, patch_len] -> output [B, target_dim, C]."""
    s = _batches_per_step()          # batches stacked per grid step
    g = B // s                       # grid steps
    sc = s * C                       # stacked sequences per step
    nr = sc * P                      # stacked rows per step

    x = jnp.transpose(inputs, (0, 2, 1, 3)).reshape(g, nr, LP)        # [G, NR, LP]
    kp = _prep_kernel_params(params, s)

    def whole(shape):                # resident whole-array block
        nd = len(shape)
        return pl.BlockSpec(shape, lambda *_: (0,) * nd)

    in_specs = [
        pl.BlockSpec((1, nr, LP), lambda b: (b, 0, 0)),  # stacked patches
        whole((nr, nr)),          # additive block-diagonal mask
        whole((nr, D)),           # positional encoding + projection bias
        whole((LP, D)),           # W_proj                       (bf16)
        whole((NL, D, 3 * D)),    # fused W_qkv                  (bf16)
        whole((NL, 1, 3 * D)),    # fused b_qkv
        whole((NL, D, D)),        # W_out                        (bf16)
        whole((NL, 6, D)),        # [b_out, bn1_g, bn1_b, b_ff2, bn2_g, bn2_b]
        whole((NL, D, FF)),       # W_ff1                        (bf16)
        whole((NL, 1, FF)),       # b_ff1
        whole((NL, FF, D)),       # W_ff2                        (bf16)
        whole((D, nr, F)),        # head weights, per stacked row
        whole((sc, F)),           # head bias, per stacked sequence
    ]

    out = pl.pallas_call(
        patchtst_kernel,
        grid=(g,),
        in_specs=in_specs,
        out_specs=pl.BlockSpec((1, sc, F), lambda b: (b, 0, 0)),
        out_shape=jax.ShapeDtypeStruct((g, sc, F), jnp.float32),
        scratch_shapes=[pltpu.VMEM((H, nr, nr), jnp.float32)],        # residual scores
        compiler_params=pltpu.CompilerParams(
            dimension_semantics=("parallel",)),
    )(
        x, kp["mask"], kp["posb"], kp["wp"], kp["wqkv"], kp["bqkv"],
        kp["wo"], kp["vecs"], kp["w1"], kp["b1"], kp["w2"], kp["wt"], kp["bh"],
    )
    return jnp.transpose(out.reshape(B, C, F), (0, 2, 1))             # [B, F, C]


# ----------------------------- pure-JAX reference --------------------------------
def reference_forward(inputs, p):
    xb = jnp.transpose(inputs, (0, 2, 1, 3)).reshape(B * C, P, LP)
    x = xb @ p["wp"] + p["bp"]
    x = x + p["pos"][None]
    scale = 1.0 / math.sqrt(DK)
    prev = [None] * H
    for l in range(NL):
        qkv = x @ p["wqkv"][l] + p["bqkv"][l]
        q, k, v = qkv[..., :D], qkv[..., D:2 * D], qkv[..., 2 * D:]
        attn_out = jnp.zeros((B * C, P, D), jnp.float32)
        new_prev = []
        for h in range(H):
            lo, hi = h * DK, (h + 1) * DK
            scores = jnp.einsum("bpd,bqd->bpq", q[..., lo:hi], k[..., lo:hi]) * scale
            if prev[h] is not None:
                scores = scores + prev[h]
            new_prev.append(scores)
            w = jax.nn.softmax(scores, axis=-1)
            oh = jnp.einsum("bpq,bqd->bpd", w, v[..., lo:hi])
            attn_out = attn_out + oh @ p["wo"][l][lo:hi, :]
        prev = new_prev
        x = x + attn_out + p["bo"][l]
        x = x * (p["bn1"][l, 0:1] / jnp.sqrt(1.0 + BN_EPS)) + p["bn1"][l, 1:2]
        h1 = jax.nn.gelu(x @ p["w1"][l] + p["b1"][l], approximate=True)
        x = x + h1 @ p["w2"][l] + p["b2"][l]
        x = x * (p["bn2"][l, 0:1] / jnp.sqrt(1.0 + BN_EPS)) + p["bn2"][l, 1:2]
    enc = x.reshape(B, C, P, D).transpose(0, 1, 3, 2)                 # [B, C, D, P]
    flat = enc.reshape(B, C, D * P)
    out = jnp.einsum("bck,ckf->bcf", flat, p["wh"]) + p["bh"][:, 0][None]
    return jnp.transpose(out, (0, 2, 1))


# --------------------------------- parameters ------------------------------------
def init_params(key):
    ks = jax.random.split(key, 20)
    s = 0.05
    params = {
        "wp": s * jax.random.normal(ks[0], (LP, D), jnp.float32),
        "bp": s * jax.random.normal(ks[1], (1, D), jnp.float32),
        "pos": jax.random.uniform(ks[2], (P, D), jnp.float32, -0.02, 0.02),
        "wqkv": s * jax.random.normal(ks[3], (NL, D, 3 * D), jnp.float32),
        "bqkv": s * jax.random.normal(ks[4], (NL, 1, 3 * D), jnp.float32),
        "wo": s * jax.random.normal(ks[5], (NL, D, D), jnp.float32),
        "bo": s * jax.random.normal(ks[6], (NL, 1, D), jnp.float32),
        "bn1": jnp.stack(
            [1.0 + 0.1 * jax.random.normal(ks[7], (NL, D), jnp.float32),
             0.05 * jax.random.normal(ks[8], (NL, D), jnp.float32)], axis=1),
        "w1": s * jax.random.normal(ks[9], (NL, D, FF), jnp.float32),
        "b1": s * jax.random.normal(ks[10], (NL, 1, FF), jnp.float32),
        "w2": s * jax.random.normal(ks[11], (NL, FF, D), jnp.float32),
        "b2": s * jax.random.normal(ks[12], (NL, 1, D), jnp.float32),
        "bn2": jnp.stack(
            [1.0 + 0.1 * jax.random.normal(ks[13], (NL, D), jnp.float32),
             0.05 * jax.random.normal(ks[14], (NL, D), jnp.float32)], axis=1),
        # individual (per-channel) prediction head: Linear(D*P -> F) per channel
        "wh": s * jax.random.normal(ks[15], (C, D * P, F), jnp.float32),
        "bh": s * jax.random.normal(ks[16], (C, 1, F), jnp.float32),
    }
    return params


if __name__ == "__main__":
    key = jax.random.PRNGKey(0)
    k_in, k_par = jax.random.split(key)
    params = init_params(k_par)
    inputs = jax.random.normal(k_in, (B, P, C, LP), jnp.float32)  # [B, num_patches, C, patch_len]

    out_kernel = jax.block_until_ready(patchtst_forward(inputs, params))
    out_ref = jax.block_until_ready(reference_forward(inputs, params))

    assert out_kernel.shape == (B, F, C)
    if not bool(jnp.allclose(out_kernel, out_ref, rtol=1e-2, atol=1e-2)):
        err = float(jnp.max(jnp.abs(out_kernel - out_ref)))
        raise AssertionError(
            f"Pallas kernel output does not match JAX reference (max abs err {err})")

    print("KERNEL_OK")
</pallas_src>

<mosaic_0001>
module attributes {stable_mosaic.version = 11 : i64} {
  func.func @patchtst_kernel(%arg0: i32, %arg1: memref<1x48x16xf32, #tpu.memory_space<vmem>>, %arg2: memref<48x48xf32, #tpu.memory_space<vmem>>, %arg3: memref<48x32xf32, #tpu.memory_space<vmem>>, %arg4: memref<16x32xbf16, #tpu.memory_space<vmem>>, %arg5: memref<2x32x96xbf16, #tpu.memory_space<vmem>>, %arg6: memref<2x1x96xf32, #tpu.memory_space<vmem>>, %arg7: memref<2x32x32xbf16, #tpu.memory_space<vmem>>, %arg8: memref<2x6x32xf32, #tpu.memory_space<vmem>>, %arg9: memref<2x32x64xbf16, #tpu.memory_space<vmem>>, %arg10: memref<2x1x64xf32, #tpu.memory_space<vmem>>, %arg11: memref<2x64x32xbf16, #tpu.memory_space<vmem>>, %arg12: memref<32x48x12xf32, #tpu.memory_space<vmem>>, %arg13: memref<6x12xf32, #tpu.memory_space<vmem>>, %arg14: memref<1x6x12xf32, #tpu.memory_space<vmem>>, %arg15: memref<4x48x48xf32, #tpu.memory_space<vmem>>) attributes {dimension_semantics = [#tpu.dimension_semantics<parallel>], iteration_bounds = array<i64: 1>, scalar_prefetch = 0 : i64, scratch_operands = 1 : i64, tpu.core_type = #tpu.core_type<tc>, window_params = [{transform_indices = @transform_0, window_bounds = array<i64: 1, 48, 16>}, {pipeline_mode = #tpu.pipeline_mode<synchronous>, transform_indices = @transform_1, window_bounds = array<i64: 48, 48>}, {pipeline_mode = #tpu.pipeline_mode<synchronous>, transform_indices = @transform_2, window_bounds = array<i64: 48, 32>}, {pipeline_mode = #tpu.pipeline_mode<synchronous>, transform_indices = @transform_3, window_bounds = array<i64: 16, 32>}, {pipeline_mode = #tpu.pipeline_mode<synchronous>, transform_indices = @transform_4, window_bounds = array<i64: 2, 32, 96>}, {pipeline_mode = #tpu.pipeline_mode<synchronous>, transform_indices = @transform_5, window_bounds = array<i64: 2, 1, 96>}, {pipeline_mode = #tpu.pipeline_mode<synchronous>, transform_indices = @transform_6, window_bounds = array<i64: 2, 32, 32>}, {pipeline_mode = #tpu.pipeline_mode<synchronous>, transform_indices = @transform_7, window_bounds = array<i64: 2, 6, 32>}, {pipeline_mode = #tpu.pipeline_mode<synchronous>, transform_indices = @transform_8, window_bounds = array<i64: 2, 32, 64>}, {pipeline_mode = #tpu.pipeline_mode<synchronous>, transform_indices = @transform_9, window_bounds = array<i64: 2, 1, 64>}, {pipeline_mode = #tpu.pipeline_mode<synchronous>, transform_indices = @transform_10, window_bounds = array<i64: 2, 64, 32>}, {pipeline_mode = #tpu.pipeline_mode<synchronous>, transform_indices = @transform_11, window_bounds = array<i64: 32, 48, 12>}, {pipeline_mode = #tpu.pipeline_mode<synchronous>, transform_indices = @transform_12, window_bounds = array<i64: 6, 12>}, {transform_indices = @transform_13, window_bounds = array<i64: 1, 6, 12>}]} {
    %c0 = arith.constant 0 : index
    %c0_0 = arith.constant 0 : index
    %c0_1 = arith.constant 0 : index
    %0 = vector.load %arg1[%c0, %c0_0, %c0_1] : memref<1x48x16xf32, #tpu.memory_space<vmem>>, vector<1x48x16xf32>
    %1 = vector.shape_cast %0 : vector<1x48x16xf32> to vector<48x16xf32>
    %c0_2 = arith.constant 0 : index
    %c0_3 = arith.constant 0 : index
    %2 = vector.load %arg2[%c0_2, %c0_3] : memref<48x48xf32, #tpu.memory_space<vmem>>, vector<48x48xf32>
    %3 = arith.truncf %1 : vector<48x16xf32> to vector<48x16xbf16>
    %c0_4 = arith.constant 0 : index
    %c0_5 = arith.constant 0 : index
    %4 = vector.load %arg4[%c0_4, %c0_5] : memref<16x32xbf16, #tpu.memory_space<vmem>>, vector<16x32xbf16>
    %cst = arith.constant dense<0.000000e+00> : vector<48x32xf32>
    %5 = tpu.matmul %3, %4, %cst {dimension_numbers = #tpu.dot_dimension_numbers<[1], [0], [0], [1], [0, 0, 1, 1], [], []>} : vector<48x16xbf16>, vector<16x32xbf16>, vector<48x32xf32> -> vector<48x32xf32>
    %c0_6 = arith.constant 0 : index
    %c0_7 = arith.constant 0 : index
    %6 = vector.load %arg3[%c0_6, %c0_7] : memref<48x32xf32, #tpu.memory_space<vmem>>, vector<48x32xf32>
    %7 = arith.addf %5, %6 : vector<48x32xf32>
    %8 = arith.truncf %7 : vector<48x32xf32> to vector<48x32xbf16>
    %c0_8 = arith.constant 0 : index
    %c0_9 = arith.constant 0 : index
    %c0_10 = arith.constant 0 : index
    %9 = vector.load %arg5[%c0_8, %c0_9, %c0_10] : memref<2x32x96xbf16, #tpu.memory_space<vmem>>, vector<1x32x96xbf16>
    %10 = vector.shape_cast %9 : vector<1x32x96xbf16> to vector<32x96xbf16>
    %cst_11 = arith.constant dense<0.000000e+00> : vector<48x96xf32>
    %11 = tpu.matmul %8, %10, %cst_11 {dimension_numbers = #tpu.dot_dimension_numbers<[1], [0], [0], [1], [0, 0, 1, 1], [], []>} : vector<48x32xbf16>, vector<32x96xbf16>, vector<48x96xf32> -> vector<48x96xf32>
    %c0_12 = arith.constant 0 : index
    %c0_13 = arith.constant 0 : index
    %c0_14 = arith.constant 0 : index
    %12 = vector.load %arg6[%c0_12, %c0_13, %c0_14] : memref<2x1x96xf32, #tpu.memory_space<vmem>>, vector<1x1x96xf32>
    %13 = vector.shape_cast %12 : vector<1x1x96xf32> to vector<1x96xf32>
    %14 = vector.broadcast %13 : vector<1x96xf32> to vector<48x96xf32>
    %15 = arith.addf %11, %14 : vector<48x96xf32>
    %16 = vector.extract_strided_slice %15 {offsets = [0, 0], sizes = [48, 8], strides = [1, 1]} : vector<48x96xf32> to vector<48x8xf32>
    %17 = vector.extract_strided_slice %15 {offsets = [0, 32], sizes = [48, 8], strides = [1, 1]} : vector<48x96xf32> to vector<48x8xf32>
    %18 = vector.extract_strided_slice %15 {offsets = [0, 64], sizes = [48, 8], strides = [1, 1]} : vector<48x96xf32> to vector<48x8xf32>
    %19 = arith.truncf %16 : vector<48x8xf32> to vector<48x8xbf16>
    %20 = arith.truncf %17 : vector<48x8xf32> to vector<48x8xbf16>
    %cst_15 = arith.constant dense<0.000000e+00> : vector<48x48xf32>
    %21 = tpu.matmul %19, %20, %cst_15 {dimension_numbers = #tpu.dot_dimension_numbers<[1], [1], [0], [0], [0, 0, 1, 0], [], []>} : vector<48x8xbf16>, vector<48x8xbf16>, vector<48x48xf32> -> vector<48x48xf32>
    %cst_16 = arith.constant 0.353553385 : f32
    %22 = vector.broadcast %cst_16 : f32 to vector<48x48xf32>
    %23 = arith.mulf %21, %22 : vector<48x48xf32>
    %c0_17 = arith.constant 0 : index
    %c0_18 = arith.constant 0 : index
    %c0_19 = arith.constant 0 : index
    %24 = vector.load %arg15[%c0_17, %c0_18, %c0_19] : memref<4x48x48xf32, #tpu.memory_space<vmem>>, vector<1x48x48xf32>
    %25 = vector.shape_cast %24 : vector<1x48x48xf32> to vector<48x48xf32>
    %26 = vector.shape_cast %23 : vector<48x48xf32> to vector<1x48x48xf32>
    tpu.vector_store %arg15[%c0_17, %c0_18, %c0_19], %26 {strides = array<i32>} : memref<4x48x48xf32, #tpu.memory_space<vmem>>, vector<1x48x48xf32>,
    %27 = arith.addf %23, %2 : vector<48x48xf32>
    %cst_20 = arith.constant dense<0xFF800000> : vector<48xf32>
    %28 = vector.multi_reduction <maximumf>, %27, %cst_20 [1] : vector<48x48xf32> to vector<48xf32>
    %29 = vector.shape_cast %28 : vector<48xf32> to vector<48x1xf32>
    %30 = vector.broadcast %29 : vector<48x1xf32> to vector<48x48xf32>
    %31 = arith.subf %27, %30 : vector<48x48xf32>
    %32 = math.exp %31 : vector<48x48xf32>
    %cst_21 = arith.constant dense<0.000000e+00> : vector<48xf32>
    %33 = vector.multi_reduction <add>, %32, %cst_21 [1] : vector<48x48xf32> to vector<48xf32>
    %34 = vector.shape_cast %33 : vector<48xf32> to vector<48x1xf32>
    %35 = tpu.reciprocal %34 {approx = true} : vector<48x1xf32> -> vector<48x1xf32>
    %36 = vector.broadcast %35 : vector<48x1xf32> to vector<48x48xf32>
    %37 = arith.mulf %32, %36 : vector<48x48xf32>
    %38 = arith.truncf %37 : vector<48x48xf32> to vector<48x48xbf16>
    %39 = arith.truncf %18 : vector<48x8xf32> to vector<48x8xbf16>
    %cst_22 = arith.constant dense<0.000000e+00> : vector<48x8xf32>
    %40 = tpu.matmul %38, %39, %cst_22 {dimension_numbers = #tpu.dot_dimension_numbers<[1], [0], [0], [1], [0, 0, 1, 1], [], []>} : vector<48x48xbf16>, vector<48x8xbf16>, vector<48x8xf32> -> vector<48x8xf32>
    %41 = vector.extract_strided_slice %15 {offsets = [0, 8], sizes = [48, 8], strides = [1, 1]} : vector<48x96xf32> to vector<48x8xf32>
    %42 = vector.extract_strided_slice %15 {offsets = [0, 40], sizes = [48, 8], strides = [1, 1]} : vector<48x96xf32> to vector<48x8xf32>
    %43 = vector.extract_strided_slice %15 {offsets = [0, 72], sizes = [48, 8], strides = [1, 1]} : vector<48x96xf32> to vector<48x8xf32>
    %44 = arith.truncf %41 : vector<48x8xf32> to vector<48x8xbf16>
    %45 = arith.truncf %42 : vector<48x8xf32> to vector<48x8xbf16>
    %cst_23 = arith.constant dense<0.000000e+00> : vector<48x48xf32>
    %46 = tpu.matmul %44, %45, %cst_23 {dimension_numbers = #tpu.dot_dimension_numbers<[1], [1], [0], [0], [0, 0, 1, 0], [], []>} : vector<48x8xbf16>, vector<48x8xbf16>, vector<48x48xf32> -> vector<48x48xf32>
    %cst_24 = arith.constant 0.353553385 : f32
    %47 = vector.broadcast %cst_24 : f32 to vector<48x48xf32>
    %48 = arith.mulf %46, %47 : vector<48x48xf32>
    %c1 = arith.constant 1 : index
    %c0_25 = arith.constant 0 : index
    %c0_26 = arith.constant 0 : index
    %49 = vector.load %arg15[%c1, %c0_25, %c0_26] : memref<4x48x48xf32, #tpu.memory_space<vmem>>, vector<1x48x48xf32>
    %50 = vector.shape_cast %49 : vector<1x48x48xf32> to vector<48x48xf32>
    %51 = vector.shape_cast %48 : vector<48x48xf32> to vector<1x48x48xf32>
    tpu.vector_store %arg15[%c1, %c0_25, %c0_26], %51 {strides = array<i32>} : memref<4x48x48xf32, #tpu.memory_space<vmem>>, vector<1x48x48xf32>,
    %52 = arith.addf %48, %2 : vector<48x48xf32>
    %cst_27 = arith.constant dense<0xFF800000> : vector<48xf32>
    %53 = vector.multi_reduction <maximumf>, %52, %cst_27 [1] : vector<48x48xf32> to vector<48xf32>
    %54 = vector.shape_cast %53 : vector<48xf32> to vector<48x1xf32>
    %55 = vector.broadcast %54 : vector<48x1xf32> to vector<48x48xf32>
    %56 = arith.subf %52, %55 : vector<48x48xf32>
    %57 = math.exp %56 : vector<48x48xf32>
    %cst_28 = arith.constant dense<0.000000e+00> : vector<48xf32>
    %58 = vector.multi_reduction <add>, %57, %cst_28 [1] : vector<48x48xf32> to vector<48xf32>
    %59 = vector.shape_cast %58 : vector<48xf32> to vector<48x1xf32>
    %60 = tpu.reciprocal %59 {approx = true} : vector<48x1xf32> -> vector<48x1xf32>
    %61 = vector.broadcast %60 : vector<48x1xf32> to vector<48x48xf32>
    %62 = arith.mulf %57, %61 : vector<48x48xf32>
    %63 = arith.truncf %62 : vector<48x48xf32> to vector<48x48xbf16>
    %64 = arith.truncf %43 : vector<48x8xf32> to vector<48x8xbf16>
    %cst_29 = arith.constant dense<0.000000e+00> : vector<48x8xf32>
    %65 = tpu.matmul %63, %64, %cst_29 {dimension_numbers = #tpu.dot_dimension_numbers<[1], [0], [0], [1], [0, 0, 1, 1], [], []>} : vector<48x48xbf16>, vector<48x8xbf16>, vector<48x8xf32> -> vector<48x8xf32>
    %66 = vector.extract_strided_slice %15 {offsets = [0, 16], sizes = [48, 8], strides = [1, 1]} : vector<48x96xf32> to vector<48x8xf32>
    %67 = vector.extract_strided_slice %15 {offsets = [0, 48], sizes = [48, 8], strides = [1, 1]} : vector<48x96xf32> to vector<48x8xf32>
    %68 = vector.extract_strided_slice %15 {offsets = [0, 80], sizes = [48, 8], strides = [1, 1]} : vector<48x96xf32> to vector<48x8xf32>
    %69 = arith.truncf %66 : vector<48x8xf32> to vector<48x8xbf16>
    %70 = arith.truncf %67 : vector<48x8xf32> to vector<48x8xbf16>
    %cst_30 = arith.constant dense<0.000000e+00> : vector<48x48xf32>
    %71 = tpu.matmul %69, %70, %cst_30 {dimension_numbers = #tpu.dot_dimension_numbers<[1], [1], [0], [0], [0, 0, 1, 0], [], []>} : vector<48x8xbf16>, vector<48x8xbf16>, vector<48x48xf32> -> vector<48x48xf32>
    %cst_31 = arith.constant 0.353553385 : f32
    %72 = vector.broadcast %cst_31 : f32 to vector<48x48xf32>
    %73 = arith.mulf %71, %72 : vector<48x48xf32>
    %c2 = arith.constant 2 : index
    %c0_32 = arith.constant 0 : index
    %c0_33 = arith.constant 0 : index
    %74 = vector.load %arg15[%c2, %c0_32, %c0_33] : memref<4x48x48xf32, #tpu.memory_space<vmem>>, vector<1x48x48xf32>
    %75 = vector.shape_cast %74 : vector<1x48x48xf32> to vector<48x48xf32>
    %76 = vector.shape_cast %73 : vector<48x48xf32> to vector<1x48x48xf32>
    tpu.vector_store %arg15[%c2, %c0_32, %c0_33], %76 {strides = array<i32>} : memref<4x48x48xf32, #tpu.memory_space<vmem>>, vector<1x48x48xf32>,
    %77 = arith.addf %73, %2 : vector<48x48xf32>
    %cst_34 = arith.constant dense<0xFF800000> : vector<48xf32>
    %78 = vector.multi_reduction <maximumf>, %77, %cst_34 [1] : vector<48x48xf32> to vector<48xf32>
    %79 = vector.shape_cast %78 : vector<48xf32> to vector<48x1xf32>
    %80 = vector.broadcast %79 : vector<48x1xf32> to vector<48x48xf32>
    %81 = arith.subf %77, %80 : vector<48x48xf32>
    %82 = math.exp %81 : vector<48x48xf32>
    %cst_35 = arith.constant dense<0.000000e+00> : vector<48xf32>
    %83 = vector.multi_reduction <add>, %82, %cst_35 [1] : vector<48x48xf32> to vector<48xf32>
    %84 = vector.shape_cast %83 : vector<48xf32> to vector<48x1xf32>
    %85 = tpu.reciprocal %84 {approx = true} : vector<48x1xf32> -> vector<48x1xf32>
    %86 = vector.broadcast %85 : vector<48x1xf32> to vector<48x48xf32>
    %87 = arith.mulf %82, %86 : vector<48x48xf32>
    %88 = arith.truncf %87 : vector<48x48xf32> to vector<48x48xbf16>
    %89 = arith.truncf %68 : vector<48x8xf32> to vector<48x8xbf16>
    %cst_36 = arith.constant dense<0.000000e+00> : vector<48x8xf32>
    %90 = tpu.matmul %88, %89, %cst_36 {dimension_numbers = #tpu.dot_dimension_numbers<[1], [0], [0], [1], [0, 0, 1, 1], [], []>} : vector<48x48xbf16>, vector<48x8xbf16>, vector<48x8xf32> -> vector<48x8xf32>
    %91 = vector.extract_strided_slice %15 {offsets = [0, 24], sizes = [48, 8], strides = [1, 1]} : vector<48x96xf32> to vector<48x8xf32>
    %92 = vector.extract_strided_slice %15 {offsets = [0, 56], sizes = [48, 8], strides = [1, 1]} : vector<48x96xf32> to vector<48x8xf32>
    %93 = vector.extract_strided_slice %15 {offsets = [0, 88], sizes = [48, 8], strides = [1, 1]} : vector<48x96xf32> to vector<48x8xf32>
    %94 = arith.truncf %91 : vector<48x8xf32> to vector<48x8xbf16>
    %95 = arith.truncf %92 : vector<48x8xf32> to vector<48x8xbf16>
    %cst_37 = arith.constant dense<0.000000e+00> : vector<48x48xf32>
    %96 = tpu.matmul %94, %95, %cst_37 {dimension_numbers = #tpu.dot_dimension_numbers<[1], [1], [0], [0], [0, 0, 1, 0], [], []>} : vector<48x8xbf16>, vector<48x8xbf16>, vector<48x48xf32> -> vector<48x48xf32>
    %cst_38 = arith.constant 0.353553385 : f32
    %97 = vector.broadcast %cst_38 : f32 to vector<48x48xf32>
    %98 = arith.mulf %96, %97 : vector<48x48xf32>
    %c3 = arith.constant 3 : index
    %c0_39 = arith.constant 0 : index
    %c0_40 = arith.constant 0 : index
    %99 = vector.load %arg15[%c3, %c0_39, %c0_40] : memref<4x48x48xf32, #tpu.memory_space<vmem>>, vector<1x48x48xf32>
    %100 = vector.shape_cast %99 : vector<1x48x48xf32> to vector<48x48xf32>
    %101 = vector.shape_cast %98 : vector<48x48xf32> to vector<1x48x48xf32>
    tpu.vector_store %arg15[%c3, %c0_39, %c0_40], %101 {strides = array<i32>} : memref<4x48x48xf32, #tpu.memory_space<vmem>>, vector<1x48x48xf32>,
    %102 = arith.addf %98, %2 : vector<48x48xf32>
    %cst_41 = arith.constant dense<0xFF800000> : vector<48xf32>
    %103 = vector.multi_reduction <maximumf>, %102, %cst_41 [1] : vector<48x48xf32> to vector<48xf32>
    %104 = vector.shape_cast %103 : vector<48xf32> to vector<48x1xf32>
    %105 = vector.broadcast %104 : vector<48x1xf32> to vector<48x48xf32>
    %106 = arith.subf %102, %105 : vector<48x48xf32>
    %107 = math.exp %106 : vector<48x48xf32>
    %cst_42 = arith.constant dense<0.000000e+00> : vector<48xf32>
    %108 = vector.multi_reduction <add>, %107, %cst_42 [1] : vector<48x48xf32> to vector<48xf32>
    %109 = vector.shape_cast %108 : vector<48xf32> to vector<48x1xf32>
    %110 = tpu.reciprocal %109 {approx = true} : vector<48x1xf32> -> vector<48x1xf32>
    %111 = vector.broadcast %110 : vector<48x1xf32> to vector<48x48xf32>
    %112 = arith.mulf %107, %111 : vector<48x48xf32>
    %113 = arith.truncf %112 : vector<48x48xf32> to vector<48x48xbf16>
    %114 = arith.truncf %93 : vector<48x8xf32> to vector<48x8xbf16>
    %cst_43 = arith.constant dense<0.000000e+00> : vector<48x8xf32>
    %115 = tpu.matmul %113, %114, %cst_43 {dimension_numbers = #tpu.dot_dimension_numbers<[1], [0], [0], [1], [0, 0, 1, 1], [], []>} : vector<48x48xbf16>, vector<48x8xbf16>, vector<48x8xf32> -> vector<48x8xf32>
    %116 = tpu.concatenate %40, %65, %90, %115 in 1 : vector<48x8xf32>, vector<48x8xf32>, vector<48x8xf32>, vector<48x8xf32> -> vector<48x32xf32>
    %117 = arith.truncf %116 : vector<48x32xf32> to vector<48x32xbf16>
    %c0_44 = arith.constant 0 : index
    %c0_45 = arith.constant 0 : index
    %c0_46 = arith.constant 0 : index
    %118 = vector.load %arg7[%c0_44, %c0_45, %c0_46] : memref<2x32x32xbf16, #tpu.memory_space<vmem>>, vector<1x32x32xbf16>
    %119 = vector.shape_cast %118 : vector<1x32x32xbf16> to vector<32x32xbf16>
    %cst_47 = arith.constant dense<0.000000e+00> : vector<48x32xf32>
    %120 = tpu.matmul %117, %119, %cst_47 {dimension_numbers = #tpu.dot_dimension_numbers<[1], [0], [0], [1], [0, 0, 1, 1], [], []>} : vector<48x32xbf16>, vector<32x32xbf16>, vector<48x32xf32> -> vector<48x32xf32>
    %c0_48 = arith.constant 0 : index
    %c0_49 = arith.constant 0 : index
    %c0_50 = arith.constant 0 : index
    %121 = vector.load %arg8[%c0_48, %c0_49, %c0_50] : memref<2x6x32xf32, #tpu.memory_space<vmem>>, vector<1x6x32xf32>
    %122 = vector.shape_cast %121 : vector<1x6x32xf32> to vector<6x32xf32>
    %123 = arith.addf %7, %120 : vector<48x32xf32>
    %124 = vector.extract_strided_slice %122 {offsets = [0, 0], sizes = [1, 32], strides = [1, 1]} : vector<6x32xf32> to vector<1x32xf32>
    %125 = vector.broadcast %124 : vector<1x32xf32> to vector<48x32xf32>
    %126 = arith.addf %123, %125 : vector<48x32xf32>
    %127 = vector.extract_strided_slice %122 {offsets = [1, 0], sizes = [1, 32], strides = [1, 1]} : vector<6x32xf32> to vector<1x32xf32>
    %128 = vector.broadcast %127 : vector<1x32xf32> to vector<48x32xf32>
    %129 = arith.mulf %126, %128 : vector<48x32xf32>
    %130 = vector.extract_strided_slice %122 {offsets = [2, 0], sizes = [1, 32], strides = [1, 1]} : vector<6x32xf32> to vector<1x32xf32>
    %131 = vector.broadcast %130 : vector<1x32xf32> to vector<48x32xf32>
    %132 = arith.addf %129, %131 : vector<48x32xf32>
    %133 = arith.truncf %132 : vector<48x32xf32> to vector<48x32xbf16>
    %c0_51 = arith.constant 0 : index
    %c0_52 = arith.constant 0 : index
    %c0_53 = arith.constant 0 : index
    %134 = vector.load %arg9[%c0_51, %c0_52, %c0_53] : memref<2x32x64xbf16, #tpu.memory_space<vmem>>, vector<1x32x64xbf16>
    %135 = vector.shape_cast %134 : vector<1x32x64xbf16> to vector<32x64xbf16>
    %cst_54 = arith.constant dense<0.000000e+00> : vector<48x64xf32>
    %136 = tpu.matmul %133, %135, %cst_54 {dimension_numbers = #tpu.dot_dimension_numbers<[1], [0], [0], [1], [0, 0, 1, 1], [], []>} : vector<48x32xbf16>, vector<32x64xbf16>, vector<48x64xf32> -> vector<48x64xf32>
    %c0_55 = arith.constant 0 : index
    %c0_56 = arith.constant 0 : index
    %c0_57 = arith.constant 0 : index
    %137 = vector.load %arg10[%c0_55, %c0_56, %c0_57] : memref<2x1x64xf32, #tpu.memory_space<vmem>>, vector<1x1x64xf32>
    %138 = vector.shape_cast %137 : vector<1x1x64xf32> to vector<1x64xf32>
    %139 = vector.broadcast %138 : vector<1x64xf32> to vector<48x64xf32>
    %140 = arith.addf %136, %139 : vector<48x64xf32>
    %141 = arith.mulf %140, %140 : vector<48x64xf32>
    %142 = arith.mulf %140, %141 : vector<48x64xf32>
    %cst_58 = arith.constant 4.471500e-02 : f32
    %143 = vector.broadcast %cst_58 : f32 to vector<48x64xf32>
    %144 = arith.mulf %143, %142 : vector<48x64xf32>
    %145 = arith.addf %140, %144 : vector<48x64xf32>
    %cst_59 = arith.constant 0.797884583 : f32
    %146 = vector.broadcast %cst_59 : f32 to vector<48x64xf32>
    %147 = arith.mulf %146, %145 : vector<48x64xf32>
    %148 = math.tanh %147 : vector<48x64xf32>
    %cst_60 = arith.constant 1.000000e+00 : f32
    %149 = vector.broadcast %cst_60 : f32 to vector<48x64xf32>
    %150 = arith.addf %149, %148 : vector<48x64xf32>
    %cst_61 = arith.constant 5.000000e-01 : f32
    %151 = vector.broadcast %cst_61 : f32 to vector<48x64xf32>
    %152 = arith.mulf %151, %150 : vector<48x64xf32>
    %153 = arith.mulf %140, %152 : vector<48x64xf32>
    %154 = arith.truncf %153 : vector<48x64xf32> to vector<48x64xbf16>
    %c0_62 = arith.constant 0 : index
    %c0_63 = arith.constant 0 : index
    %c0_64 = arith.constant 0 : index
    %155 = vector.load %arg11[%c0_62, %c0_63, %c0_64] : memref<2x64x32xbf16, #tpu.memory_space<vmem>>, vector<1x64x32xbf16>
    %156 = vector.shape_cast %155 : vector<1x64x32xbf16> to vector<64x32xbf16>
    %cst_65 = arith.constant dense<0.000000e+00> : vector<48x32xf32>
    %157 = tpu.matmul %154, %156, %cst_65 {dimension_numbers = #tpu.dot_dimension_numbers<[1], [0], [0], [1], [0, 0, 1, 1], [], []>} : vector<48x64xbf16>, vector<64x32xbf16>, vector<48x32xf32> -> vector<48x32xf32>
    %158 = arith.addf %132, %157 : vector<48x32xf32>
    %159 = vector.extract_strided_slice %122 {offsets = [3, 0], sizes = [1, 32], strides = [1, 1]} : vector<6x32xf32> to vector<1x32xf32>
    %160 = vector.broadcast %159 : vector<1x32xf32> to vector<48x32xf32>
    %161 = arith.addf %158, %160 : vector<48x32xf32>
    %162 = vector.extract_strided_slice %122 {offsets = [4, 0], sizes = [1, 32], strides = [1, 1]} : vector<6x32xf32> to vector<1x32xf32>
    %163 = vector.broadcast %162 : vector<1x32xf32> to vector<48x32xf32>
    %164 = arith.mulf %161, %163 : vector<48x32xf32>
    %165 = vector.extract_strided_slice %122 {offsets = [5, 0], sizes = [1, 32], strides = [1, 1]} : vector<6x32xf32> to vector<1x32xf32>
    %166 = vector.broadcast %165 : vector<1x32xf32> to vector<48x32xf32>
    %167 = arith.addf %164, %166 : vector<48x32xf32>
    %168 = arith.truncf %167 : vector<48x32xf32> to vector<48x32xbf16>
    %c1_66 = arith.constant 1 : index
    %c0_67 = arith.constant 0 : index
    %c0_68 = arith.constant 0 : index
    %169 = vector.load %arg5[%c1_66, %c0_67, %c0_68] : memref<2x32x96xbf16, #tpu.memory_space<vmem>>, vector<1x32x96xbf16>
    %170 = vector.shape_cast %169 : vector<1x32x96xbf16> to vector<32x96xbf16>
    %cst_69 = arith.constant dense<0.000000e+00> : vector<48x96xf32>
    %171 = tpu.matmul %168, %170, %cst_69 {dimension_numbers = #tpu.dot_dimension_numbers<[1], [0], [0], [1], [0, 0, 1, 1], [], []>} : vector<48x32xbf16>, vector<32x96xbf16>, vector<48x96xf32> -> vector<48x96xf32>
    %c1_70 = arith.constant 1 : index
    %c0_71 = arith.constant 0 : index
    %c0_72 = arith.constant 0 : index
    %172 = vector.load %arg6[%c1_70, %c0_71, %c0_72] : memref<2x1x96xf32, #tpu.memory_space<vmem>>, vector<1x1x96xf32>
    %173 = vector.shape_cast %172 : vector<1x1x96xf32> to vector<1x96xf32>
    %174 = vector.broadcast %173 : vector<1x96xf32> to vector<48x96xf32>
    %175 = arith.addf %171, %174 : vector<48x96xf32>
    %176 = vector.extract_strided_slice %175 {offsets = [0, 0], sizes = [48, 8], strides = [1, 1]} : vector<48x96xf32> to vector<48x8xf32>
    %177 = vector.extract_strided_slice %175 {offsets = [0, 32], sizes = [48, 8], strides = [1, 1]} : vector<48x96xf32> to vector<48x8xf32>
    %178 = vector.extract_strided_slice %175 {offsets = [0, 64], sizes = [48, 8], strides = [1, 1]} : vector<48x96xf32> to vector<48x8xf32>
    %179 = arith.truncf %176 : vector<48x8xf32> to vector<48x8xbf16>
    %180 = arith.truncf %177 : vector<48x8xf32> to vector<48x8xbf16>
    %cst_73 = arith.constant dense<0.000000e+00> : vector<48x48xf32>
    %181 = tpu.matmul %179, %180, %cst_73 {dimension_numbers = #tpu.dot_dimension_numbers<[1], [1], [0], [0], [0, 0, 1, 0], [], []>} : vector<48x8xbf16>, vector<48x8xbf16>, vector<48x48xf32> -> vector<48x48xf32>
    %cst_74 = arith.constant 0.353553385 : f32
    %182 = vector.broadcast %cst_74 : f32 to vector<48x48xf32>
    %183 = arith.mulf %181, %182 : vector<48x48xf32>
    %c0_75 = arith.constant 0 : index
    %c0_76 = arith.constant 0 : index
    %c0_77 = arith.constant 0 : index
    %184 = vector.load %arg15[%c0_75, %c0_76, %c0_77] : memref<4x48x48xf32, #tpu.memory_space<vmem>>, vector<1x48x48xf32>
    %185 = vector.shape_cast %184 : vector<1x48x48xf32> to vector<48x48xf32>
    %186 = arith.addf %183, %185 : vector<48x48xf32>
    %187 = arith.addf %186, %2 : vector<48x48xf32>
    %cst_78 = arith.constant dense<0xFF800000> : vector<48xf32>
    %188 = vector.multi_reduction <maximumf>, %187, %cst_78 [1] : vector<48x48xf32> to vector<48xf32>
    %189 = vector.shape_cast %188 : vector<48xf32> to vector<48x1xf32>
    %190 = vector.broadcast %189 : vector<48x1xf32> to vector<48x48xf32>
    %191 = arith.subf %187, %190 : vector<48x48xf32>
    %192 = math.exp %191 : vector<48x48xf32>
    %cst_79 = arith.constant dense<0.000000e+00> : vector<48xf32>
    %193 = vector.multi_reduction <add>, %192, %cst_79 [1] : vector<48x48xf32> to vector<48xf32>
    %194 = vector.shape_cast %193 : vector<48xf32> to vector<48x1xf32>
    %195 = tpu.reciprocal %194 {approx = true} : vector<48x1xf32> -> vector<48x1xf32>
    %196 = vector.broadcast %195 : vector<48x1xf32> to vector<48x48xf32>
    %197 = arith.mulf %192, %196 : vector<48x48xf32>
    %198 = arith.truncf %197 : vector<48x48xf32> to vector<48x48xbf16>
    %199 = arith.truncf %178 : vector<48x8xf32> to vector<48x8xbf16>
    %cst_80 = arith.constant dense<0.000000e+00> : vector<48x8xf32>
    %200 = tpu.matmul %198, %199, %cst_80 {dimension_numbers = #tpu.dot_dimension_numbers<[1], [0], [0], [1], [0, 0, 1, 1], [], []>} : vector<48x48xbf16>, vector<48x8xbf16>, vector<48x8xf32> -> vector<48x8xf32>
    %201 = vector.extract_strided_slice %175 {offsets = [0, 8], sizes = [48, 8], strides = [1, 1]} : vector<48x96xf32> to vector<48x8xf32>
    %202 = vector.extract_strided_slice %175 {offsets = [0, 40], sizes = [48, 8], strides = [1, 1]} : vector<48x96xf32> to vector<48x8xf32>
    %203 = vector.extract_strided_slice %175 {offsets = [0, 72], sizes = [48, 8], strides = [1, 1]} : vector<48x96xf32> to vector<48x8xf32>
    %204 = arith.truncf %201 : vector<48x8xf32> to vector<48x8xbf16>
    %205 = arith.truncf %202 : vector<48x8xf32> to vector<48x8xbf16>
    %cst_81 = arith.constant dense<0.000000e+00> : vector<48x48xf32>
    %206 = tpu.matmul %204, %205, %cst_81 {dimension_numbers = #tpu.dot_dimension_numbers<[1], [1], [0], [0], [0, 0, 1, 0], [], []>} : vector<48x8xbf16>, vector<48x8xbf16>, vector<48x48xf32> -> vector<48x48xf32>
    %cst_82 = arith.constant 0.353553385 : f32
    %207 = vector.broadcast %cst_82 : f32 to vector<48x48xf32>
    %208 = arith.mulf %206, %207 : vector<48x48xf32>
    %c1_83 = arith.constant 1 : index
    %c0_84 = arith.constant 0 : index
    %c0_85 = arith.constant 0 : index
    %209 = vector.load %arg15[%c1_83, %c0_84, %c0_85] : memref<4x48x48xf32, #tpu.memory_space<vmem>>, vector<1x48x48xf32>
    %210 = vector.shape_cast %209 : vector<1x48x48xf32> to vector<48x48xf32>
    %211 = arith.addf %208, %210 : vector<48x48xf32>
    %212 = arith.addf %211, %2 : vector<48x48xf32>
    %cst_86 = arith.constant dense<0xFF800000> : vector<48xf32>
    %213 = vector.multi_reduction <maximumf>, %212, %cst_86 [1] : vector<48x48xf32> to vector<48xf32>
    %214 = vector.shape_cast %213 : vector<48xf32> to vector<48x1xf32>
    %215 = vector.broadcast %214 : vector<48x1xf32> to vector<48x48xf32>
    %216 = arith.subf %212, %215 : vector<48x48xf32>
    %217 = math.exp %216 : vector<48x48xf32>
    %cst_87 = arith.constant dense<0.000000e+00> : vector<48xf32>
    %218 = vector.multi_reduction <add>, %217, %cst_87 [1] : vector<48x48xf32> to vector<48xf32>
    %219 = vector.shape_cast %218 : vector<48xf32> to vector<48x1xf32>
    %220 = tpu.reciprocal %219 {approx = true} : vector<48x1xf32> -> vector<48x1xf32>
    %221 = vector.broadcast %220 : vector<48x1xf32> to vector<48x48xf32>
    %222 = arith.mulf %217, %221 : vector<48x48xf32>
    %223 = arith.truncf %222 : vector<48x48xf32> to vector<48x48xbf16>
    %224 = arith.truncf %203 : vector<48x8xf32> to vector<48x8xbf16>
    %cst_88 = arith.constant dense<0.000000e+00> : vector<48x8xf32>
    %225 = tpu.matmul %223, %224, %cst_88 {dimension_numbers = #tpu.dot_dimension_numbers<[1], [0], [0], [1], [0, 0, 1, 1], [], []>} : vector<48x48xbf16>, vector<48x8xbf16>, vector<48x8xf32> -> vector<48x8xf32>
    %226 = vector.extract_strided_slice %175 {offsets = [0, 16], sizes = [48, 8], strides = [1, 1]} : vector<48x96xf32> to vector<48x8xf32>
    %227 = vector.extract_strided_slice %175 {offsets = [0, 48], sizes = [48, 8], strides = [1, 1]} : vector<48x96xf32> to vector<48x8xf32>
    %228 = vector.extract_strided_slice %175 {offsets = [0, 80], sizes = [48, 8], strides = [1, 1]} : vector<48x96xf32> to vector<48x8xf32>
    %229 = arith.truncf %226 : vector<48x8xf32> to vector<48x8xbf16>
    %230 = arith.truncf %227 : vector<48x8xf32> to vector<48x8xbf16>
    %cst_89 = arith.constant dense<0.000000e+00> : vector<48x48xf32>
    %231 = tpu.matmul %229, %230, %cst_89 {dimension_numbers = #tpu.dot_dimension_numbers<[1], [1], [0], [0], [0, 0, 1, 0], [], []>} : vector<48x8xbf16>, vector<48x8xbf16>, vector<48x48xf32> -> vector<48x48xf32>
    %cst_90 = arith.constant 0.353553385 : f32
    %232 = vector.broadcast %cst_90 : f32 to vector<48x48xf32>
    %233 = arith.mulf %231, %232 : vector<48x48xf32>
    %c2_91 = arith.constant 2 : index
    %c0_92 = arith.constant 0 : index
    %c0_93 = arith.constant 0 : index
    %234 = vector.load %arg15[%c2_91, %c0_92, %c0_93] : memref<4x48x48xf32, #tpu.memory_space<vmem>>, vector<1x48x48xf32>
    %235 = vector.shape_cast %234 : vector<1x48x48xf32> to vector<48x48xf32>
    %236 = arith.addf %233, %235 : vector<48x48xf32>
    %237 = arith.addf %236, %2 : vector<48x48xf32>
    %cst_94 = arith.constant dense<0xFF800000> : vector<48xf32>
    %238 = vector.multi_reduction <maximumf>, %237, %cst_94 [1] : vector<48x48xf32> to vector<48xf32>
    %239 = vector.shape_cast %238 : vector<48xf32> to vector<48x1xf32>
    %240 = vector.broadcast %239 : vector<48x1xf32> to vector<48x48xf32>
    %241 = arith.subf %237, %240 : vector<48x48xf32>
    %242 = math.exp %241 : vector<48x48xf32>
    %cst_95 = arith.constant dense<0.000000e+00> : vector<48xf32>
    %243 = vector.multi_reduction <add>, %242, %cst_95 [1] : vector<48x48xf32> to vector<48xf32>
    %244 = vector.shape_cast %243 : vector<48xf32> to vector<48x1xf32>
    %245 = tpu.reciprocal %244 {approx = true} : vector<48x1xf32> -> vector<48x1xf32>
    %246 = vector.broadcast %245 : vector<48x1xf32> to vector<48x48xf32>
    %247 = arith.mulf %242, %246 : vector<48x48xf32>
    %248 = arith.truncf %247 : vector<48x48xf32> to vector<48x48xbf16>
    %249 = arith.truncf %228 : vector<48x8xf32> to vector<48x8xbf16>
    %cst_96 = arith.constant dense<0.000000e+00> : vector<48x8xf32>
    %250 = tpu.matmul %248, %249, %cst_96 {dimension_numbers = #tpu.dot_dimension_numbers<[1], [0], [0], [1], [0, 0, 1, 1], [], []>} : vector<48x48xbf16>, vector<48x8xbf16>, vector<48x8xf32> -> vector<48x8xf32>
    %251 = vector.extract_strided_slice %175 {offsets = [0, 24], sizes = [48, 8], strides = [1, 1]} : vector<48x96xf32> to vector<48x8xf32>
    %252 = vector.extract_strided_slice %175 {offsets = [0, 56], sizes = [48, 8], strides = [1, 1]} : vector<48x96xf32> to vector<48x8xf32>
    %253 = vector.extract_strided_slice %175 {offsets = [0, 88], sizes = [48, 8], strides = [1, 1]} : vector<48x96xf32> to vector<48x8xf32>
    %254 = arith.truncf %251 : vector<48x8xf32> to vector<48x8xbf16>
    %255 = arith.truncf %252 : vector<48x8xf32> to vector<48x8xbf16>
    %cst_97 = arith.constant dense<0.000000e+00> : vector<48x48xf32>
    %256 = tpu.matmul %254, %255, %cst_97 {dimension_numbers = #tpu.dot_dimension_numbers<[1], [1], [0], [0], [0, 0, 1, 0], [], []>} : vector<48x8xbf16>, vector<48x8xbf16>, vector<48x48xf32> -> vector<48x48xf32>
    %cst_98 = arith.constant 0.353553385 : f32
    %257 = vector.broadcast %cst_98 : f32 to vector<48x48xf32>
    %258 = arith.mulf %256, %257 : vector<48x48xf32>
    %c3_99 = arith.constant 3 : index
    %c0_100 = arith.constant 0 : index
    %c0_101 = arith.constant 0 : index
    %259 = vector.load %arg15[%c3_99, %c0_100, %c0_101] : memref<4x48x48xf32, #tpu.memory_space<vmem>>, vector<1x48x48xf32>
    %260 = vector.shape_cast %259 : vector<1x48x48xf32> to vector<48x48xf32>
    %261 = arith.addf %258, %260 : vector<48x48xf32>
    %262 = arith.addf %261, %2 : vector<48x48xf32>
    %cst_102 = arith.constant dense<0xFF800000> : vector<48xf32>
    %263 = vector.multi_reduction <maximumf>, %262, %cst_102 [1] : vector<48x48xf32> to vector<48xf32>
    %264 = vector.shape_cast %263 : vector<48xf32> to vector<48x1xf32>
    %265 = vector.broadcast %264 : vector<48x1xf32> to vector<48x48xf32>
    %266 = arith.subf %262, %265 : vector<48x48xf32>
    %267 = math.exp %266 : vector<48x48xf32>
    %cst_103 = arith.constant dense<0.000000e+00> : vector<48xf32>
    %268 = vector.multi_reduction <add>, %267, %cst_103 [1] : vector<48x48xf32> to vector<48xf32>
    %269 = vector.shape_cast %268 : vector<48xf32> to vector<48x1xf32>
    %270 = tpu.reciprocal %269 {approx = true} : vector<48x1xf32> -> vector<48x1xf32>
    %271 = vector.broadcast %270 : vector<48x1xf32> to vector<48x48xf32>
    %272 = arith.mulf %267, %271 : vector<48x48xf32>
    %273 = arith.truncf %272 : vector<48x48xf32> to vector<48x48xbf16>
    %274 = arith.truncf %253 : vector<48x8xf32> to vector<48x8xbf16>
    %cst_104 = arith.constant dense<0.000000e+00> : vector<48x8xf32>
    %275 = tpu.matmul %273, %274, %cst_104 {dimension_numbers = #tpu.dot_dimension_numbers<[1], [0], [0], [1], [0, 0, 1, 1], [], []>} : vector<48x48xbf16>, vector<48x8xbf16>, vector<48x8xf32> -> vector<48x8xf32>
    %276 = tpu.concatenate %200, %225, %250, %275 in 1 : vector<48x8xf32>, vector<48x8xf32>, vector<48x8xf32>, vector<48x8xf32> -> vector<48x32xf32>
    %277 = arith.truncf %276 : vector<48x32xf32> to vector<48x32xbf16>
    %c1_105 = arith.constant 1 : index
    %c0_106 = arith.constant 0 : index
    %c0_107 = arith.constant 0 : index
    %278 = vector.load %arg7[%c1_105, %c0_106, %c0_107] : memref<2x32x32xbf16, #tpu.memory_space<vmem>>, vector<1x32x32xbf16>
    %279 = vector.shape_cast %278 : vector<1x32x32xbf16> to vector<32x32xbf16>
    %cst_108 = arith.constant dense<0.000000e+00> : vector<48x32xf32>
    %280 = tpu.matmul %277, %279, %cst_108 {dimension_numbers = #tpu.dot_dimension_numbers<[1], [0], [0], [1], [0, 0, 1, 1], [], []>} : vector<48x32xbf16>, vector<32x32xbf16>, vector<48x32xf32> -> vector<48x32xf32>
    %c1_109 = arith.constant 1 : index
    %c0_110 = arith.constant 0 : index
    %c0_111 = arith.constant 0 : index
    %281 = vector.load %arg8[%c1_109, %c0_110, %c0_111] : memref<2x6x32xf32, #tpu.memory_space<vmem>>, vector<1x6x32xf32>
    %282 = vector.shape_cast %281 : vector<1x6x32xf32> to vector<6x32xf32>
    %283 = arith.addf %167, %280 : vector<48x32xf32>
    %284 = vector.extract_strided_slice %282 {offsets = [0, 0], sizes = [1, 32], strides = [1, 1]} : vector<6x32xf32> to vector<1x32xf32>
    %285 = vector.broadcast %284 : vector<1x32xf32> to vector<48x32xf32>
    %286 = arith.addf %283, %285 : vector<48x32xf32>
    %287 = vector.extract_strided_slice %282 {offsets = [1, 0], sizes = [1, 32], strides = [1, 1]} : vector<6x32xf32> to vector<1x32xf32>
    %288 = vector.broadcast %287 : vector<1x32xf32> to vector<48x32xf32>
    %289 = arith.mulf %286, %288 : vector<48x32xf32>
    %290 = vector.extract_strided_slice %282 {offsets = [2, 0], sizes = [1, 32], strides = [1, 1]} : vector<6x32xf32> to vector<1x32xf32>
    %291 = vector.broadcast %290 : vector<1x32xf32> to vector<48x32xf32>
    %292 = arith.addf %289, %291 : vector<48x32xf32>
    %293 = arith.truncf %292 : vector<48x32xf32> to vector<48x32xbf16>
    %c1_112 = arith.constant 1 : index
    %c0_113 = arith.constant 0 : index
    %c0_114 = arith.constant 0 : index
    %294 = vector.load %arg9[%c1_112, %c0_113, %c0_114] : memref<2x32x64xbf16, #tpu.memory_space<vmem>>, vector<1x32x64xbf16>
    %295 = vector.shape_cast %294 : vector<1x32x64xbf16> to vector<32x64xbf16>
    %cst_115 = arith.constant dense<0.000000e+00> : vector<48x64xf32>
    %296 = tpu.matmul %293, %295, %cst_115 {dimension_numbers = #tpu.dot_dimension_numbers<[1], [0], [0], [1], [0, 0, 1, 1], [], []>} : vector<48x32xbf16>, vector<32x64xbf16>, vector<48x64xf32> -> vector<48x64xf32>
    %c1_116 = arith.constant 1 : index
    %c0_117 = arith.constant 0 : index
    %c0_118 = arith.constant 0 : index
    %297 = vector.load %arg10[%c1_116, %c0_117, %c0_118] : memref<2x1x64xf32, #tpu.memory_space<vmem>>, vector<1x1x64xf32>
    %298 = vector.shape_cast %297 : vector<1x1x64xf32> to vector<1x64xf32>
    %299 = vector.broadcast %298 : vector<1x64xf32> to vector<48x64xf32>
    %300 = arith.addf %296, %299 : vector<48x64xf32>
    %301 = arith.mulf %300, %300 : vector<48x64xf32>
    %302 = arith.mulf %300, %301 : vector<48x64xf32>
    %cst_119 = arith.constant 4.471500e-02 : f32
    %303 = vector.broadcast %cst_119 : f32 to vector<48x64xf32>
    %304 = arith.mulf %303, %302 : vector<48x64xf32>
    %305 = arith.addf %300, %304 : vector<48x64xf32>
    %cst_120 = arith.constant 0.797884583 : f32
    %306 = vector.broadcast %cst_120 : f32 to vector<48x64xf32>
    %307 = arith.mulf %306, %305 : vector<48x64xf32>
    %308 = math.tanh %307 : vector<48x64xf32>
    %cst_121 = arith.constant 1.000000e+00 : f32
    %309 = vector.broadcast %cst_121 : f32 to vector<48x64xf32>
    %310 = arith.addf %309, %308 : vector<48x64xf32>
    %cst_122 = arith.constant 5.000000e-01 : f32
    %311 = vector.broadcast %cst_122 : f32 to vector<48x64xf32>
    %312 = arith.mulf %311, %310 : vector<48x64xf32>
    %313 = arith.mulf %300, %312 : vector<48x64xf32>
    %314 = arith.truncf %313 : vector<48x64xf32> to vector<48x64xbf16>
    %c1_123 = arith.constant 1 : index
    %c0_124 = arith.constant 0 : index
    %c0_125 = arith.constant 0 : index
    %315 = vector.load %arg11[%c1_123, %c0_124, %c0_125] : memref<2x64x32xbf16, #tpu.memory_space<vmem>>, vector<1x64x32xbf16>
    %316 = vector.shape_cast %315 : vector<1x64x32xbf16> to vector<64x32xbf16>
    %cst_126 = arith.constant dense<0.000000e+00> : vector<48x32xf32>
    %317 = tpu.matmul %314, %316, %cst_126 {dimension_numbers = #tpu.dot_dimension_numbers<[1], [0], [0], [1], [0, 0, 1, 1], [], []>} : vector<48x64xbf16>, vector<64x32xbf16>, vector<48x32xf32> -> vector<48x32xf32>
    %318 = arith.addf %292, %317 : vector<48x32xf32>
    %319 = vector.extract_strided_slice %282 {offsets = [3, 0], sizes = [1, 32], strides = [1, 1]} : vector<6x32xf32> to vector<1x32xf32>
    %320 = vector.broadcast %319 : vector<1x32xf32> to vector<48x32xf32>
    %321 = arith.addf %318, %320 : vector<48x32xf32>
    %322 = vector.extract_strided_slice %282 {offsets = [4, 0], sizes = [1, 32], strides = [1, 1]} : vector<6x32xf32> to vector<1x32xf32>
    %323 = vector.broadcast %322 : vector<1x32xf32> to vector<48x32xf32>
    %324 = arith.mulf %321, %323 : vector<48x32xf32>
    %325 = vector.extract_strided_slice %282 {offsets = [5, 0], sizes = [1, 32], strides = [1, 1]} : vector<6x32xf32> to vector<1x32xf32>
    %326 = vector.broadcast %325 : vector<1x32xf32> to vector<48x32xf32>
    %327 = arith.addf %324, %326 : vector<48x32xf32>
    %328 = vector.extract_strided_slice %327 {offsets = [0, 0], sizes = [48, 1], strides = [1, 1]} : vector<48x32xf32> to vector<48x1xf32>
    %c0_127 = arith.constant 0 : index
    %c0_128 = arith.constant 0 : index
    %c0_129 = arith.constant 0 : index
    %329 = vector.load %arg12[%c0_127, %c0_128, %c0_129] : memref<32x48x12xf32, #tpu.memory_space<vmem>>, vector<1x48x12xf32>
    %330 = vector.shape_cast %329 : vector<1x48x12xf32> to vector<48x12xf32>
    %331 = vector.broadcast %328 : vector<48x1xf32> to vector<48x12xf32>
    %332 = arith.mulf %331, %330 : vector<48x12xf32>
    %333 = vector.extract_strided_slice %327 {offsets = [0, 1], sizes = [48, 1], strides = [1, 1]} : vector<48x32xf32> to vector<48x1xf32>
    %c1_130 = arith.constant 1 : index
    %c0_131 = arith.constant 0 : index
    %c0_132 = arith.constant 0 : index
    %334 = vector.load %arg12[%c1_130, %c0_131, %c0_132] : memref<32x48x12xf32, #tpu.memory_space<vmem>>, vector<1x48x12xf32>
    %335 = vector.shape_cast %334 : vector<1x48x12xf32> to vector<48x12xf32>
    %336 = vector.broadcast %333 : vector<48x1xf32> to vector<48x12xf32>
    %337 = arith.mulf %336, %335 : vector<48x12xf32>
    %338 = vector.extract_strided_slice %327 {offsets = [0, 2], sizes = [48, 1], strides = [1, 1]} : vector<48x32xf32> to vector<48x1xf32>
    %c2_133 = arith.constant 2 : index
    %c0_134 = arith.constant 0 : index
    %c0_135 = arith.constant 0 : index
    %339 = vector.load %arg12[%c2_133, %c0_134, %c0_135] : memref<32x48x12xf32, #tpu.memory_space<vmem>>, vector<1x48x12xf32>
    %340 = vector.shape_cast %339 : vector<1x48x12xf32> to vector<48x12xf32>
    %341 = vector.broadcast %338 : vector<48x1xf32> to vector<48x12xf32>
    %342 = arith.mulf %341, %340 : vector<48x12xf32>
    %343 = vector.extract_strided_slice %327 {offsets = [0, 3], sizes = [48, 1], strides = [1, 1]} : vector<48x32xf32> to vector<48x1xf32>
    %c3_136 = arith.constant 3 : index
    %c0_137 = arith.constant 0 : index
    %c0_138 = arith.constant 0 : index
    %344 = vector.load %arg12[%c3_136, %c0_137, %c0_138] : memref<32x48x12xf32, #tpu.memory_space<vmem>>, vector<1x48x12xf32>
    %345 = vector.shape_cast %344 : vector<1x48x12xf32> to vector<48x12xf32>
    %346 = vector.broadcast %343 : vector<48x1xf32> to vector<48x12xf32>
    %347 = arith.mulf %346, %345 : vector<48x12xf32>
    %348 = vector.extract_strided_slice %327 {offsets = [0, 4], sizes = [48, 1], strides = [1, 1]} : vector<48x32xf32> to vector<48x1xf32>
    %c4 = arith.constant 4 : index
    %c0_139 = arith.constant 0 : index
    %c0_140 = arith.constant 0 : index
    %349 = vector.load %arg12[%c4, %c0_139, %c0_140] : memref<32x48x12xf32, #tpu.memory_space<vmem>>, vector<1x48x12xf32>
    %350 = vector.shape_cast %349 : vector<1x48x12xf32> to vector<48x12xf32>
    %351 = vector.broadcast %348 : vector<48x1xf32> to vector<48x12xf32>
    %352 = arith.mulf %351, %350 : vector<48x12xf32>
    %353 = vector.extract_strided_slice %327 {offsets = [0, 5], sizes = [48, 1], strides = [1, 1]} : vector<48x32xf32> to vector<48x1xf32>
    %c5 = arith.constant 5 : index
    %c0_141 = arith.constant 0 : index
    %c0_142 = arith.constant 0 : index
    %354 = vector.load %arg12[%c5, %c0_141, %c0_142] : memref<32x48x12xf32, #tpu.memory_space<vmem>>, vector<1x48x12xf32>
    %355 = vector.shape_cast %354 : vector<1x48x12xf32> to vector<48x12xf32>
    %356 = vector.broadcast %353 : vector<48x1xf32> to vector<48x12xf32>
    %357 = arith.mulf %356, %355 : vector<48x12xf32>
    %358 = vector.extract_strided_slice %327 {offsets = [0, 6], sizes = [48, 1], strides = [1, 1]} : vector<48x32xf32> to vector<48x1xf32>
    %c6 = arith.constant 6 : index
    %c0_143 = arith.constant 0 : index
    %c0_144 = arith.constant 0 : index
    %359 = vector.load %arg12[%c6, %c0_143, %c0_144] : memref<32x48x12xf32, #tpu.memory_space<vmem>>, vector<1x48x12xf32>
    %360 = vector.shape_cast %359 : vector<1x48x12xf32> to vector<48x12xf32>
    %361 = vector.broadcast %358 : vector<48x1xf32> to vector<48x12xf32>
    %362 = arith.mulf %361, %360 : vector<48x12xf32>
    %363 = vector.extract_strided_slice %327 {offsets = [0, 7], sizes = [48, 1], strides = [1, 1]} : vector<48x32xf32> to vector<48x1xf32>
    %c7 = arith.constant 7 : index
    %c0_145 = arith.constant 0 : index
    %c0_146 = arith.constant 0 : index
    %364 = vector.load %arg12[%c7, %c0_145, %c0_146] : memref<32x48x12xf32, #tpu.memory_space<vmem>>, vector<1x48x12xf32>
    %365 = vector.shape_cast %364 : vector<1x48x12xf32> to vector<48x12xf32>
    %366 = vector.broadcast %363 : vector<48x1xf32> to vector<48x12xf32>
    %367 = arith.mulf %366, %365 : vector<48x12xf32>
    %368 = vector.extract_strided_slice %327 {offsets = [0, 8], sizes = [48, 1], strides = [1, 1]} : vector<48x32xf32> to vector<48x1xf32>
    %c8 = arith.constant 8 : index
    %c0_147 = arith.constant 0 : index
    %c0_148 = arith.constant 0 : index
    %369 = vector.load %arg12[%c8, %c0_147, %c0_148] : memref<32x48x12xf32, #tpu.memory_space<vmem>>, vector<1x48x12xf32>
    %370 = vector.shape_cast %369 : vector<1x48x12xf32> to vector<48x12xf32>
    %371 = vector.broadcast %368 : vector<48x1xf32> to vector<48x12xf32>
    %372 = arith.mulf %371, %370 : vector<48x12xf32>
    %373 = vector.extract_strided_slice %327 {offsets = [0, 9], sizes = [48, 1], strides = [1, 1]} : vector<48x32xf32> to vector<48x1xf32>
    %c9 = arith.constant 9 : index
    %c0_149 = arith.constant 0 : index
    %c0_150 = arith.constant 0 : index
    %374 = vector.load %arg12[%c9, %c0_149, %c0_150] : memref<32x48x12xf32, #tpu.memory_space<vmem>>, vector<1x48x12xf32>
    %375 = vector.shape_cast %374 : vector<1x48x12xf32> to vector<48x12xf32>
    %376 = vector.broadcast %373 : vector<48x1xf32> to vector<48x12xf32>
    %377 = arith.mulf %376, %375 : vector<48x12xf32>
    %378 = vector.extract_strided_slice %327 {offsets = [0, 10], sizes = [48, 1], strides = [1, 1]} : vector<48x32xf32> to vector<48x1xf32>
    %c10 = arith.constant 10 : index
    %c0_151 = arith.constant 0 : index
    %c0_152 = arith.constant 0 : index
    %379 = vector.load %arg12[%c10, %c0_151, %c0_152] : memref<32x48x12xf32, #tpu.memory_space<vmem>>, vector<1x48x12xf32>
    %380 = vector.shape_cast %379 : vector<1x48x12xf32> to vector<48x12xf32>
    %381 = vector.broadcast %378 : vector<48x1xf32> to vector<48x12xf32>
    %382 = arith.mulf %381, %380 : vector<48x12xf32>
    %383 = vector.extract_strided_slice %327 {offsets = [0, 11], sizes = [48, 1], strides = [1, 1]} : vector<48x32xf32> to vector<48x1xf32>
    %c11 = arith.constant 11 : index
    %c0_153 = arith.constant 0 : index
    %c0_154 = arith.constant 0 : index
    %384 = vector.load %arg12[%c11, %c0_153, %c0_154] : memref<32x48x12xf32, #tpu.memory_space<vmem>>, vector<1x48x12xf32>
    %385 = vector.shape_cast %384 : vector<1x48x12xf32> to vector<48x12xf32>
    %386 = vector.broadcast %383 : vector<48x1xf32> to vector<48x12xf32>
    %387 = arith.mulf %386, %385 : vector<48x12xf32>
    %388 = vector.extract_strided_slice %327 {offsets = [0, 12], sizes = [48, 1], strides = [1, 1]} : vector<48x32xf32> to vector<48x1xf32>
    %c12 = arith.constant 12 : index
    %c0_155 = arith.constant 0 : index
    %c0_156 = arith.constant 0 : index
    %389 = vector.load %arg12[%c12, %c0_155, %c0_156] : memref<32x48x12xf32, #tpu.memory_space<vmem>>, vector<1x48x12xf32>
    %390 = vector.shape_cast %389 : vector<1x48x12xf32> to vector<48x12xf32>
    %391 = vector.broadcast %388 : vector<48x1xf32> to vector<48x12xf32>
    %392 = arith.mulf %391, %390 : vector<48x12xf32>
    %393 = vector.extract_strided_slice %327 {offsets = [0, 13], sizes = [48, 1], strides = [1, 1]} : vector<48x32xf32> to vector<48x1xf32>
    %c13 = arith.constant 13 : index
    %c0_157 = arith.constant 0 : index
    %c0_158 = arith.constant 0 : index
    %394 = vector.load %arg12[%c13, %c0_157, %c0_158] : memref<32x48x12xf32, #tpu.memory_space<vmem>>, vector<1x48x12xf32>
    %395 = vector.shape_cast %394 : vector<1x48x12xf32> to vector<48x12xf32>
    %396 = vector.broadcast %393 : vector<48x1xf32> to vector<48x12xf32>
    %397 = arith.mulf %396, %395 : vector<48x12xf32>
    %398 = vector.extract_strided_slice %327 {offsets = [0, 14], sizes = [48, 1], strides = [1, 1]} : vector<48x32xf32> to vector<48x1xf32>
    %c14 = arith.constant 14 : index
    %c0_159 = arith.constant 0 : index
    %c0_160 = arith.constant 0 : index
    %399 = vector.load %arg12[%c14, %c0_159, %c0_160] : memref<32x48x12xf32, #tpu.memory_space<vmem>>, vector<1x48x12xf32>
    %400 = vector.shape_cast %399 : vector<1x48x12xf32> to vector<48x12xf32>
    %401 = vector.broadcast %398 : vector<48x1xf32> to vector<48x12xf32>
    %402 = arith.mulf %401, %400 : vector<48x12xf32>
    %403 = vector.extract_strided_slice %327 {offsets = [0, 15], sizes = [48, 1], strides = [1, 1]} : vector<48x32xf32> to vector<48x1xf32>
    %c15 = arith.constant 15 : index
    %c0_161 = arith.constant 0 : index
    %c0_162 = arith.constant 0 : index
    %404 = vector.load %arg12[%c15, %c0_161, %c0_162] : memref<32x48x12xf32, #tpu.memory_space<vmem>>, vector<1x48x12xf32>
    %405 = vector.shape_cast %404 : vector<1x48x12xf32> to vector<48x12xf32>
    %406 = vector.broadcast %403 : vector<48x1xf32> to vector<48x12xf32>
    %407 = arith.mulf %406, %405 : vector<48x12xf32>
    %408 = vector.extract_strided_slice %327 {offsets = [0, 16], sizes = [48, 1], strides = [1, 1]} : vector<48x32xf32> to vector<48x1xf32>
    %c16 = arith.constant 16 : index
    %c0_163 = arith.constant 0 : index
    %c0_164 = arith.constant 0 : index
    %409 = vector.load %arg12[%c16, %c0_163, %c0_164] : memref<32x48x12xf32, #tpu.memory_space<vmem>>, vector<1x48x12xf32>
    %410 = vector.shape_cast %409 : vector<1x48x12xf32> to vector<48x12xf32>
    %411 = vector.broadcast %408 : vector<48x1xf32> to vector<48x12xf32>
    %412 = arith.mulf %411, %410 : vector<48x12xf32>
    %413 = vector.extract_strided_slice %327 {offsets = [0, 17], sizes = [48, 1], strides = [1, 1]} : vector<48x32xf32> to vector<48x1xf32>
    %c17 = arith.constant 17 : index
    %c0_165 = arith.constant 0 : index
    %c0_166 = arith.constant 0 : index
    %414 = vector.load %arg12[%c17, %c0_165, %c0_166] : memref<32x48x12xf32, #tpu.memory_space<vmem>>, vector<1x48x12xf32>
    %415 = vector.shape_cast %414 : vector<1x48x12xf32> to vector<48x12xf32>
    %416 = vector.broadcast %413 : vector<48x1xf32> to vector<48x12xf32>
    %417 = arith.mulf %416, %415 : vector<48x12xf32>
    %418 = vector.extract_strided_slice %327 {offsets = [0, 18], sizes = [48, 1], strides = [1, 1]} : vector<48x32xf32> to vector<48x1xf32>
    %c18 = arith.constant 18 : index
    %c0_167 = arith.constant 0 : index
    %c0_168 = arith.constant 0 : index
    %419 = vector.load %arg12[%c18, %c0_167, %c0_168] : memref<32x48x12xf32, #tpu.memory_space<vmem>>, vector<1x48x12xf32>
    %420 = vector.shape_cast %419 : vector<1x48x12xf32> to vector<48x12xf32>
    %421 = vector.broadcast %418 : vector<48x1xf32> to vector<48x12xf32>
    %422 = arith.mulf %421, %420 : vector<48x12xf32>
    %423 = vector.extract_strided_slice %327 {offsets = [0, 19], sizes = [48, 1], strides = [1, 1]} : vector<48x32xf32> to vector<48x1xf32>
    %c19 = arith.constant 19 : index
    %c0_169 = arith.constant 0 : index
    %c0_170 = arith.constant 0 : index
    %424 = vector.load %arg12[%c19, %c0_169, %c0_170] : memref<32x48x12xf32, #tpu.memory_space<vmem>>, vector<1x48x12xf32>
    %425 = vector.shape_cast %424 : vector<1x48x12xf32> to vector<48x12xf32>
    %426 = vector.broadcast %423 : vector<48x1xf32> to vector<48x12xf32>
    %427 = arith.mulf %426, %425 : vector<48x12xf32>
    %428 = vector.extract_strided_slice %327 {offsets = [0, 20], sizes = [48, 1], strides = [1, 1]} : vector<48x32xf32> to vector<48x1xf32>
    %c20 = arith.constant 20 : index
    %c0_171 = arith.constant 0 : index
    %c0_172 = arith.constant 0 : index
    %429 = vector.load %arg12[%c20, %c0_171, %c0_172] : memref<32x48x12xf32, #tpu.memory_space<vmem>>, vector<1x48x12xf32>
    %430 = vector.shape_cast %429 : vector<1x48x12xf32> to vector<48x12xf32>
    %431 = vector.broadcast %428 : vector<48x1xf32> to vector<48x12xf32>
    %432 = arith.mulf %431, %430 : vector<48x12xf32>
    %433 = vector.extract_strided_slice %327 {offsets = [0, 21], sizes = [48, 1], strides = [1, 1]} : vector<48x32xf32> to vector<48x1xf32>
    %c21 = arith.constant 21 : index
    %c0_173 = arith.constant 0 : index
    %c0_174 = arith.constant 0 : index
    %434 = vector.load %arg12[%c21, %c0_173, %c0_174] : memref<32x48x12xf32, #tpu.memory_space<vmem>>, vector<1x48x12xf32>
    %435 = vector.shape_cast %434 : vector<1x48x12xf32> to vector<48x12xf32>
    %436 = vector.broadcast %433 : vector<48x1xf32> to vector<48x12xf32>
    %437 = arith.mulf %436, %435 : vector<48x12xf32>
    %438 = vector.extract_strided_slice %327 {offsets = [0, 22], sizes = [48, 1], strides = [1, 1]} : vector<48x32xf32> to vector<48x1xf32>
    %c22 = arith.constant 22 : index
    %c0_175 = arith.constant 0 : index
    %c0_176 = arith.constant 0 : index
    %439 = vector.load %arg12[%c22, %c0_175, %c0_176] : memref<32x48x12xf32, #tpu.memory_space<vmem>>, vector<1x48x12xf32>
    %440 = vector.shape_cast %439 : vector<1x48x12xf32> to vector<48x12xf32>
    %441 = vector.broadcast %438 : vector<48x1xf32> to vector<48x12xf32>
    %442 = arith.mulf %441, %440 : vector<48x12xf32>
    %443 = vector.extract_strided_slice %327 {offsets = [0, 23], sizes = [48, 1], strides = [1, 1]} : vector<48x32xf32> to vector<48x1xf32>
    %c23 = arith.constant 23 : index
    %c0_177 = arith.constant 0 : index
    %c0_178 = arith.constant 0 : index
    %444 = vector.load %arg12[%c23, %c0_177, %c0_178] : memref<32x48x12xf32, #tpu.memory_space<vmem>>, vector<1x48x12xf32>
    %445 = vector.shape_cast %444 : vector<1x48x12xf32> to vector<48x12xf32>
    %446 = vector.broadcast %443 : vector<48x1xf32> to vector<48x12xf32>
    %447 = arith.mulf %446, %445 : vector<48x12xf32>
    %448 = vector.extract_strided_slice %327 {offsets = [0, 24], sizes = [48, 1], strides = [1, 1]} : vector<48x32xf32> to vector<48x1xf32>
    %c24 = arith.constant 24 : index
    %c0_179 = arith.constant 0 : index
    %c0_180 = arith.constant 0 : index
    %449 = vector.load %arg12[%c24, %c0_179, %c0_180] : memref<32x48x12xf32, #tpu.memory_space<vmem>>, vector<1x48x12xf32>
    %450 = vector.shape_cast %449 : vector<1x48x12xf32> to vector<48x12xf32>
    %451 = vector.broadcast %448 : vector<48x1xf32> to vector<48x12xf32>
    %452 = arith.mulf %451, %450 : vector<48x12xf32>
    %453 = vector.extract_strided_slice %327 {offsets = [0, 25], sizes = [48, 1], strides = [1, 1]} : vector<48x32xf32> to vector<48x1xf32>
    %c25 = arith.constant 25 : index
    %c0_181 = arith.constant 0 : index
    %c0_182 = arith.constant 0 : index
    %454 = vector.load %arg12[%c25, %c0_181, %c0_182] : memref<32x48x12xf32, #tpu.memory_space<vmem>>, vector<1x48x12xf32>
    %455 = vector.shape_cast %454 : vector<1x48x12xf32> to vector<48x12xf32>
    %456 = vector.broadcast %453 : vector<48x1xf32> to vector<48x12xf32>
    %457 = arith.mulf %456, %455 : vector<48x12xf32>
    %458 = vector.extract_strided_slice %327 {offsets = [0, 26], sizes = [48, 1], strides = [1, 1]} : vector<48x32xf32> to vector<48x1xf32>
    %c26 = arith.constant 26 : index
    %c0_183 = arith.constant 0 : index
    %c0_184 = arith.constant 0 : index
    %459 = vector.load %arg12[%c26, %c0_183, %c0_184] : memref<32x48x12xf32, #tpu.memory_space<vmem>>, vector<1x48x12xf32>
    %460 = vector.shape_cast %459 : vector<1x48x12xf32> to vector<48x12xf32>
    %461 = vector.broadcast %458 : vector<48x1xf32> to vector<48x12xf32>
    %462 = arith.mulf %461, %460 : vector<48x12xf32>
    %463 = vector.extract_strided_slice %327 {offsets = [0, 27], sizes = [48, 1], strides = [1, 1]} : vector<48x32xf32> to vector<48x1xf32>
    %c27 = arith.constant 27 : index
    %c0_185 = arith.constant 0 : index
    %c0_186 = arith.constant 0 : index
    %464 = vector.load %arg12[%c27, %c0_185, %c0_186] : memref<32x48x12xf32, #tpu.memory_space<vmem>>, vector<1x48x12xf32>
    %465 = vector.shape_cast %464 : vector<1x48x12xf32> to vector<48x12xf32>
    %466 = vector.broadcast %463 : vector<48x1xf32> to vector<48x12xf32>
    %467 = arith.mulf %466, %465 : vector<48x12xf32>
    %468 = vector.extract_strided_slice %327 {offsets = [0, 28], sizes = [48, 1], strides = [1, 1]} : vector<48x32xf32> to vector<48x1xf32>
    %c28 = arith.constant 28 : index
    %c0_187 = arith.constant 0 : index
    %c0_188 = arith.constant 0 : index
    %469 = vector.load %arg12[%c28, %c0_187, %c0_188] : memref<32x48x12xf32, #tpu.memory_space<vmem>>, vector<1x48x12xf32>
    %470 = vector.shape_cast %469 : vector<1x48x12xf32> to vector<48x12xf32>
    %471 = vector.broadcast %468 : vector<48x1xf32> to vector<48x12xf32>
    %472 = arith.mulf %471, %470 : vector<48x12xf32>
    %473 = vector.extract_strided_slice %327 {offsets = [0, 29], sizes = [48, 1], strides = [1, 1]} : vector<48x32xf32> to vector<48x1xf32>
    %c29 = arith.constant 29 : index
    %c0_189 = arith.constant 0 : index
    %c0_190 = arith.constant 0 : index
    %474 = vector.load %arg12[%c29, %c0_189, %c0_190] : memref<32x48x12xf32, #tpu.memory_space<vmem>>, vector<1x48x12xf32>
    %475 = vector.shape_cast %474 : vector<1x48x12xf32> to vector<48x12xf32>
    %476 = vector.broadcast %473 : vector<48x1xf32> to vector<48x12xf32>
    %477 = arith.mulf %476, %475 : vector<48x12xf32>
    %478 = vector.extract_strided_slice %327 {offsets = [0, 30], sizes = [48, 1], strides = [1, 1]} : vector<48x32xf32> to vector<48x1xf32>
    %c30 = arith.constant 30 : index
    %c0_191 = arith.constant 0 : index
    %c0_192 = arith.constant 0 : index
    %479 = vector.load %arg12[%c30, %c0_191, %c0_192] : memref<32x48x12xf32, #tpu.memory_space<vmem>>, vector<1x48x12xf32>
    %480 = vector.shape_cast %479 : vector<1x48x12xf32> to vector<48x12xf32>
    %481 = vector.broadcast %478 : vector<48x1xf32> to vector<48x12xf32>
    %482 = arith.mulf %481, %480 : vector<48x12xf32>
    %483 = vector.extract_strided_slice %327 {offsets = [0, 31], sizes = [48, 1], strides = [1, 1]} : vector<48x32xf32> to vector<48x1xf32>
    %c31 = arith.constant 31 : index
    %c0_193 = arith.constant 0 : index
    %c0_194 = arith.constant 0 : index
    %484 = vector.load %arg12[%c31, %c0_193, %c0_194] : memref<32x48x12xf32, #tpu.memory_space<vmem>>, vector<1x48x12xf32>
    %485 = vector.shape_cast %484 : vector<1x48x12xf32> to vector<48x12xf32>
    %486 = vector.broadcast %483 : vector<48x1xf32> to vector<48x12xf32>
    %487 = arith.mulf %486, %485 : vector<48x12xf32>
    %488 = arith.addf %332, %337 : vector<48x12xf32>
    %489 = arith.addf %342, %347 : vector<48x12xf32>
    %490 = arith.addf %352, %357 : vector<48x12xf32>
    %491 = arith.addf %362, %367 : vector<48x12xf32>
    %492 = arith.addf %372, %377 : vector<48x12xf32>
    %493 = arith.addf %382, %387 : vector<48x12xf32>
    %494 = arith.addf %392, %397 : vector<48x12xf32>
    %495 = arith.addf %402, %407 : vector<48x12xf32>
    %496 = arith.addf %412, %417 : vector<48x12xf32>
    %497 = arith.addf %422, %427 : vector<48x12xf32>
    %498 = arith.addf %432, %437 : vector<48x12xf32>
    %499 = arith.addf %442, %447 : vector<48x12xf32>
    %500 = arith.addf %452, %457 : vector<48x12xf32>
    %501 = arith.addf %462, %467 : vector<48x12xf32>
    %502 = arith.addf %472, %477 : vector<48x12xf32>
    %503 = arith.addf %482, %487 : vector<48x12xf32>
    %504 = arith.addf %488, %489 : vector<48x12xf32>
    %505 = arith.addf %490, %491 : vector<48x12xf32>
    %506 = arith.addf %492, %493 : vector<48x12xf32>
    %507 = arith.addf %494, %495 : vector<48x12xf32>
    %508 = arith.addf %496, %497 : vector<48x12xf32>
    %509 = arith.addf %498, %499 : vector<48x12xf32>
    %510 = arith.addf %500, %501 : vector<48x12xf32>
    %511 = arith.addf %502, %503 : vector<48x12xf32>
    %512 = arith.addf %504, %505 : vector<48x12xf32>
    %513 = arith.addf %506, %507 : vector<48x12xf32>
    %514 = arith.addf %508, %509 : vector<48x12xf32>
    %515 = arith.addf %510, %511 : vector<48x12xf32>
    %516 = arith.addf %512, %513 : vector<48x12xf32>
    %517 = arith.addf %514, %515 : vector<48x12xf32>
    %518 = arith.addf %516, %517 : vector<48x12xf32>
    %519 = vector.extract_strided_slice %518 {offsets = [0, 0], sizes = [8, 12], strides = [1, 1]} : vector<48x12xf32> to vector<8x12xf32>
    %cst_195 = arith.constant dense<0.000000e+00> : vector<12xf32>
    %520 = vector.multi_reduction <add>, %519, %cst_195 [0] : vector<8x12xf32> to vector<12xf32>
    %521 = vector.shape_cast %520 : vector<12xf32> to vector<1x12xf32>
    %522 = vector.extract_strided_slice %518 {offsets = [8, 0], sizes = [8, 12], strides = [1, 1]} : vector<48x12xf32> to vector<8x12xf32>
    %cst_196 = arith.constant dense<0.000000e+00> : vector<12xf32>
    %523 = vector.multi_reduction <add>, %522, %cst_196 [0] : vector<8x12xf32> to vector<12xf32>
    %524 = vector.shape_cast %523 : vector<12xf32> to vector<1x12xf32>
    %525 = vector.extract_strided_slice %518 {offsets = [16, 0], sizes = [8, 12], strides = [1, 1]} : vector<48x12xf32> to vector<8x12xf32>
    %cst_197 = arith.constant dense<0.000000e+00> : vector<12xf32>
    %526 = vector.multi_reduction <add>, %525, %cst_197 [0] : vector<8x12xf32> to vector<12xf32>
    %527 = vector.shape_cast %526 : vector<12xf32> to vector<1x12xf32>
    %528 = vector.extract_strided_slice %518 {offsets = [24, 0], sizes = [8, 12], strides = [1, 1]} : vector<48x12xf32> to vector<8x12xf32>
    %cst_198 = arith.constant dense<0.000000e+00> : vector<12xf32>
    %529 = vector.multi_reduction <add>, %528, %cst_198 [0] : vector<8x12xf32> to vector<12xf32>
    %530 = vector.shape_cast %529 : vector<12xf32> to vector<1x12xf32>
    %531 = vector.extract_strided_slice %518 {offsets = [32, 0], sizes = [8, 12], strides = [1, 1]} : vector<48x12xf32> to vector<8x12xf32>
    %cst_199 = arith.constant dense<0.000000e+00> : vector<12xf32>
    %532 = vector.multi_reduction <add>, %531, %cst_199 [0] : vector<8x12xf32> to vector<12xf32>
    %533 = vector.shape_cast %532 : vector<12xf32> to vector<1x12xf32>
    %534 = vector.extract_strided_slice %518 {offsets = [40, 0], sizes = [8, 12], strides = [1, 1]} : vector<48x12xf32> to vector<8x12xf32>
    %cst_200 = arith.constant dense<0.000000e+00> : vector<12xf32>
    %535 = vector.multi_reduction <add>, %534, %cst_200 [0] : vector<8x12xf32> to vector<12xf32>
    %536 = vector.shape_cast %535 : vector<12xf32> to vector<1x12xf32>
    %537 = tpu.concatenate %521, %524, %527, %530, %533, %536 in 0 : vector<1x12xf32>, vector<1x12xf32>, vector<1x12xf32>, vector<1x12xf32>, vector<1x12xf32>, vector<1x12xf32> -> vector<6x12xf32>
    %c0_201 = arith.constant 0 : index
    %c0_202 = arith.constant 0 : index
    %538 = vector.load %arg13[%c0_201, %c0_202] : memref<6x12xf32, #tpu.memory_space<vmem>>, vector<6x12xf32>
    %539 = arith.addf %537, %538 : vector<6x12xf32>
    %c0_203 = arith.constant 0 : index
    %c0_204 = arith.constant 0 : index
    %c0_205 = arith.constant 0 : index
    %540 = vector.load %arg14[%c0_203, %c0_204, %c0_205] : memref<1x6x12xf32, #tpu.memory_space<vmem>>, vector<1x6x12xf32>
    %541 = vector.shape_cast %540 : vector<1x6x12xf32> to vector<6x12xf32>
    %542 = vector.shape_cast %539 : vector<6x12xf32> to vector<1x6x12xf32>
    tpu.vector_store %arg14[%c0_203, %c0_204, %c0_205], %542 {strides = array<i32>} : memref<1x6x12xf32, #tpu.memory_space<vmem>>, vector<1x6x12xf32>,
    return
  }
  func.func @transform_0(%arg0: i32) -> (i32, i32, i32) {
    %c0_i32 = arith.constant 0 : i32
    %c0_i32_0 = arith.constant 0 : i32
    %c0_i32_1 = arith.constant 0 : i32
    return %arg0, %c0_i32, %c0_i32_0 : i32, i32, i32
  }
  func.func @transform_1(%arg0: i32) -> (i32, i32) {
    %c0_i32 = arith.constant 0 : i32
    %c0_i32_0 = arith.constant 0 : i32
    %c0_i32_1 = arith.constant 0 : i32
    return %c0_i32, %c0_i32_0 : i32, i32
  }
  func.func @transform_2(%arg0: i32) -> (i32, i32) {
    %c0_i32 = arith.constant 0 : i32
    %c0_i32_0 = arith.constant 0 : i32
    %c0_i32_1 = arith.constant 0 : i32
    return %c0_i32, %c0_i32_0 : i32, i32
  }
  func.func @transform_3(%arg0: i32) -> (i32, i32) {
    %c0_i32 = arith.constant 0 : i32
    %c0_i32_0 = arith.constant 0 : i32
    %c0_i32_1 = arith.constant 0 : i32
    return %c0_i32, %c0_i32_0 : i32, i32
  }
  func.func @transform_4(%arg0: i32) -> (i32, i32, i32) {
    %c0_i32 = arith.constant 0 : i32
    %c0_i32_0 = arith.constant 0 : i32
    %c0_i32_1 = arith.constant 0 : i32
    %c0_i32_2 = arith.constant 0 : i32
    return %c0_i32, %c0_i32_0, %c0_i32_1 : i32, i32, i32
  }
  func.func @transform_5(%arg0: i32) -> (i32, i32, i32) {
    %c0_i32 = arith.constant 0 : i32
    %c0_i32_0 = arith.constant 0 : i32
    %c0_i32_1 = arith.constant 0 : i32
    %c0_i32_2 = arith.constant 0 : i32
    return %c0_i32, %c0_i32_0, %c0_i32_1 : i32, i32, i32
  }
  func.func @transform_6(%arg0: i32) -> (i32, i32, i32) {
    %c0_i32 = arith.constant 0 : i32
    %c0_i32_0 = arith.constant 0 : i32
    %c0_i32_1 = arith.constant 0 : i32
    %c0_i32_2 = arith.constant 0 : i32
    return %c0_i32, %c0_i32_0, %c0_i32_1 : i32, i32, i32
  }
  func.func @transform_7(%arg0: i32) -> (i32, i32, i32) {
    %c0_i32 = arith.constant 0 : i32
    %c0_i32_0 = arith.constant 0 : i32
    %c0_i32_1 = arith.constant 0 : i32
    %c0_i32_2 = arith.constant 0 : i32
    return %c0_i32, %c0_i32_0, %c0_i32_1 : i32, i32, i32
  }
  func.func @transform_8(%arg0: i32) -> (i32, i32, i32) {
    %c0_i32 = arith.constant 0 : i32
    %c0_i32_0 = arith.constant 0 : i32
    %c0_i32_1 = arith.constant 0 : i32
    %c0_i32_2 = arith.constant 0 : i32
    return %c0_i32, %c0_i32_0, %c0_i32_1 : i32, i32, i32
  }
  func.func @transform_9(%arg0: i32) -> (i32, i32, i32) {
    %c0_i32 = arith.constant 0 : i32
    %c0_i32_0 = arith.constant 0 : i32
    %c0_i32_1 = arith.constant 0 : i32
    %c0_i32_2 = arith.constant 0 : i32
    return %c0_i32, %c0_i32_0, %c0_i32_1 : i32, i32, i32
  }
  func.func @transform_10(%arg0: i32) -> (i32, i32, i32) {
    %c0_i32 = arith.constant 0 : i32
    %c0_i32_0 = arith.constant 0 : i32
    %c0_i32_1 = arith.constant 0 : i32
    %c0_i32_2 = arith.constant 0 : i32
    return %c0_i32, %c0_i32_0, %c0_i32_1 : i32, i32, i32
  }
  func.func @transform_11(%arg0: i32) -> (i32, i32, i32) {
    %c0_i32 = arith.constant 0 : i32
    %c0_i32_0 = arith.constant 0 : i32
    %c0_i32_1 = arith.constant 0 : i32
    %c0_i32_2 = arith.constant 0 : i32
    return %c0_i32, %c0_i32_0, %c0_i32_1 : i32, i32, i32
  }
  func.func @transform_12(%arg0: i32) -> (i32, i32) {
    %c0_i32 = arith.constant 0 : i32
    %c0_i32_0 = arith.constant 0 : i32
    %c0_i32_1 = arith.constant 0 : i32
    return %c0_i32, %c0_i32_0 : i32, i32
  }
  func.func @transform_13(%arg0: i32) -> (i32, i32, i32) {
    %c0_i32 = arith.constant 0 : i32
    %c0_i32_0 = arith.constant 0 : i32
    %c0_i32_1 = arith.constant 0 : i32
    return %arg0, %c0_i32, %c0_i32_0 : i32, i32, i32
  }
}

</mosaic_0001>

<bundles_post_ra>
// kernel: tpu_custom_call.1
= control target key start
LH: loop header
LB: loop body
LE: loop exit
PB: predicated region body
PF: predicated region fallthrough
CT: control target
= control target key end

     0   :  { %vm74_vm0 = vcmask 130048   ;;  %vm131_vm1 = vcmask 261120   ;;  %s4854_s20 = smov 96   ;;  %s4855_s21 = smov 88   ;;  %vm177_vm2 = vcmask 64512   ;;  %vm226_vm3 = vcmask 392192   ;;  %s7201_s3 = inlined_call_operand.vmem [shape: bf16[16,32], index: 3, kind: input, shape index: {}]   ;;  %s7202_s0 = inlined_call_operand.vmem [shape: f32[1,48,16], index: 0, kind: input, shape index: {}]   ;;  %s7203_s5 = inlined_call_operand.vmem [shape: f32[2,1,96], index: 5, kind: input, shape index: {}]   ;;  %s7204_s4 = inlined_call_operand.vmem [shape: bf16[2,32,96], index: 4, kind: input, shape index: {}]   ;;  %s7205_s2 = inlined_call_operand.vmem [shape: f32[48,32], index: 2, kind: input, shape index: {}]   ;;  %s7206_s1 = inlined_call_operand.vmem [shape: f32[48,48], index: 1, kind: input, shape index: {}]   ;;  %s7207_s6 = inlined_call_operand.vmem [shape: bf16[2,32,32], index: 6, kind: input, shape index: {}]   ;;  %s7208_s9 = inlined_call_operand.vmem [shape: f32[2,1,64], index: 9, kind: input, shape index: {}]   ;;  %s7209_s8 = inlined_call_operand.vmem [shape: bf16[2,32,64], index: 8, kind: input, shape index: {}]   ;;  %s7210_s7 = inlined_call_operand.vmem [shape: f32[2,6,32], index: 7, kind: input, shape index: {}]   ;;  %s7211_s10 = inlined_call_operand.vmem [shape: bf16[2,64,32], index: 10, kind: input, shape index: {}]   ;;  %s7212_s11 = inlined_call_operand.vmem [shape: f32[32,48,12], index: 11, kind: input, shape index: {}]   ;;  %s7213_s12 = inlined_call_operand.vmem [shape: f32[6,12], index: 12, kind: input, shape index: {}]   ;;  %s7214_s13 = inlined_call_operand.vmem [shape: f32[1,6,12], index: 13, kind: output, shape index: {}]  }
   0x1   :  { %v4277_v0 = vld [vmem:[%s7201_s3] sm:$0xff]  ;;  %v46_v2 = vld [vmem:[%s7202_s0 + $0x8] sm:$0xff]  ;;  %v47_v7 = vld [vmem:[%s7202_s0 + $0x10] sm:$0xff]  ;;  %s4856_s22 = smov 80   ;;  %s4857_s23 = smov 72   ;;  %vm986_vm4 = vcmask 195584  }
   0x2   :  { %v45_v1 = vld [vmem:[%s7202_s0] sm:$0xff]  ;;  %91 = vmatpush.bf16.msra.mxu0 %v4277_v0  ;;  %4298 = vmatpush.bf16.msra.mxu1 %v4277_v0  ;;  %v50_v5 = vld [vmem:[%s7202_s0 + $0x28] sm:$0xff]  ;;  %v48_v8 = vld [vmem:[%s7202_s0 + $0x18] sm:$0xff]  ;;  %s4858_s24 = smov 120   ;;  %s4859_s30 = smov 112   ;;  %vm1218_vm5 = vcmask 523264  }
   0x3   :  { %v57_v3 = vpack.c.bf16 %v46_v2, %v45_v1  ;;  %v49_v4 = vld [vmem:[%s7202_s0 + $0x20] sm:$0xff]  ;;  %v58_v9 = vpack.c.bf16 %v48_v8, %v47_v7  ;;  %v4279_v10 = vld [vmem:[%s7204_s4 + $0x8] sm:$0xff]  ;;  %v64_v20 = vld [vmem:[%s7205_s2 + $0x10] sm:$0xff]  ;;  %s4860_s19 = smov 104   ;;  %s4861_s25 = smov 56   ;;  %vm3848_vm6 = vcmask 97280  }
   0x4   :  { %v59_v6 = vpack.c.bf16 %v50_v5, %v49_v4  ;;  %v4278_v11 = vld [vmem:[%s7204_s4] sm:$0xff]  ;;  %v63_v14 = vld [vmem:[%s7205_s2 + $0x8] sm:$0xff]  ;;  %v65_v21 = vld [vmem:[%s7205_s2 + $0x18] sm:$0xff]  ;;  %s4862_s26 = smov 48   ;;  %s7221_s27 = smov 40   ;;  %vm3891_vm7 = vcmask 1040384  }
   0x5   :  { %3913 = vmatmul.msk.bf16.vlgmr.msra.gmra.mxu0 %vm74_vm0, %v57_v3  ;;  %v62_v13 = vld [vmem:[%s7205_s2] sm:$0xff]  ;;  %v67_v28 = vld [vmem:[%s7205_s2 + $0x28] sm:$0xff]  ;;  %s7219_s0 = smov 8   ;;  %s7217_s28 = smov 24   ;;  %vm3893_vm8 = vcmask 1041408   ;;  %vm3895_vm9 = vcmask 1042432  }
   0x6   :  { %3915 = vmatmul.msk.bf16.vlgmr.msra.gmra.mxu1 %vm74_vm0, %v59_v6  ;;  %v66_v27 = vld [vmem:[%s7205_s2 + $0x20] sm:$0xff]  ;;  %s4853_s2 = smov 64   ;;  %v5098_v6 = vld [vmem:[%s7206_s1 + $0x8] sm:$0xff]  ;;  %s7215_s29 = smov 16   ;;  %vm3897_vm10 = vcmask 1043456   ;;  %vm3899_vm11 = vcmask 1044480  }
   0x7   :  { %147 = vmatpush.bf16.msrb.mxu1 %v4279_v10  ;;  %v4627_v34 = vld [vmem:[%s7203_s5] ss:$0 sm:$0xff]  ;;  %s7231_s15 = smov 24   ;;  %s7232_s16 = smov 16   ;;  %vm3903_vm12 = vcmask 95232  }
   0x8   :  { %v5090_v1 = vld [vmem:[%s7206_s1] sm:$0xff] }
   0xb   :  { %148 = vmatpush.bf16.msrb.mxu1 %v4278_v11 }
  0x15   :  { %3914 = vmatmul.msk.bf16.gmra.mxu0 %vm74_vm0, %v58_v9 }
  0x82   :  { %v93_v12 = vpop.f32.mrf.mxu0 }
  0x83   :  { %v5005_v16 = vadd.f32 %v93_v12, %v62_v13  ;;  %v103_v25 = vpop.f32.mrf.mxu1  ;;  %v5107_v13 = vld [vmem:[%s7206_s1 + $0x18] sm:$0xff] }
  0x84   :  { %v5031_v30 = vadd.f32 %v103_v25, %v66_v27  ;;  %v5125_v25 = vld [vmem:[%s7206_s1 + $0x10] sm:$0xff] }
  0x8a   :  { %v95_v15 = vpop.f32.mrf.mxu0 }
  0x8b   :  { %v5007_v17 = vadd.f32 %v95_v15, %v63_v14  ;;  %v105_v29 = vpop.f32.mrf.mxu1 }
  0x8c   :  { %v5033_v31 = vadd.f32 %v105_v29, %v67_v28  ;;  %v5132_v28 = vld [vmem:[%s7206_s1 + $0x20] sm:$0xff] }
  0x8d   :  { %v108_v18 = vpack.c.bf16 %v5007_v17, %v5005_v16 }
  0x8e   :  { %v110_v32 = vpack.c.bf16 %v5033_v31, %v5031_v30 }
  0x8f   :  { %3924 = vmatmul.msk.bf16.vlgmr.msrb.gmra.mxu1 %vm131_vm1, %v108_v18 }
  0x92   :  { %v98_v19 = vpop.f32.mrf.mxu0 }
  0x93   :  { %v5018_v23 = vadd.f32 %v98_v19, %v64_v20 }
  0x9a   :  { %v100_v22 = vpop.f32.mrf.mxu0 }
  0x9b   :  { %v5020_v24 = vadd.f32 %v100_v22, %v65_v21 }
  0x9d   :  { %v109_v26 = vpack.c.bf16 %v5020_v24, %v5018_v23 }
  0x9f   :  { %3925 = vmatmul.msk.bf16.gmra.mxu1 %vm131_vm1, %v109_v26 }
  0xaf   :  { %3926 = vmatmul.msk.bf16.gmra.mxu1 %vm131_vm1, %v110_v32 }
 0x10c   :  { %v150_v33 = vpop.f32.mrf.mxu1 }
 0x10d   :  { %v151_v36 = vadd.f32 %v4627_v34, %v150_v33  ;;  %v5139_v33 = vld [vmem:[%s7206_s1 + $0x28] sm:$0xff] }
 0x114   :  { %v152_v35 = vpop.f32.mrf.mxu1 }
 0x115   :  { %v153_v37 = vadd.f32 %v4627_v34, %v152_v35 }
 0x117   :  { %v5041_v38 = vpack.c.bf16 %v153_v37, %v151_v36 }
 0x119   :  { %308 = vrot.lane.b32.xlu2 %v5041_v38, %s4853_s2  ;;  %171 = vrot.lane.b32.xlu1 %v5041_v38, %s4854_s20 }
 0x11c   :  { %v155_v39 = vpop.f32.mrf.mxu1 }
 0x11d   :  { %v156_v41 = vadd.f32 %v4627_v34, %v155_v39 }
 0x124   :  { %v157_v40 = vpop.f32.mrf.mxu1 }
 0x125   :  { %v158_v42 = vadd.f32 %v4627_v34, %v157_v40 }
 0x127   :  { %v5047_v43 = vpack.c.bf16 %v158_v42, %v156_v41 }
 0x129   :  { %358 = vrot.lane.b32.xlu1 %v5047_v43, %s4855_s21 }
 0x12c   :  { %v160_v44 = vpop.f32.mrf.mxu1 }
 0x12d   :  { %v161_v46 = vadd.f32 %v4627_v34, %v160_v44 }
 0x134   :  { %v162_v45 = vpop.f32.mrf.mxu1 }
 0x135   :  { %v163_v47 = vadd.f32 %v4627_v34, %v162_v45 }
 0x137   :  { %v5051_v48 = vpack.c.bf16 %v163_v47, %v161_v46 }
 0x139   :  { %175 = vrot.lane.b32.xlu0 %v5051_v48, %s4854_s20  ;;  %312 = vrot.lane.b32.xlu2 %v5051_v48, %s4853_s2 }
 0x13a   :  { %360 = vrot.lane.b32.xlu1 %v5051_v48, %s4855_s21 }
 0x141   :  { %173 = vrot.lane.b32.xlu0 %v5047_v43, %s4854_s20  ;;  %544 = vrot.lane.b32.xlu2 %v5051_v48, %s4856_s22 }
 0x149   :  { %310 = vrot.lane.b32.xlu0 %v5047_v43, %s4853_s2  ;;  %728 = vrot.lane.b32.xlu2 %v5051_v48, %s4857_s23 }
 0x151   :  { %352 = vrot.lane.b32.xlu0 %v5047_v43, %s4858_s24  ;;  %354 = vrot.lane.b32.xlu2 %v5051_v48, %s4858_s24 }
 0x159   :  { %540 = vrot.lane.b32.xlu0 %v5041_v38, %s4856_s22 }
 0x161   :  { %726 = vrot.lane.b32.xlu0 %v5047_v43, %s4857_s23 }
 0x173   :  { %v309_v49 = vpop.permute.xlu2 %308 }
 0x18b   :  { %v172_v51 = vpop.permute.xlu1 %171 }
 0x18c   :  { %v188_v61 = vsel %vm177_vm2, %v172_v51, 0 }
 0x193   :  { %v313_v50 = vpop.permute.xlu2 %312 }
 0x194   :  { %331 = vmatpush.bf16.msra.mxu3 %v313_v50 }
 0x19b   :  { %v359_v52 = vpop.permute.xlu1 %358  ;;  %v545_v62 = vpop.permute.xlu2 %544 }
 0x19c   :  { %v375_v59 = vsel %vm177_vm2, %v359_v52, 0  ;;  %v562_v63 = vsel %vm177_vm2, %v545_v62, 0 }
 0x1a3   :  { %v729_v36 = vpop.permute.xlu2 %728 }
 0x1ab   :  { %v176_v53 = vpop.permute.xlu0 %175  ;;  %v355_v39 = vpop.permute.xlu2 %354 }
 0x1ac   :  { %v361_v54 = vpop.permute.xlu1 %360  ;;  %v194_v55 = vsel %vm177_vm2, %v176_v53, 0 }
 0x1ad   :  { %201 = vmatpush.bf16.xpose.msra.mxu2 %v194_v55  ;;  %v378_v56 = vsel %vm177_vm2, %v361_v54, 0 }
 0x1ae   :  { %385 = vmatpush.bf16.xpose.msrb.mxu0 %v378_v56 }
 0x1b3   :  { %v174_v57 = vpop.permute.xlu0 %173 }
 0x1b4   :  { %v191_v58 = vsel %vm177_vm2, %v174_v57, 0 }
 0x1b5   :  { %202 = vmatpush.bf16.xpose.msra.mxu2 %v191_v58  ;;  %v746_v58 = vsel %vm177_vm2, %v729_v36, 0 }
 0x1b6   :  { %386 = vmatpush.bf16.xpose.msrb.mxu0 %v375_v59 }
 0x1bb   :  { %v311_v60 = vpop.permute.xlu0 %310 }
 0x1bc   :  { %332 = vmatpush.bf16.msra.mxu3 %v311_v60 }
 0x1bd   :  { %203 = vmatpush.bf16.xpose.msra.mxu2 %v188_v61 }
 0x1c0   :  { %333 = vmatpush.bf16.msra.mxu3 %v309_v49 }
 0x1c3   :  { %v353_v37 = vpop.permute.xlu0 %352 }
 0x1c4   :  { %569 = vmatpush.bf16.xpose.msrb.mxu3 %v562_v63  ;;  %3927 = vmatmul.msk.bf16.vlgmr.msra.gmra.mxu2 %vm177_vm2, %v5041_v38 }
 0x1cb   :  { %v541_v44 = vpop.permute.xlu0 %540 }
 0x1d3   :  { %v727_v51 = vpop.permute.xlu0 %726 }
 0x1d4   :  { %3928 = vmatmul.msk.bf16.gmra.mxu2 %vm177_vm2, %v5047_v43  ;;  %v743_v61 = vsel %vm177_vm2, %v727_v51, 0 }
 0x1e4   :  { %3929 = vmatmul.msk.bf16.gmra.mxu2 %vm177_vm2, %v5051_v48 }
 0x247   :  { %v205_v0 = vpop.f32.mrf.mxu2 }
 0x248   :  { %v220_v2 = vmul.f32 0.35355338, %v205_v0 }
 0x24a   :  { %227 = vst.msk [vmem:[#allocation2] sm:$0xff] %vm226_vm3, %v220_v2  ;;  %v233_v3 = vadd.f32 %v220_v2, %v5090_v1 }
 0x24c   :  { %v239_v4 = vsel %vm226_vm3, %v233_v3, -inf }
 0x24d   :  { %240 = vmax.xlane.f32.xlu1 %v239_v4 }
 0x24f   :  { %v207_v5 = vpop.f32.mrf.mxu2 }
 0x250   :  { %v221_v7 = vmul.f32 0.35355338, %v207_v5 }
 0x252   :  { %228 = vst.msk [vmem:[#allocation2 + $0x8] sm:$0xff] %vm226_vm3, %v221_v7  ;;  %v234_v8 = vadd.f32 %v221_v7, %v5098_v6 }
 0x254   :  { %v242_v9 = vsel %vm226_vm3, %v234_v8, -inf }
 0x255   :  { %243 = vmax.xlane.f32.xlu2 %v242_v9 }
 0x257   :  { %v210_v10 = vpop.f32.mrf.mxu2 }
 0x258   :  { %v222_v11 = vmul.f32 0.35355338, %v210_v10 }
 0x25a   :  { %229 = vst.msk [vmem:[#allocation2 + $0x10] sm:$0xff] %vm226_vm3, %v222_v11  ;;  %v235_v26 = vadd.f32 %v222_v11, %v5125_v25 }
 0x25c   :  { %v245_v27 = vsel %vm226_vm3, %v235_v26, -inf }
 0x25f   :  { %v212_v12 = vpop.f32.mrf.mxu2 }
 0x260   :  { %v223_v14 = vmul.f32 0.35355338, %v212_v12 }
 0x262   :  { %230 = vst.msk [vmem:[#allocation2 + $0x18] sm:$0xff] %vm226_vm3, %v223_v14  ;;  %v236_v15 = vadd.f32 %v223_v14, %v5107_v13 }
 0x264   :  { %v248_v18 = vsel %vm226_vm3, %v236_v15, -inf }
 0x265   :  { %249 = vmax.xlane.f32.xlu0 %v248_v18 }
 0x266   :  { %356 = vrot.lane.b32.xlu1 %v5041_v38, %s4855_s21 }
 0x267   :  { %v215_v19 = vpop.f32.mrf.mxu2 }
 0x268   :  { %v224_v20 = vmul.f32 0.35355338, %v215_v19 }
 0x26a   :  { %231 = vst.msk [vmem:[#allocation2 + $0x20] sm:$0xff] %vm226_vm3, %v224_v20  ;;  %v237_v29 = vadd.f32 %v224_v20, %v5132_v28 }
 0x26c   :  { %v251_v32 = vsel %vm226_vm3, %v237_v29, -inf }
 0x26d   :  { %534 = vrot.lane.b32.xlu2 %v5041_v38, %s4859_s30 }
 0x26e   :  { %350 = vrot.lane.b32.xlu1 %v5041_v38, %s4858_s24 }
 0x26f   :  { %v217_v21 = vpop.f32.mrf.mxu2 }
 0x270   :  { %v225_v22 = vmul.f32 0.35355338, %v217_v21 }
 0x272   :  { %232 = vst.msk [vmem:[#allocation2 + $0x28] sm:$0xff] %vm226_vm3, %v225_v22  ;;  %v5142_v34 = vadd.f32 %v225_v22, %v5139_v33 }
 0x274   :  { %v254_v35 = vsel %vm226_vm3, %v5142_v34, -inf }
 0x276   :  { %542 = vrot.lane.b32.xlu1 %v5047_v43, %s4856_s22 }
 0x296   :  { %246 = vmax.xlane.f32.xlu2 %v245_v27 }
 0x29e   :  { %252 = vmax.xlane.f32.xlu2 %v251_v32 }
 0x2a6   :  { %255 = vmax.xlane.f32.xlu2 %v254_v35 }
 0x2c0   :  { %v241_v40 = vpop.xlane.xlu1 %240 }
 0x2c1   :  { %v257_v41 = vsub.f32 %v233_v3, %v241_v40  ;;  %v556_v3 = vsel %vm177_vm2, %v541_v44, 0 }
 0x2c3   :  { %v263_v42 = vmul.f32 1.442695, %v257_v41 }
 0x2c5   :  { %4631 = vpow2.f32 %v263_v42 }
 0x2c8   :  { %v244_v45 = vpop.xlane.xlu2 %243 }
 0x2c9   :  { %v258_v46 = vsub.f32 %v234_v8, %v244_v45 }
 0x2cb   :  { %v5146_v47 = vpop.eup %4631  ;;  %v265_v49 = vmul.f32 1.442695, %v258_v46 }
 0x2cc   :  { %v275_v50 = vsel %vm226_vm3, %v5146_v47, 0.0 }
 0x2cd   :  { %4633 = vpow2.f32 %v265_v49  ;;  %276 = vadd.xlane.f32.xlu2 %v275_v50 }
 0x2d0   :  { %v5164_v4 = vpop.permute.xlu2 %534 }
 0x2d3   :  { %v4634_v52 = vpop.eup %4633 }
 0x2d4   :  { %v278_v53 = vsel %vm226_vm3, %v4634_v52, 0.0 }
 0x2d5   :  { %279 = vadd.xlane.f32.xlu2 %v278_v53 }
 0x2d8   :  { %v250_v54 = vpop.xlane.xlu0 %249  ;;  %v357_v55 = vpop.permute.xlu1 %356 }
 0x2d9   :  { %v260_v56 = vsub.f32 %v236_v15, %v250_v54  ;;  %v372_v57 = vsel %vm177_vm2, %v357_v55, 0 }
 0x2da   :  { %387 = vmatpush.bf16.xpose.msrb.mxu0 %v372_v57 }
 0x2db   :  { %v269_v59 = vmul.f32 1.442695, %v260_v56 }
 0x2dd   :  { %4635 = vpow2.f32 %v269_v59 }
 0x2e0   :  { %v351_v60 = vpop.permute.xlu1 %350 }
 0x2e1   :  { %3933 = vmatmul.msk.bf16.vlgmr.msrb.gmra.mxu0 %vm177_vm2, %v351_v60 }
 0x2e2   :  { %753 = vmatpush.bf16.xpose.msra.mxu0 %v746_v58 }
 0x2e3   :  { %v5155_v62 = vpop.eup %4635 }
 0x2e4   :  { %v284_v63 = vsel %vm226_vm3, %v5155_v62, 0.0 }
 0x2e5   :  { %285 = vadd.xlane.f32.xlu2 %v284_v63 }
 0x2e8   :  { %v543_v0 = vpop.permute.xlu1 %542 }
 0x2e9   :  { %v559_v2 = vsel %vm177_vm2, %v543_v0, 0 }
 0x2ea   :  { %754 = vmatpush.bf16.xpose.msra.mxu0 %v743_v61  ;;  %570 = vmatpush.bf16.xpose.msrb.mxu3 %v559_v2 }
 0x2f1   :  { %3934 = vmatmul.msk.bf16.gmra.mxu0 %vm177_vm2, %v353_v37 }
 0x2f2   :  { %571 = vmatpush.bf16.xpose.msrb.mxu3 %v556_v3 }
 0x2fd   :  { %536 = vrot.lane.b32.xlu2 %v5047_v43, %s4859_s30 }
 0x301   :  { %3935 = vmatmul.msk.bf16.gmra.mxu0 %vm177_vm2, %v355_v39 }
 0x305   :  { %722 = vrot.lane.b32.xlu2 %v5051_v48, %s4860_s19 }
 0x309   :  { %v247_v5 = vpop.xlane.xlu2 %246 }
 0x30a   :  { %v259_v7 = vsub.f32 %v235_v26, %v247_v5 }
 0x30c   :  { %v267_v8 = vmul.f32 1.442695, %v259_v7 }
 0x30e   :  { %4637 = vpow2.f32 %v267_v8 }
 0x311   :  { %v253_v9 = vpop.xlane.xlu2 %252 }
 0x312   :  { %v261_v10 = vsub.f32 %v237_v29, %v253_v9 }
 0x314   :  { %v5169_v11 = vpop.eup %4637  ;;  %v271_v12 = vmul.f32 1.442695, %v261_v10 }
 0x315   :  { %v281_v14 = vsel %vm226_vm3, %v5169_v11, 0.0 }
 0x316   :  { %4639 = vpow2.f32 %v271_v12  ;;  %282 = vadd.xlane.f32.xlu0 %v281_v14 }
 0x319   :  { %v256_v19 = vpop.xlane.xlu2 %255 }
 0x31a   :  { %v262_v21 = vsub.f32 %v5142_v34, %v256_v19 }
 0x31c   :  { %v5173_v15 = vpop.eup %4639  ;;  %v273_v22 = vmul.f32 1.442695, %v262_v21 }
 0x31d   :  { %v287_v18 = vsel %vm226_vm3, %v5173_v15, 0.0 }
 0x31e   :  { %288 = vadd.xlane.f32.xlu1 %v287_v18 }
 0x32a   :  { %724 = vrot.lane.b32.xlu0 %v5041_v38, %s4857_s23 }
 0x337   :  { %718 = vrot.lane.b32.xlu1 %v5041_v38, %s4860_s19 }
 0x33f   :  { %538 = vrot.lane.b32.xlu1 %v5051_v48, %s4859_s30 }
 0x340   :  { %v277_v20 = vpop.xlane.xlu2 %276 }
 0x341   :  { %4641 = vrcp.f32 %v277_v20 }
 0x347   :  { %v4642_v27 = vpop.eup %4641 }
 0x348   :  { %v280_v26 = vpop.xlane.xlu2 %279  ;;  %v299_v35 = vmul.f32 %v4642_v27, %v5146_v47 }
 0x349   :  { %4643 = vrcp.f32 %v280_v26 }
 0x34a   :  { %4645 = vpow2.f32 %v273_v22 }
 0x34f   :  { %v4644_v29 = vpop.eup %4643 }
 0x350   :  { %v5184_v32 = vpop.eup %4645  ;;  %v300_v36 = vmul.f32 %v4644_v29, %v4634_v52 }
 0x351   :  { %v290_v39 = vsel %vm226_vm3, %v5184_v32, 0.0 }
 0x352   :  { %v305_v37 = vpack.c.bf16 %v300_v36, %v299_v35 }
 0x354   :  { %291 = vadd.xlane.f32.xlu0 %v290_v39  ;;  %3930 = vmatmul.msk.bf16.vlgmr.msra.gmra.mxu3 %vm226_vm3, %v305_v37 }
 0x358   :  { %v286_v57 = vpop.xlane.xlu2 %285 }
 0x359   :  { %4647 = vrcp.f32 %v286_v57 }
 0x35e   :  { %v389_v34 = vpop.f32.mrf.mxu0 }
 0x35f   :  { %v404_v40 = vmul.f32 0.35355338, %v389_v34  ;;  %v4648_v2 = vpop.eup %4647 }
 0x360   :  { %v302_v8 = vmul.f32 %v4648_v2, %v5155_v62  ;;  %v537_v35 = vpop.permute.xlu2 %536 }
 0x361   :  { %411 = vst.msk [vmem:[#allocation2 + $0x30] sm:$0xff] %vm226_vm3, %v404_v40  ;;  %v417_v0 = vadd.f32 %v404_v40, %v5090_v1 }
 0x363   :  { %v423_v5 = vsel %vm226_vm3, %v417_v0, -inf }
 0x366   :  { %v391_v41 = vpop.f32.mrf.mxu0 }
 0x367   :  { %v405_v42 = vmul.f32 0.35355338, %v391_v41 }
 0x368   :  { %720 = vrot.lane.b32.xlu0 %v5047_v43, %s4860_s19  ;;  %v723_v36 = vpop.permute.xlu2 %722 }
 0x369   :  { %412 = vst.msk [vmem:[#allocation2 + $0x38] sm:$0xff] %vm226_vm3, %v405_v42  ;;  %v5195_v44 = vadd.f32 %v405_v42, %v5098_v6 }
 0x36b   :  { %v426_v45 = vsel %vm226_vm3, %v5195_v44, -inf }
 0x36c   :  { %427 = vmax.xlane.f32.xlu1 %v426_v45 }
 0x36e   :  { %v394_v46 = vpop.f32.mrf.mxu0 }
 0x36f   :  { %v406_v47 = vmul.f32 0.35355338, %v394_v46 }
 0x371   :  { %413 = vst.msk [vmem:[#allocation2 + $0x40] sm:$0xff] %vm226_vm3, %v406_v47  ;;  %v5201_v49 = vadd.f32 %v406_v47, %v5125_v25 }
 0x373   :  { %v429_v50 = vsel %vm226_vm3, %v5201_v49, -inf }
 0x374   :  { %430 = vmax.xlane.f32.xlu2 %v429_v50 }
 0x376   :  { %v396_v51 = vpop.f32.mrf.mxu0 }
 0x377   :  { %v407_v52 = vmul.f32 0.35355338, %v396_v51 }
 0x379   :  { %414 = vst.msk [vmem:[#allocation2 + $0x48] sm:$0xff] %vm226_vm3, %v407_v52  ;;  %v5224_v10 = vadd.f32 %v407_v52, %v5107_v13 }
 0x37b   :  { %v432_v12 = vsel %vm226_vm3, %v5224_v10, -inf }
 0x37e   :  { %v399_v53 = vpop.f32.mrf.mxu0 }
 0x37f   :  { %v408_v54 = vmul.f32 0.35355338, %v399_v53 }
 0x381   :  { %415 = vst.msk [vmem:[#allocation2 + $0x50] sm:$0xff] %vm226_vm3, %v408_v54  ;;  %v5208_v55 = vadd.f32 %v408_v54, %v5132_v28 }
 0x383   :  { %v435_v56 = vsel %vm226_vm3, %v5208_v55, -inf }
 0x384   :  { %436 = vmax.xlane.f32.xlu1 %v435_v56 }
 0x386   :  { %v401_v58 = vpop.f32.mrf.mxu0 }
 0x387   :  { %v409_v59 = vmul.f32 0.35355338, %v401_v58 }
 0x389   :  { %416 = vst.msk [vmem:[#allocation2 + $0x58] sm:$0xff] %vm226_vm3, %v409_v59  ;;  %v283_v60 = vpop.xlane.xlu0 %282  ;;  %v5214_v61 = vadd.f32 %v409_v59, %v5139_v33 }
 0x38a   :  { %4649 = vrcp.f32 %v283_v60 }
 0x38b   :  { %v438_v63 = vsel %vm226_vm3, %v5214_v61, -inf }
 0x38c   :  { %439 = vmax.xlane.f32.xlu2 %v438_v63 }
 0x390   :  { %v4650_v3 = vpop.eup %4649 }
 0x391   :  { %v301_v7 = vmul.f32 %v4650_v3, %v5169_v11  ;;  %v289_v19 = vpop.xlane.xlu1 %288 }
 0x392   :  { %424 = vmax.xlane.f32.xlu0 %v423_v5  ;;  %4651 = vrcp.f32 %v289_v19 }
 0x393   :  { %v306_v9 = vpack.c.bf16 %v302_v8, %v301_v7 }
 0x395   :  { %3931 = vmatmul.msk.bf16.gmra.mxu3 %vm226_vm3, %v306_v9 }
 0x398   :  { %v4652_v11 = vpop.eup %4651 }
 0x399   :  { %v303_v22 = vmul.f32 %v4652_v11, %v5173_v15 }
 0x39a   :  { %433 = vmax.xlane.f32.xlu0 %v432_v12 }
 0x39c   :  { %v725_v14 = vpop.permute.xlu0 %724 }
 0x39d   :  { %v740_v18 = vsel %vm177_vm2, %v725_v14, 0 }
 0x39e   :  { %755 = vmatpush.bf16.xpose.msra.mxu0 %v740_v18 }
 0x3a9   :  { %v719_v20 = vpop.permute.xlu1 %718 }
 0x3aa   :  { %3945 = vmatmul.msk.bf16.vlgmr.msra.gmra.mxu0 %vm177_vm2, %v719_v20 }
 0x3b1   :  { %v539_v37 = vpop.permute.xlu1 %538 }
 0x3c7   :  { %v292_v62 = vpop.xlane.xlu0 %291 }
 0x3c8   :  { %4653 = vrcp.f32 %v292_v62 }
 0x3ce   :  { %v4654_v21 = vpop.eup %4653 }
 0x3cf   :  { %v304_v26 = vmul.f32 %v4654_v21, %v5184_v32 }
 0x3d1   :  { %v307_v27 = vpack.c.bf16 %v304_v26, %v303_v22 }
 0x3d3   :  { %3932 = vmatmul.msk.bf16.gmra.mxu3 %vm226_vm3, %v307_v27 }
 0x3d7   :  { %v5254_v53 = vpop.f32.mrf.mxu3 }
 0x3da   :  { %v721_v29 = vpop.permute.xlu0 %720 }
 0x3db   :  { %3946 = vmatmul.msk.bf16.gmra.mxu0 %vm177_vm2, %v721_v29 }
 0x3df   :  { %v428_v41 = vpop.xlane.xlu1 %427  ;;  %v5264_v58 = vpop.f32.mrf.mxu3 }
 0x3e3   :  { %3939 = vmatmul.msk.bf16.vlgmr.msrb.gmra.mxu3 %vm177_vm2, %v5164_v4  ;;  %v442_v4 = vsub.f32 %v5195_v44, %v428_v41 }
 0x3e5   :  { %v449_v42 = vmul.f32 1.442695, %v442_v4 }
 0x3e7   :  { %v431_v63 = vpop.xlane.xlu2 %430 }
 0x3eb   :  { %3947 = vmatmul.msk.bf16.gmra.mxu0 %vm177_vm2, %v723_v36 }
 0x3f3   :  { %3940 = vmatmul.msk.bf16.gmra.mxu3 %vm177_vm2, %v537_v35  ;;  %v443_v35 = vsub.f32 %v5201_v49, %v431_v63 }
 0x3f7   :  { %v437_v36 = vpop.xlane.xlu1 %436 }
 0x3ff   :  { %v440_v8 = vpop.xlane.xlu2 %439 }
 0x400   :  { %v446_v14 = vsub.f32 %v5214_v61, %v440_v8 }
 0x403   :  { %3941 = vmatmul.msk.bf16.gmra.mxu3 %vm177_vm2, %v539_v37 }
 0x405   :  { %v425_v15 = vpop.xlane.xlu0 %424 }
 0x406   :  { %v441_v32 = vsub.f32 %v417_v0, %v425_v15 }
 0x408   :  { %v447_v39 = vmul.f32 1.442695, %v441_v32 }
 0x40a   :  { %4655 = vpow2.f32 %v447_v39  ;;  %v445_v39 = vsub.f32 %v5208_v55, %v437_v36 }
 0x40b   :  { %4657 = vpow2.f32 %v449_v42 }
 0x40d   :  { %v434_v0 = vpop.xlane.xlu0 %433 }
 0x40e   :  { %v444_v2 = vsub.f32 %v5224_v10, %v434_v0  ;;  %v457_v10 = vmul.f32 1.442695, %v446_v14 }
 0x410   :  { %v5239_v34 = vpop.eup %4655  ;;  %v453_v5 = vmul.f32 1.442695, %v444_v2 }
 0x411   :  { %v459_v40 = vsel %vm226_vm3, %v5239_v34, 0.0  ;;  %v5252_v44 = vpop.eup %4657 }
 0x412   :  { %460 = vadd.xlane.f32.xlu1 %v459_v40  ;;  %v462_v57 = vsel %vm226_vm3, %v5252_v44, 0.0  ;;  %4659 = vpow2.f32 %v453_v5  ;;  %v451_v40 = vmul.f32 1.442695, %v443_v35 }
 0x413   :  { %4661 = vpow2.f32 %v457_v10 }
 0x414   :  { %4663 = vpow2.f32 %v451_v40 }
 0x418   :  { %v5266_v59 = vpop.f32.mrf.mxu3  ;;  %v5286_v11 = vpop.eup %4659 }
 0x419   :  { %v468_v22 = vsel %vm226_vm3, %v5286_v11, 0.0  ;;  %v5298_v15 = vpop.eup %4661 }
 0x41a   :  { %v474_v41 = vsel %vm226_vm3, %v5298_v15, 0.0  ;;  %v5321_v63 = vpop.eup %4663 }
 0x41b   :  { %v465_v2 = vsel %vm226_vm3, %v5321_v63, 0.0 }
 0x420   :  { %v5270_v60 = vpop.f32.mrf.mxu3 }
 0x427   :  { %v757_v45 = vpop.f32.mrf.mxu0 }
 0x428   :  { %v772_v46 = vmul.f32 0.35355338, %v757_v45  ;;  %v455_v45 = vmul.f32 1.442695, %v445_v39 }
 0x42a   :  { %779 = vst.msk [vmem:[#allocation2 + $0x90] sm:$0xff] %vm226_vm3, %v772_v46  ;;  %v5246_v47 = vadd.f32 %v772_v46, %v5090_v1  ;;  %4665 = vpow2.f32 %v455_v45 }
 0x42b   :  { %494 = vrot.lane.b32.xlu1 %v5047_v43, %s4861_s25 }
 0x42c   :  { %v791_v50 = vsel %vm226_vm3, %v5246_v47, -inf }
 0x42d   :  { %792 = vmax.xlane.f32.xlu2 %v791_v50 }
 0x42f   :  { %v759_v51 = vpop.f32.mrf.mxu0 }
 0x430   :  { %v773_v52 = vmul.f32 0.35355338, %v759_v51 }
 0x432   :  { %780 = vst.msk [vmem:[#allocation2 + $0x98] sm:$0xff] %vm226_vm3, %v773_v52  ;;  %v5258_v54 = vadd.f32 %v773_v52, %v5098_v6 }
 0x434   :  { %v794_v56 = vsel %vm226_vm3, %v5258_v54, -inf }
 0x435   :  { %795 = vmax.xlane.f32.xlu0 %v794_v56  ;;  %463 = vadd.xlane.f32.xlu2 %v462_v57 }
 0x449   :  { %496 = vrot.lane.b32.xlu0 %v5051_v48, %s4861_s25 }
 0x451   :  { %492 = vrot.lane.b32.xlu0 %v5041_v38, %s4861_s25 }
 0x456   :  { %v5275_v3 = vpop.f32.mrf.mxu3 }
 0x458   :  { %v762_v7 = vpop.f32.mrf.mxu0 }
 0x459   :  { %v774_v9 = vmul.f32 0.35355338, %v762_v7 }
 0x45b   :  { %781 = vst.msk [vmem:[#allocation2 + $0xa0] sm:$0xff] %vm226_vm3, %v774_v9  ;;  %v5279_v12 = vadd.f32 %v774_v9, %v5125_v25 }
 0x45d   :  { %v797_v18 = vsel %vm226_vm3, %v5279_v12, -inf }
 0x45e   :  { %v5284_v19 = vpop.f32.mrf.mxu3  ;;  %798 = vmax.xlane.f32.xlu2 %v797_v18 }
 0x460   :  { %v764_v20 = vpop.f32.mrf.mxu0 }
 0x461   :  { %v775_v62 = vmul.f32 0.35355338, %v764_v20 }
 0x463   :  { %782 = vst.msk [vmem:[#allocation2 + $0xa8] sm:$0xff] %vm226_vm3, %v775_v62  ;;  %v5290_v21 = vadd.f32 %v775_v62, %v5107_v13 }
 0x465   :  { %v800_v61 = vsel %vm226_vm3, %v5290_v21, -inf }
 0x466   :  { %v573_v26 = vpop.f32.mrf.mxu3  ;;  %801 = vmax.xlane.f32.xlu1 %v800_v61  ;;  %469 = vadd.xlane.f32.xlu2 %v468_v22 }
 0x467   :  { %v588_v27 = vmul.f32 0.35355338, %v573_v26 }
 0x468   :  { %v767_v29 = vpop.f32.mrf.mxu0 }
 0x469   :  { %595 = vst.msk [vmem:[#allocation2 + $0x60] sm:$0xff] %vm226_vm3, %v588_v27  ;;  %v776_v37 = vmul.f32 0.35355338, %v767_v29  ;;  %v5331_v8 = vadd.f32 %v588_v27, %v5090_v1 }
 0x46b   :  { %783 = vst.msk [vmem:[#allocation2 + $0xb0] sm:$0xff] %vm226_vm3, %v776_v37  ;;  %v5302_v32 = vadd.f32 %v776_v37, %v5132_v28  ;;  %v607_v14 = vsel %vm226_vm3, %v5331_v8, -inf }
 0x46d   :  { %v803_v49 = vsel %vm226_vm3, %v5302_v32, -inf }
 0x46e   :  { %v575_v4 = vpop.f32.mrf.mxu3  ;;  %475 = vadd.xlane.f32.xlu1 %v474_v41  ;;  %804 = vmax.xlane.f32.xlu2 %v803_v49 }
 0x46f   :  { %v589_v42 = vmul.f32 0.35355338, %v575_v4 }
 0x470   :  { %v769_v46 = vpop.f32.mrf.mxu0 }
 0x471   :  { %596 = vst.msk [vmem:[#allocation2 + $0x68] sm:$0xff] %vm226_vm3, %v589_v42  ;;  %v777_v50 = vmul.f32 0.35355338, %v769_v46  ;;  %v5311_v51 = vadd.f32 %v589_v42, %v5098_v6  ;;  %v5324_v6 = vpop.eup %4665 }
 0x472   :  { %v471_v5 = vsel %vm226_vm3, %v5324_v6, 0.0 }
 0x473   :  { %784 = vst.msk [vmem:[#allocation2 + $0xb8] sm:$0xff] %vm226_vm3, %v777_v50  ;;  %v5315_v55 = vadd.f32 %v777_v50, %v5139_v33  ;;  %v610_v52 = vsel %vm226_vm3, %v5311_v51, -inf }
 0x475   :  { %v806_v56 = vsel %vm226_vm3, %v5315_v55, -inf }
 0x476   :  { %v578_v57 = vpop.f32.mrf.mxu3  ;;  %611 = vmax.xlane.f32.xlu1 %v610_v52  ;;  %807 = vmax.xlane.f32.xlu2 %v806_v56 }
 0x477   :  { %v590_v0 = vmul.f32 0.35355338, %v578_v57 }
 0x479   :  { %597 = vst.msk [vmem:[#allocation2 + $0x70] sm:$0xff] %vm226_vm3, %v590_v0  ;;  %v5355_v40 = vadd.f32 %v590_v0, %v5125_v25 }
 0x47b   :  { %466 = vadd.xlane.f32.xlu0 %v465_v2  ;;  %v613_v41 = vsel %vm226_vm3, %v5355_v40, -inf }
 0x47e   :  { %v580_v7 = vpop.f32.mrf.mxu3  ;;  %472 = vadd.xlane.f32.xlu2 %v471_v5 }
 0x47f   :  { %v591_v9 = vmul.f32 0.35355338, %v580_v7 }
 0x481   :  { %598 = vst.msk [vmem:[#allocation2 + $0x78] sm:$0xff] %vm226_vm3, %v591_v9  ;;  %v5360_v45 = vadd.f32 %v591_v9, %v5107_v13 }
 0x483   :  { %608 = vmax.xlane.f32.xlu0 %v607_v14  ;;  %v616_v52 = vsel %vm226_vm3, %v5360_v45, -inf }
 0x486   :  { %v583_v18 = vpop.f32.mrf.mxu3 }
 0x487   :  { %v592_v10 = vmul.f32 0.35355338, %v583_v18 }
 0x489   :  { %599 = vst.msk [vmem:[#allocation2 + $0x80] sm:$0xff] %vm226_vm3, %v592_v10  ;;  %v5368_v57 = vadd.f32 %v592_v10, %v5132_v28 }
 0x48b   :  { %v619_v13 = vsel %vm226_vm3, %v5368_v57, -inf }
 0x48e   :  { %v585_v20 = vpop.f32.mrf.mxu3 }
 0x48f   :  { %v593_v62 = vmul.f32 0.35355338, %v585_v20  ;;  %680 = vrot.lane.b32.xlu1 %v5051_v48, %s4862_s26 }
 0x491   :  { %600 = vst.msk [vmem:[#allocation2 + $0x88] sm:$0xff] %vm226_vm3, %v593_v62 }
 0x497   :  { %678 = vrot.lane.b32.xlu0 %v5047_v43, %s4862_s26  ;;  %862 = vrot.lane.b32.xlu1 %v5047_v43, %s7221_s27 }
 0x4a0   :  { %v793_v1 = vpop.xlane.xlu2 %792 }
 0x4a1   :  { %v809_v61 = vsub.f32 %v5246_v47, %v793_v1  ;;  %v461_v47 = vpop.xlane.xlu1 %460 }
 0x4a3   :  { %v815_v22 = vmul.f32 1.442695, %v809_v61 }
 0x4a5   :  { %4667 = vpow2.f32 %v815_v22 }
 0x4a8   :  { %v796_v26 = vpop.xlane.xlu0 %795  ;;  %v464_v39 = vpop.xlane.xlu2 %463 }
 0x4a9   :  { %v810_v27 = vsub.f32 %v5258_v54, %v796_v26  ;;  %v495_v4 = vpop.permute.xlu1 %494 }
 0x4ab   :  { %v5346_v29 = vpop.eup %4667  ;;  %v817_v35 = vmul.f32 1.442695, %v810_v27 }
 0x4ac   :  { %v827_v36 = vsel %vm226_vm3, %v5346_v29, 0.0 }
 0x4ad   :  { %4669 = vpow2.f32 %v817_v35  ;;  %828 = vadd.xlane.f32.xlu2 %v827_v36 }
 0x4ae   :  { %4671 = vrcp.f32 %v464_v39 }
 0x4af   :  { %4673 = vrcp.f32 %v461_v47 }
 0x4b3   :  { %v5350_v37 = vpop.eup %4669 }
 0x4b4   :  { %v830_v43 = vsel %vm226_vm3, %v5350_v37, 0.0  ;;  %v4672_v49 = vpop.eup %4671 }
 0x4b5   :  { %831 = vadd.xlane.f32.xlu2 %v830_v43  ;;  %v4674_v42 = vpop.eup %4673  ;;  %v484_v46 = vmul.f32 %v4672_v49, %v5252_v44  ;;  %v5373_v44 = vadd.f32 %v593_v62, %v5139_v33 }
 0x4b6   :  { %v483_v50 = vmul.f32 %v4674_v42, %v5239_v34 }
 0x4b7   :  { %v622_v0 = vsel %vm226_vm3, %v5373_v44, -inf }
 0x4b8   :  { %v489_v56 = vpack.c.bf16 %v484_v46, %v483_v50 }
 0x4bb   :  { %v497_v54 = vpop.permute.xlu0 %496 }
 0x4bc   :  { %515 = vmatpush.bf16.msra.mxu1 %v497_v54 }
 0x4bd   :  { %614 = vmax.xlane.f32.xlu2 %v613_v41 }
 0x4c0   :  { %516 = vmatpush.bf16.msra.mxu1 %v495_v4 }
 0x4c3   :  { %v493_v25 = vpop.permute.xlu0 %492 }
 0x4c4   :  { %517 = vmatpush.bf16.msra.mxu1 %v493_v25 }
 0x4c5   :  { %617 = vmax.xlane.f32.xlu2 %v616_v52 }
 0x4c7   :  { %3936 = vmatmul.msk.bf16.vlgmr.msra.gmra.mxu1 %vm226_vm3, %v489_v56 }
 0x4cd   :  { %620 = vmax.xlane.f32.xlu2 %v619_v13 }
 0x4d1   :  { %v5375_v34 = vpop.xlane.xlu2 %798 }
 0x4d5   :  { %623 = vmax.xlane.f32.xlu2 %v622_v0 }
 0x4d9   :  { %v470_v2 = vpop.xlane.xlu2 %469  ;;  %v802_v5 = vpop.xlane.xlu1 %801 }
 0x4da   :  { %4675 = vrcp.f32 %v470_v2  ;;  %v812_v25 = vsub.f32 %v5290_v21, %v802_v5 }
 0x4dc   :  { %v821_v13 = vmul.f32 1.442695, %v812_v25 }
 0x4e0   :  { %v4676_v33 = vpop.eup %4675 }
 0x4e1   :  { %v5379_v7 = vpop.xlane.xlu2 %804  ;;  %v476_v9 = vpop.xlane.xlu1 %475  ;;  %v486_v1 = vmul.f32 %v4676_v33, %v5286_v11 }
 0x4e2   :  { %v813_v21 = vsub.f32 %v5302_v32, %v5379_v7 }
 0x4e9   :  { %v5383_v14 = vpop.xlane.xlu2 %807  ;;  %v612_v61 = vpop.xlane.xlu1 %611 }
 0x4ea   :  { %v626_v11 = vsub.f32 %v5311_v51, %v612_v61 }
 0x4ec   :  { %v633_v54 = vmul.f32 1.442695, %v626_v11 }
 0x4ed   :  { %676 = vrot.lane.b32.xlu2 %v5041_v38, %s4862_s26 }
 0x4ee   :  { %v467_v28 = vpop.xlane.xlu0 %466 }
 0x4ef   :  { %4677 = vrcp.f32 %v467_v28 }
 0x4f1   :  { %v473_v22 = vpop.xlane.xlu2 %472 }
 0x4f5   :  { %v4678_v18 = vpop.eup %4677 }
 0x4f6   :  { %v609_v10 = vpop.xlane.xlu0 %608  ;;  %v485_v62 = vmul.f32 %v4678_v18, %v5321_v63  ;;  %v823_v18 = vmul.f32 1.442695, %v813_v21 }
 0x4f7   :  { %v625_v20 = vsub.f32 %v5331_v8, %v609_v10 }
 0x4f8   :  { %v490_v27 = vpack.c.bf16 %v486_v1, %v485_v62 }
 0x4f9   :  { %v631_v26 = vmul.f32 1.442695, %v625_v20 }
 0x4fa   :  { %3937 = vmatmul.msk.bf16.gmra.mxu1 %vm226_vm3, %v490_v27 }
 0x4fb   :  { %4679 = vpow2.f32 %v631_v26 }
 0x4fc   :  { %4681 = vrcp.f32 %v473_v22 }
 0x4fd   :  { %4683 = vrcp.f32 %v476_v9 }
 0x4fe   :  { %4685 = vpow2.f32 %v633_v54 }
 0x501   :  { %v5389_v35 = vpop.eup %4679  ;;  %v681_v36 = vpop.permute.xlu1 %680 }
 0x502   :  { %v4682_v43 = vpop.eup %4681  ;;  %699 = vmatpush.bf16.msrb.mxu2 %v681_v36  ;;  %v643_v8 = vsel %vm226_vm3, %v5389_v35, 0.0 }
 0x503   :  { %644 = vadd.xlane.f32.xlu0 %v643_v8  ;;  %v4684_v63 = vpop.eup %4683  ;;  %v487_v39 = vmul.f32 %v4682_v43, %v5324_v6 }
 0x504   :  { %v488_v47 = vmul.f32 %v4684_v63, %v5298_v15  ;;  %v5397_v4 = vpop.eup %4685 }
 0x505   :  { %v646_v42 = vsel %vm226_vm3, %v5397_v4, 0.0 }
 0x506   :  { %v491_v49 = vpack.c.bf16 %v488_v47, %v487_v39 }
 0x509   :  { %v679_v41 = vpop.permute.xlu0 %678 }
 0x50a   :  { %700 = vmatpush.bf16.msrb.mxu2 %v679_v41  ;;  %3938 = vmatmul.msk.bf16.gmra.mxu1 %vm226_vm3, %v491_v49 }
 0x516   :  { %647 = vadd.xlane.f32.xlu2 %v646_v42  ;;  %v863_v42 = vpop.permute.xlu1 %862 }
 0x517   :  { %864 = vrot.lane.b32.xlu0 %v5051_v48, %s7221_s27 }
 0x520   :  { %v5403_v51 = vpop.xlane.xlu2 %828 }
 0x528   :  { %v832_v6 = vpop.xlane.xlu2 %831 }
 0x52e   :  { %860 = vrot.lane.b32.xlu2 %v5041_v38, %s7221_s27 }
 0x530   :  { %v615_v15 = vpop.xlane.xlu2 %614 }
 0x531   :  { %v627_v46 = vsub.f32 %v5355_v40, %v615_v15 }
 0x533   :  { %v635_v50 = vmul.f32 1.442695, %v627_v46 }
 0x535   :  { %4687 = vpow2.f32 %v635_v50 }
 0x538   :  { %v618_v52 = vpop.xlane.xlu2 %617 }
 0x539   :  { %v628_v56 = vsub.f32 %v5360_v45, %v618_v52  ;;  %v811_v45 = vsub.f32 %v5279_v12, %v5375_v34  ;;  %v814_v12 = vsub.f32 %v5315_v55, %v5383_v14 }
 0x53b   :  { %v637_v0 = vmul.f32 1.442695, %v628_v56  ;;  %v5410_v2 = vpop.eup %4687  ;;  %v819_v10 = vmul.f32 1.442695, %v811_v45  ;;  %v825_v1 = vmul.f32 1.442695, %v814_v12 }
 0x53c   :  { %v649_v38 = vsel %vm226_vm3, %v5410_v2, 0.0 }
 0x53d   :  { %4689 = vpow2.f32 %v637_v0 }
 0x53e   :  { %4691 = vpow2.f32 %v821_v13 }
 0x540   :  { %v621_v48 = vpop.xlane.xlu2 %620 }
 0x541   :  { %v629_v28 = vsub.f32 %v5368_v57, %v621_v48  ;;  %650 = vadd.xlane.f32.xlu0 %v649_v38 }
 0x543   :  { %v5415_v40 = vpop.eup %4689  ;;  %v639_v5 = vmul.f32 1.442695, %v629_v28 }
 0x544   :  { %v652_v9 = vsel %vm226_vm3, %v5415_v40, 0.0  ;;  %v5423_v33 = vpop.eup %4691  ;;  %v519_v8 = vpop.f32.mrf.mxu1 }
 0x545   :  { %4693 = vpow2.f32 %v639_v5  ;;  %653 = vadd.xlane.f32.xlu1 %v652_v9  ;;  %v836_v20 = vsel %vm226_vm3, %v5423_v33, 0.0 }
 0x546   :  { %4695 = vpow2.f32 %v823_v18 }
 0x547   :  { %4697 = vpow2.f32 %v819_v10 }
 0x548   :  { %v624_v57 = vpop.xlane.xlu2 %623 }
 0x549   :  { %v630_v62 = vsub.f32 %v5373_v44, %v624_v57  ;;  %837 = vadd.xlane.f32.xlu0 %v836_v20 }
 0x54b   :  { %v5428_v32 = vpop.eup %4693  ;;  %v641_v34 = vmul.f32 1.442695, %v630_v62 }
 0x54c   :  { %v655_v7 = vsel %vm226_vm3, %v5428_v32, 0.0  ;;  %v5434_v22 = vpop.eup %4695  ;;  %v521_v63 = vpop.f32.mrf.mxu1 }
 0x54d   :  { %4699 = vpow2.f32 %v641_v34  ;;  %656 = vadd.xlane.f32.xlu1 %v655_v7  ;;  %v5436_v44 = vpop.eup %4697  ;;  %v839_v27 = vsel %vm226_vm3, %v5434_v22, 0.0  ;;  %v4345_v11 = vpack.i.bf16 %v521_v63, %v519_v8 }
 0x54e   :  { %4701 = vpow2.f32 %v825_v1  ;;  %v833_v14 = vsel %vm226_vm3, %v5436_v44, 0.0 }
 0x54f   :  { %4703 = vrcp.f32 %v832_v6 }
 0x550   :  { %v677_v61 = vpop.permute.xlu2 %676  ;;  %4705 = vrcp.f32 %v5403_v51 }
 0x551   :  { %701 = vmatpush.bf16.msrb.mxu2 %v677_v61 }
 0x553   :  { %v4700_v26 = vpop.eup %4699 }
 0x554   :  { %v658_v55 = vsel %vm226_vm3, %v4700_v26, 0.0  ;;  %v5443_v36 = vpop.eup %4701 }
 0x555   :  { %840 = vadd.xlane.f32.xlu1 %v839_v27  ;;  %659 = vadd.xlane.f32.xlu0 %v658_v55  ;;  %v842_v43 = vsel %vm226_vm3, %v5443_v36, 0.0  ;;  %v4704_v41 = vpop.eup %4703 }
 0x556   :  { %v4706_v49 = vpop.eup %4705  ;;  %v852_v46 = vmul.f32 %v4704_v41, %v5350_v37 }
 0x557   :  { %834 = vadd.xlane.f32.xlu2 %v833_v14  ;;  %v851_v25 = vmul.f32 %v4706_v49, %v5346_v29 }
 0x559   :  { %v857_v56 = vpack.c.bf16 %v852_v46, %v851_v25 }
 0x55d   :  { %843 = vadd.xlane.f32.xlu0 %v842_v43 }
 0x56e   :  { %4346 = vrot.lane.b32.xlu1 %v4345_v11, %s7219_s0 }
 0x576   :  { %v645_v39 = vpop.xlane.xlu0 %644 }
 0x577   :  { %4707 = vrcp.f32 %v645_v39 }
 0x57d   :  { %v4708_v15 = vpop.eup %4707 }
 0x57e   :  { %v667_v52 = vmul.f32 %v4708_v15, %v5389_v35 }
 0x589   :  { %v865_v47 = vpop.permute.xlu0 %864  ;;  %v648_v54 = vpop.xlane.xlu2 %647 }
 0x58a   :  { %4709 = vrcp.f32 %v648_v54  ;;  %883 = vmatpush.bf16.msrb.mxu1 %v865_v47 }
 0x58e   :  { %884 = vmatpush.bf16.msrb.mxu1 %v863_v42 }
 0x590   :  { %v4710_v50 = vpop.eup %4709 }
 0x591   :  { %v668_v6 = vmul.f32 %v4710_v50, %v5397_v4  ;;  %v861_v51 = vpop.permute.xlu2 %860  ;;  %v4281_v50 = vld [vmem:[%s7207_s6 + $0x8] sm:$0xff] }
 0x592   :  { %885 = vmatpush.bf16.msrb.mxu1 %v861_v51  ;;  %1027 = vmatpush.bf16.msra.mxu3 %v4281_v50 }
 0x593   :  { %v673_v13 = vpack.c.bf16 %v668_v6, %v667_v52 }
 0x595   :  { %3942 = vmatmul.msk.bf16.vlgmr.msrb.gmra.mxu2 %vm226_vm3, %v673_v13  ;;  %3948 = vmatmul.msk.bf16.vlgmr.msrb.gmra.mxu1 %vm226_vm3, %v857_v56 }
 0x5b4   :  { %v651_v0 = vpop.xlane.xlu0 %650 }
 0x5b5   :  { %4711 = vrcp.f32 %v651_v0 }
 0x5b8   :  { %v654_v48 = vpop.xlane.xlu1 %653 }
 0x5b9   :  { %4713 = vrcp.f32 %v654_v48  ;;  %v4280_v48 = vld [vmem:[%s7207_s6] sm:$0xff] }
 0x5ba   :  { %1028 = vmatpush.bf16.msra.mxu3 %v4280_v48 }
 0x5bb   :  { %v4712_v37 = vpop.eup %4711 }
 0x5bc   :  { %v838_v28 = vpop.xlane.xlu0 %837  ;;  %v669_v29 = vmul.f32 %v4712_v37, %v5410_v2 }
 0x5bf   :  { %v4714_v38 = vpop.eup %4713 }
 0x5c0   :  { %v670_v35 = vmul.f32 %v4714_v38, %v5415_v40  ;;  %v657_v21 = vpop.xlane.xlu1 %656 }
 0x5c1   :  { %4715 = vrcp.f32 %v657_v21 }
 0x5c2   :  { %v674_v4 = vpack.c.bf16 %v670_v35, %v669_v29  ;;  %4717 = vrcp.f32 %v838_v28 }
 0x5c4   :  { %3943 = vmatmul.msk.bf16.gmra.mxu2 %vm226_vm3, %v674_v4 }
 0x5c7   :  { %v4716_v9 = vpop.eup %4715 }
 0x5c8   :  { %v660_v5 = vpop.xlane.xlu0 %659  ;;  %v4718_v18 = vpop.eup %4717  ;;  %v671_v57 = vmul.f32 %v4716_v9, %v5428_v32 }
 0x5c9   :  { %4719 = vrcp.f32 %v660_v5  ;;  %v854_v12 = vmul.f32 %v4718_v18, %v5423_v33  ;;  %v841_v1 = vpop.xlane.xlu1 %840 }
 0x5ca   :  { %v835_v45 = vpop.xlane.xlu2 %834 }
 0x5cb   :  { %4721 = vrcp.f32 %v835_v45 }
 0x5cf   :  { %v4720_v10 = vpop.eup %4719 }
 0x5d0   :  { %v672_v20 = vmul.f32 %v4720_v10, %v4700_v26  ;;  %v844_v34 = vpop.xlane.xlu0 %843 }
 0x5d1   :  { %v4722_v62 = vpop.eup %4721  ;;  %4723 = vrcp.f32 %v844_v34 }
 0x5d2   :  { %v675_v2 = vpack.c.bf16 %v672_v20, %v671_v57  ;;  %v853_v40 = vmul.f32 %v4722_v62, %v5436_v44  ;;  %4725 = vrcp.f32 %v841_v1  ;;  %v524_v44 = vpop.f32.mrf.mxu1 }
 0x5d4   :  { %3944 = vmatmul.msk.bf16.gmra.mxu2 %vm226_vm3, %v675_v2  ;;  %v858_v7 = vpack.c.bf16 %v854_v12, %v853_v40 }
 0x5d6   :  { %3949 = vmatmul.msk.bf16.gmra.mxu1 %vm226_vm3, %v858_v7 }
 0x5d7   :  { %v4724_v61 = vpop.eup %4723 }
 0x5d8   :  { %v4726_v27 = vpop.eup %4725  ;;  %v856_v32 = vmul.f32 %v4724_v61, %v5443_v36 }
 0x5d9   :  { %v855_v26 = vmul.f32 %v4726_v27, %v5434_v22 }
 0x5da   :  { %v526_v33 = vpop.f32.mrf.mxu1 }
 0x5db   :  { %v859_v55 = vpack.c.bf16 %v856_v32, %v855_v26  ;;  %v4360_v22 = vpack.i.bf16 %v526_v33, %v524_v44 }
 0x5e0   :  { %v4347_v37 = vpop.permute.xlu1 %4346 }
 0x5e1   :  { %v4349_v38 = vunpack.i.h.bf16 %v4347_v37  ;;  %v4348_v28 = vunpack.i.l.bf16 %v4347_v37 }
 0x5e2   :  { %v529_v14 = vpop.f32.mrf.mxu1 }
 0x5e3   :  { %v975_v5 = vsel %vm177_vm2, %v5264_v58, %v4349_v38  ;;  %v974_v45 = vsel %vm177_vm2, %v5254_v53, %v4348_v28 }
 0x5e6   :  { %3950 = vmatmul.msk.bf16.gmra.mxu1 %vm226_vm3, %v859_v55 }
 0x5ea   :  { %v531_v43 = vpop.f32.mrf.mxu1 }
 0x5eb   :  { %v4375_v36 = vpack.i.bf16 %v531_v43, %v529_v14 }
 0x612   :  { %v887_v8 = vpop.f32.mrf.mxu1 }
 0x618   :  { %v703_v63 = vpop.f32.mrf.mxu2 }
 0x61a   :  { %v889_v11 = vpop.f32.mrf.mxu1 }
 0x61b   :  { %v4355_v39 = vpack.i.bf16 %v889_v11, %v887_v8 }
 0x61d   :  { %4356 = vrot.lane.b32.xlu2 %v4355_v39, %s7217_s28 }
 0x620   :  { %v705_v47 = vpop.f32.mrf.mxu2 }
 0x621   :  { %v4350_v54 = vpack.i.bf16 %v705_v47, %v703_v63 }
 0x623   :  { %4351 = vrot.lane.b32.xlu0 %v4350_v54, %s7215_s29 }
 0x62b   :  { %4361 = vrot.lane.b32.xlu0 %v4360_v22, %s7219_s0 }
 0x633   :  { %4376 = vrot.lane.b32.xlu0 %v4375_v36, %s7219_s0 }
 0x647   :  { %v708_v41 = vpop.f32.mrf.mxu2 }
 0x64f   :  { %v710_v49 = vpop.f32.mrf.mxu2 }
 0x650   :  { %v4365_v42 = vpack.i.bf16 %v710_v49, %v708_v41 }
 0x652   :  { %4366 = vrot.lane.b32.xlu1 %v4365_v42, %s7215_s29 }
 0x653   :  { %v892_v15 = vpop.f32.mrf.mxu1 }
 0x657   :  { %v713_v46 = vpop.f32.mrf.mxu2 }
 0x65b   :  { %v894_v25 = vpop.f32.mrf.mxu1 }
 0x65c   :  { %v4370_v52 = vpack.i.bf16 %v894_v25, %v892_v15 }
 0x65e   :  { %4371 = vrot.lane.b32.xlu2 %v4370_v52, %s7217_s28  ;;  %v5516_v52 = vld [vmem:[%s7210_s7] sm:$0x3f] }
 0x65f   :  { %v715_v6 = vpop.f32.mrf.mxu2  ;;  %v1066_v38 = vperm.slane %v5516_v52, 2 }
 0x660   :  { %v4380_v51 = vpack.i.bf16 %v715_v6, %v713_v46 }
 0x662   :  { %4381 = vrot.lane.b32.xlu1 %v4380_v51, %s7215_s29  ;;  %v1052_v51 = vperm.slane %v5516_v52, 0 }
 0x663   :  { %v897_v56 = vpop.f32.mrf.mxu1 }
 0x66b   :  { %v899_v13 = vpop.f32.mrf.mxu1 }
 0x66c   :  { %v4385_v0 = vpack.i.bf16 %v899_v13, %v897_v56  ;;  %v1059_v13 = vperm.slane %v5516_v52, 1 }
 0x66e   :  { %4386 = vrot.lane.b32.xlu2 %v4385_v0, %s7217_s28 }
 0x677   :  { %v4357_v29 = vpop.permute.xlu2 %4356 }
 0x678   :  { %v4359_v9 = vunpack.i.h.bf16 %v4357_v29  ;;  %v4358_v18 = vunpack.i.l.bf16 %v4357_v29 }
 0x695   :  { %v4352_v35 = vpop.permute.xlu0 %4351 }
 0x696   :  { %v4354_v4 = vunpack.i.h.bf16 %v4352_v35  ;;  %v4353_v21 = vunpack.i.l.bf16 %v4352_v35 }
 0x698   :  { %v980_v10 = vsel %vm74_vm0, %v974_v45, %v4353_v21  ;;  %v981_v57 = vsel %vm74_vm0, %v975_v5, %v4354_v4 }
 0x699   :  { %v987_v20 = vsel %vm986_vm4, %v980_v10, %v4358_v18  ;;  %v988_v62 = vsel %vm986_vm4, %v981_v57, %v4359_v9 }
 0x69a   :  { %v993_v2 = vpack.c.bf16 %v988_v62, %v987_v20 }
 0x69c   :  { %3959 = vmatmul.msk.bf16.vlgmr.msra.gmra.mxu3 %vm131_vm1, %v993_v2 }
 0x69d   :  { %v4362_v40 = vpop.permute.xlu0 %4361 }
 0x69e   :  { %v4364_v12 = vunpack.i.h.bf16 %v4362_v40  ;;  %v4363_v34 = vunpack.i.l.bf16 %v4362_v40 }
 0x6a0   :  { %v977_v61 = vsel %vm177_vm2, %v5270_v60, %v4364_v12  ;;  %v976_v27 = vsel %vm177_vm2, %v5266_v59, %v4363_v34 }
 0x6a5   :  { %v4377_v8 = vpop.permute.xlu0 %4376 }
 0x6a6   :  { %v4379_v63 = vunpack.i.h.bf16 %v4377_v8  ;;  %v4378_v11 = vunpack.i.l.bf16 %v4377_v8 }
 0x6a8   :  { %v979_v54 = vsel %vm177_vm2, %v5284_v19, %v4379_v63  ;;  %v978_v22 = vsel %vm177_vm2, %v5275_v3, %v4378_v11  ;;  %v4283_v19 = vld [vmem:[%s7209_s8 + $0x8] sm:$0xff]  ;;  %v4282_v3 = vld [vmem:[%s7209_s8] sm:$0xff] }
 0x6a9   :  { %1111 = vmatpush.bf16.msra.mxu2 %v4283_v19 }
 0x6ad   :  { %1112 = vmatpush.bf16.msra.mxu2 %v4282_v3 }
 0x6b8   :  { %v4372_v58 = vpop.permute.xlu2 %4371 }
 0x6b9   :  { %v4374_v32 = vunpack.i.h.bf16 %v4372_v58  ;;  %v4373_v26 = vunpack.i.l.bf16 %v4372_v58 }
 0x6c4   :  { %v4367_v7 = vpop.permute.xlu1 %4366 }
 0x6c5   :  { %v4369_v1 = vunpack.i.h.bf16 %v4367_v7  ;;  %v4368_v53 = vunpack.i.l.bf16 %v4367_v7 }
 0x6c7   :  { %v982_v55 = vsel %vm74_vm0, %v976_v27, %v4368_v53  ;;  %v983_v44 = vsel %vm74_vm0, %v977_v61, %v4369_v1 }
 0x6c8   :  { %v989_v33 = vsel %vm986_vm4, %v982_v55, %v4373_v26  ;;  %v990_v14 = vsel %vm986_vm4, %v983_v44, %v4374_v32  ;;  %v4387_v60 = vpop.permute.xlu2 %4386  ;;  %v4286_v32 = vld [vmem:[%s7211_s10 + $0x10] sm:$0xff]  ;;  %v4628_v26 = vld [vmem:[%s7208_s9] ss:$0 sm:$0xff] }
 0x6c9   :  { %v994_v43 = vpack.c.bf16 %v990_v14, %v989_v33  ;;  %v4389_v36 = vunpack.i.h.bf16 %v4387_v60  ;;  %v4388_v41 = vunpack.i.l.bf16 %v4387_v60  ;;  %v4284_v44 = vld [vmem:[%s7211_s10] sm:$0xff] }
 0x6cb   :  { %3960 = vmatmul.msk.bf16.gmra.mxu3 %vm131_vm1, %v994_v43 }
 0x6d4   :  { %v4382_v39 = vpop.permute.xlu1 %4381 }
 0x6d5   :  { %v4384_v47 = vunpack.i.h.bf16 %v4382_v39  ;;  %v4383_v59 = vunpack.i.l.bf16 %v4382_v39 }
 0x6d7   :  { %v984_v49 = vsel %vm74_vm0, %v978_v22, %v4383_v59  ;;  %v985_v42 = vsel %vm74_vm0, %v979_v54, %v4384_v47 }
 0x6d8   :  { %v991_v15 = vsel %vm986_vm4, %v984_v49, %v4388_v41  ;;  %v992_v46 = vsel %vm986_vm4, %v985_v42, %v4389_v36 }
 0x6d9   :  { %v995_v50 = vpack.c.bf16 %v992_v46, %v991_v15 }
 0x6db   :  { %3961 = vmatmul.msk.bf16.gmra.mxu3 %vm131_vm1, %v995_v50 }
 0x71f   :  { %v1030_v25 = vpop.f32.mrf.mxu3 }
 0x720   :  { %v1046_v6 = vadd.f32 %v1030_v25, %v5005_v16 }
 0x722   :  { %v1053_v56 = vadd.f32 %v1052_v51, %v1046_v6 }
 0x724   :  { %v1060_v37 = vmul.f32 %v1059_v13, %v1053_v56 }
 0x726   :  { %v5523_v35 = vadd.f32 %v1066_v38, %v1060_v37 }
 0x727   :  { %v1032_v0 = vpop.f32.mrf.mxu3 }
 0x728   :  { %v1047_v48 = vadd.f32 %v1032_v0, %v5007_v17 }
 0x72a   :  { %v1054_v28 = vadd.f32 %v1052_v51, %v1047_v48 }
 0x72c   :  { %v1061_v29 = vmul.f32 %v1059_v13, %v1054_v28 }
 0x72e   :  { %v5525_v4 = vadd.f32 %v1066_v38, %v1061_v29 }
 0x730   :  { %v1073_v16 = vpack.c.bf16 %v5525_v4, %v5523_v35 }
 0x732   :  { %3970 = vmatmul.msk.bf16.vlgmr.msra.gmra.mxu2 %vm131_vm1, %v1073_v16 }
 0x74e   :  { %v1035_v21 = vpop.f32.mrf.mxu3 }
 0x74f   :  { %v1048_v5 = vadd.f32 %v1035_v21, %v5018_v23 }
 0x751   :  { %v1055_v45 = vadd.f32 %v1052_v51, %v1048_v5 }
 0x753   :  { %v1062_v18 = vmul.f32 %v1059_v13, %v1055_v45 }
 0x755   :  { %v5532_v20 = vadd.f32 %v1066_v38, %v1062_v18 }
 0x756   :  { %v1037_v9 = vpop.f32.mrf.mxu3 }
 0x757   :  { %v1049_v17 = vadd.f32 %v1037_v9, %v5020_v24 }
 0x759   :  { %v1056_v10 = vadd.f32 %v1052_v51, %v1049_v17 }
 0x75b   :  { %v1063_v57 = vmul.f32 %v1059_v13, %v1056_v10 }
 0x75d   :  { %v5534_v62 = vadd.f32 %v1066_v38, %v1063_v57 }
 0x75e   :  { %v1040_v2 = vpop.f32.mrf.mxu3 }
 0x75f   :  { %v1050_v40 = vadd.f32 %v1040_v2, %v5031_v30  ;;  %v1074_v12 = vpack.c.bf16 %v5534_v62, %v5532_v20  ;;  %v4287_v30 = vld [vmem:[%s7211_s10 + $0x18] sm:$0xff] }
 0x760   :  { %1232 = vmatpush.bf16.msrb.mxu0 %v4287_v30 }
 0x761   :  { %v1057_v34 = vadd.f32 %v1052_v51, %v1050_v40  ;;  %3971 = vmatmul.msk.bf16.gmra.mxu2 %vm131_vm1, %v1074_v12 }
 0x763   :  { %v1064_v23 = vmul.f32 %v1059_v13, %v1057_v34 }
 0x764   :  { %1233 = vmatpush.bf16.msrb.mxu0 %v4286_v32 }
 0x765   :  { %v5540_v58 = vadd.f32 %v1066_v38, %v1064_v23 }
 0x766   :  { %v1042_v24 = vpop.f32.mrf.mxu3 }
 0x767   :  { %v1051_v7 = vadd.f32 %v1042_v24, %v5033_v31  ;;  %v4285_v31 = vld [vmem:[%s7211_s10 + $0x8] sm:$0xff] }
 0x768   :  { %1234 = vmatpush.bf16.msrb.mxu0 %v4285_v31 }
 0x769   :  { %v1058_v1 = vadd.f32 %v1052_v51, %v1051_v7 }
 0x76b   :  { %v1065_v53 = vmul.f32 %v1059_v13, %v1058_v1 }
 0x76c   :  { %1235 = vmatpush.bf16.msrb.mxu0 %v4284_v44 }
 0x76d   :  { %v5543_v61 = vadd.f32 %v1066_v38, %v1065_v53 }
 0x76f   :  { %v1075_v27 = vpack.c.bf16 %v5543_v61, %v5540_v58 }
 0x771   :  { %3972 = vmatmul.msk.bf16.gmra.mxu2 %vm131_vm1, %v1075_v27 }
 0x7b5   :  { %v1114_v55 = vpop.f32.mrf.mxu2 }
 0x7b6   :  { %v1115_v33 = vadd.f32 %v4628_v26, %v1114_v55 }
 0x7b8   :  { %v1129_v14 = vmul.f32 %v1115_v33, %v1115_v33 }
 0x7ba   :  { %v1135_v43 = vmul.f32 %v1129_v14, %v1115_v33 }
 0x7bc   :  { %v1141_v8 = vmul.f32 0.044715, %v1135_v43 }
 0x7bd   :  { %v1116_v63 = vpop.f32.mrf.mxu2 }
 0x7be   :  { %v1147_v11 = vadd.f32 %v1141_v8, %v1115_v33  ;;  %v1117_v60 = vadd.f32 %v4628_v26, %v1116_v63 }
 0x7c0   :  { %v1153_v39 = vmul.f32 0.7978846, %v1147_v11  ;;  %v1130_v47 = vmul.f32 %v1117_v60, %v1117_v60 }
 0x7c2   :  { %v1136_v59 = vmul.f32 %v1130_v47, %v1117_v60  ;;  %4727 = vtanh.f32 %v1153_v39 }
 0x7c4   :  { %v1142_v54 = vmul.f32 0.044715, %v1136_v59 }
 0x7c6   :  { %v1148_v22 = vadd.f32 %v1142_v54, %v1117_v60 }
 0x7c8   :  { %v1154_v36 = vmul.f32 0.7978846, %v1148_v22  ;;  %v4728_v41 = vpop.eup %4727  ;;  %v4289_v22 = vld [vmem:[%s7204_s4 + $0x18] sm:$0xff] }
 0x7c9   :  { %v1165_v49 = vadd.f32 1.0, %v4728_v41  ;;  %1319 = vmatpush.bf16.msra.mxu1 %v4289_v22 }
 0x7ca   :  { %4729 = vtanh.f32 %v1154_v36  ;;  %v4288_v36 = vld [vmem:[%s7204_s4 + $0x10] sm:$0xff] }
 0x7cb   :  { %v1171_v15 = vmul.f32 0.5, %v1165_v49 }
 0x7cd   :  { %v1177_v19 = vmul.f32 %v1171_v15, %v1115_v33  ;;  %1320 = vmatpush.bf16.msra.mxu1 %v4288_v36 }
 0x7d0   :  { %v4730_v42 = vpop.eup %4729 }
 0x7d1   :  { %v1166_v46 = vadd.f32 1.0, %v4730_v42  ;;  %v1258_v42 = vperm.slane %v5516_v52, 3 }
 0x7d3   :  { %v1172_v50 = vmul.f32 0.5, %v1166_v46  ;;  %v1265_v46 = vperm.slane %v5516_v52, 4 }
 0x7d5   :  { %v1178_v3 = vmul.f32 %v1172_v50, %v1117_v60 }
 0x7d7   :  { %v1183_v25 = vpack.c.bf16 %v1178_v3, %v1177_v19 }
 0x7d9   :  { %3989 = vmatmul.msk.bf16.vlgmr.msrb.gmra.mxu0 %vm1218_vm5, %v1183_v25  ;;  %v1272_v25 = vperm.slane %v5516_v52, 5 }
 0x7e4   :  { %v1119_v6 = vpop.f32.mrf.mxu2 }
 0x7e5   :  { %v1120_v51 = vadd.f32 %v4628_v26, %v1119_v6 }
 0x7e7   :  { %v1131_v56 = vmul.f32 %v1120_v51, %v1120_v51 }
 0x7e9   :  { %v1137_v13 = vmul.f32 %v1131_v56, %v1120_v51 }
 0x7eb   :  { %v1143_v0 = vmul.f32 0.044715, %v1137_v13 }
 0x7ec   :  { %v1121_v48 = vpop.f32.mrf.mxu2 }
 0x7ed   :  { %v1149_v37 = vadd.f32 %v1143_v0, %v1120_v51  ;;  %v1122_v38 = vadd.f32 %v4628_v26, %v1121_v48 }
 0x7ef   :  { %v1155_v28 = vmul.f32 0.7978846, %v1149_v37  ;;  %v1132_v29 = vmul.f32 %v1122_v38, %v1122_v38 }
 0x7f1   :  { %v1138_v16 = vmul.f32 %v1132_v29, %v1122_v38  ;;  %4731 = vtanh.f32 %v1155_v28 }
 0x7f3   :  { %v1144_v21 = vmul.f32 0.044715, %v1138_v16 }
 0x7f4   :  { %v1124_v5 = vpop.f32.mrf.mxu2 }
 0x7f5   :  { %v1150_v45 = vadd.f32 %v1144_v21, %v1122_v38  ;;  %v1125_v9 = vadd.f32 %v4628_v26, %v1124_v5 }
 0x7f7   :  { %v1156_v17 = vmul.f32 0.7978846, %v1150_v45  ;;  %v1133_v18 = vmul.f32 %v1125_v9, %v1125_v9  ;;  %v4732_v10 = vpop.eup %4731 }
 0x7f8   :  { %v1167_v12 = vadd.f32 1.0, %v4732_v10 }
 0x7f9   :  { %4733 = vtanh.f32 %v1156_v17  ;;  %v1139_v57 = vmul.f32 %v1133_v18, %v1125_v9 }
 0x7fa   :  { %v1173_v27 = vmul.f32 0.5, %v1167_v12 }
 0x7fb   :  { %v1145_v2 = vmul.f32 0.044715, %v1139_v57 }
 0x7fc   :  { %v1126_v40 = vpop.f32.mrf.mxu2  ;;  %v1179_v55 = vmul.f32 %v1173_v27, %v1120_v51 }
 0x7fd   :  { %v1151_v34 = vadd.f32 %v1145_v2, %v1125_v9  ;;  %v1127_v23 = vadd.f32 %v4628_v26, %v1126_v40 }
 0x7ff   :  { %v4734_v24 = vpop.eup %4733  ;;  %v1157_v7 = vmul.f32 0.7978846, %v1151_v34  ;;  %v1134_v1 = vmul.f32 %v1127_v23, %v1127_v23  ;;  %v4629_v34 = vld [vmem:[%s7203_s5 + $0x1] ss:$0 sm:$0xff]  ;;  %s7229_s5 = smov 40  }
 0x800   :  { %v1168_v53 = vadd.f32 1.0, %v4734_v24 }
 0x801   :  { %v1140_v30 = vmul.f32 %v1134_v1, %v1127_v23  ;;  %4735 = vtanh.f32 %v1157_v7 }
 0x802   :  { %v1174_v32 = vmul.f32 0.5, %v1168_v53 }
 0x803   :  { %v1146_v31 = vmul.f32 0.044715, %v1140_v30 }
 0x804   :  { %v1180_v44 = vmul.f32 %v1174_v32, %v1122_v38 }
 0x805   :  { %v1152_v33 = vadd.f32 %v1146_v31, %v1127_v23 }
 0x806   :  { %v1184_v14 = vpack.c.bf16 %v1180_v44, %v1179_v55 }
 0x807   :  { %v1158_v43 = vmul.f32 0.7978846, %v1152_v33  ;;  %v4736_v8 = vpop.eup %4735 }
 0x808   :  { %3990 = vmatmul.msk.bf16.gmra.mxu0 %vm1218_vm5, %v1184_v14  ;;  %v1169_v63 = vadd.f32 1.0, %v4736_v8 }
 0x809   :  { %4737 = vtanh.f32 %v1158_v43 }
 0x80a   :  { %v1175_v60 = vmul.f32 0.5, %v1169_v63 }
 0x80c   :  { %v1181_v47 = vmul.f32 %v1175_v60, %v1125_v9 }
 0x80f   :  { %v4738_v26 = vpop.eup %4737 }
 0x810   :  { %v1170_v11 = vadd.f32 1.0, %v4738_v26 }
 0x812   :  { %v1176_v39 = vmul.f32 0.5, %v1170_v11 }
 0x814   :  { %v1182_v59 = vmul.f32 %v1176_v39, %v1127_v23 }
 0x816   :  { %v1185_v54 = vpack.c.bf16 %v1182_v59, %v1181_v47 }
 0x818   :  { %3991 = vmatmul.msk.bf16.gmra.mxu0 %vm1218_vm5, %v1185_v54 }
 0x856   :  { %v1237_v41 = vpop.f32.mrf.mxu0 }
 0x857   :  { %v1252_v49 = vadd.f32 %v1237_v41, %v5523_v35 }
 0x859   :  { %v1259_v15 = vadd.f32 %v1258_v42, %v1252_v49 }
 0x85b   :  { %v1266_v3 = vmul.f32 %v1265_v46, %v1259_v15 }
 0x85d   :  { %v5577_v56 = vadd.f32 %v1272_v25, %v1266_v3 }
 0x85e   :  { %v1239_v50 = vpop.f32.mrf.mxu0 }
 0x85f   :  { %v1253_v19 = vadd.f32 %v1239_v50, %v5525_v4 }
 0x861   :  { %v1260_v6 = vadd.f32 %v1258_v42, %v1253_v19 }
 0x863   :  { %v1267_v51 = vmul.f32 %v1265_v46, %v1260_v6 }
 0x865   :  { %v5579_v13 = vadd.f32 %v1272_v25, %v1267_v51 }
 0x867   :  { %v1279_v35 = vpack.c.bf16 %v5579_v13, %v5577_v56 }
 0x869   :  { %4005 = vmatmul.msk.bf16.vlgmr.msra.gmra.mxu1 %vm131_vm1, %v1279_v35 }
 0x885   :  { %v1242_v0 = vpop.f32.mrf.mxu0 }
 0x886   :  { %v1254_v48 = vadd.f32 %v1242_v0, %v5532_v20 }
 0x888   :  { %v1261_v37 = vadd.f32 %v1258_v42, %v1254_v48 }
 0x88a   :  { %v1268_v28 = vmul.f32 %v1265_v46, %v1261_v37 }
 0x88c   :  { %v5586_v16 = vadd.f32 %v1272_v25, %v1268_v28 }
 0x88d   :  { %v1244_v38 = vpop.f32.mrf.mxu0 }
 0x88e   :  { %v1255_v4 = vadd.f32 %v1244_v38, %v5534_v62 }
 0x890   :  { %v1262_v52 = vadd.f32 %v1258_v42, %v1255_v4 }
 0x892   :  { %v1269_v29 = vmul.f32 %v1265_v46, %v1262_v52 }
 0x894   :  { %v5588_v21 = vadd.f32 %v1272_v25, %v1269_v29 }
 0x895   :  { %v1247_v5 = vpop.f32.mrf.mxu0 }
 0x896   :  { %v1256_v45 = vadd.f32 %v1247_v5, %v5540_v58  ;;  %v1280_v9 = vpack.c.bf16 %v5588_v21, %v5586_v16 }
 0x898   :  { %v1263_v17 = vadd.f32 %v1258_v42, %v1256_v45  ;;  %4006 = vmatmul.msk.bf16.gmra.mxu1 %vm131_vm1, %v1280_v9 }
 0x89a   :  { %v1270_v20 = vmul.f32 %v1265_v46, %v1263_v17 }
 0x89c   :  { %v5594_v18 = vadd.f32 %v1272_v25, %v1270_v20 }
 0x89d   :  { %v1249_v62 = vpop.f32.mrf.mxu0 }
 0x89e   :  { %v1257_v10 = vadd.f32 %v1249_v62, %v5543_v61 }
 0x8a0   :  { %v1264_v57 = vadd.f32 %v1258_v42, %v1257_v10 }
 0x8a2   :  { %v1271_v2 = vmul.f32 %v1265_v46, %v1264_v57 }
 0x8a4   :  { %v5597_v40 = vadd.f32 %v1272_v25, %v1271_v2 }
 0x8a6   :  { %v1281_v12 = vpack.c.bf16 %v5597_v40, %v5594_v18 }
 0x8a8   :  { %4007 = vmatmul.msk.bf16.gmra.mxu1 %vm131_vm1, %v1281_v12 }
 0x8e6   :  { %v1322_v58 = vpop.f32.mrf.mxu1 }
 0x8e7   :  { %v1323_v24 = vadd.f32 %v4629_v34, %v1322_v58 }
 0x8ee   :  { %v1324_v23 = vpop.f32.mrf.mxu1 }
 0x8ef   :  { %v1325_v7 = vadd.f32 %v4629_v34, %v1324_v23  ;;  %v1397_v23 = vld [vmem:[#allocation2] sm:$0xff] }
 0x8f1   :  { %v1337_v1 = vpack.c.bf16 %v1325_v7, %v1323_v24  ;;  %v5689_v7 = vld [vmem:[%s7206_s1] sm:$0xff] }
 0x8f3   :  { %1343 = vrot.lane.b32.xlu0 %v1337_v1, %s4854_s20 }
 0x8fb   :  { %1484 = vrot.lane.b32.xlu0 %v1337_v1, %s4853_s2 }
 0x903   :  { %1526 = vrot.lane.b32.xlu0 %v1337_v1, %s4858_s24 }
 0x915   :  { %v1327_v61 = vpop.f32.mrf.mxu1 }
 0x916   :  { %v1328_v27 = vadd.f32 %v4629_v34, %v1327_v61 }
 0x91d   :  { %v1329_v53 = vpop.f32.mrf.mxu1 }
 0x91e   :  { %v1330_v30 = vadd.f32 %v4629_v34, %v1329_v53 }
 0x920   :  { %v5608_v32 = vpack.c.bf16 %v1330_v30, %v1328_v27 }
 0x922   :  { %1345 = vrot.lane.b32.xlu1 %v5608_v32, %s4854_s20 }
 0x925   :  { %v1332_v31 = vpop.f32.mrf.mxu1 }
 0x926   :  { %v1333_v44 = vadd.f32 %v4629_v34, %v1332_v31 }
 0x92a   :  { %1486 = vrot.lane.b32.xlu1 %v5608_v32, %s4853_s2 }
 0x92d   :  { %v1334_v55 = vpop.f32.mrf.mxu1 }
 0x92e   :  { %v1335_v33 = vadd.f32 %v4629_v34, %v1334_v55  ;;  %v1586_v55 = vld [vmem:[#allocation2 + $0x30] sm:$0xff] }
 0x930   :  { %v5614_v14 = vpack.c.bf16 %v1335_v33, %v1333_v44 }
 0x932   :  { %1528 = vrot.lane.b32.xlu1 %v5608_v32, %s4858_s24  ;;  %1530 = vrot.lane.b32.xlu0 %v5614_v14, %s4858_s24 }
 0x933   :  { %1347 = vrot.lane.b32.xlu2 %v5614_v14, %s4854_s20 }
 0x93a   :  { %1534 = vrot.lane.b32.xlu1 %v5608_v32, %s4855_s21  ;;  %1536 = vrot.lane.b32.xlu0 %v5614_v14, %s4855_s21 }
 0x93b   :  { %1532 = vrot.lane.b32.xlu2 %v1337_v1, %s4855_s21 }
 0x942   :  { %1675 = vrot.lane.b32.xlu1 %v5608_v32, %s4861_s25  ;;  %1673 = vrot.lane.b32.xlu0 %v1337_v1, %s4861_s25 }
 0x943   :  { %1488 = vrot.lane.b32.xlu2 %v5614_v14, %s4853_s2 }
 0x94a   :  { %1719 = vrot.lane.b32.xlu1 %v5614_v14, %s4859_s30  ;;  %1715 = vrot.lane.b32.xlu0 %v1337_v1, %s4859_s30 }
 0x94b   :  { %1721 = vrot.lane.b32.xlu2 %v1337_v1, %s4856_s22 }
 0x952   :  { %1725 = vrot.lane.b32.xlu1 %v5614_v14, %s4856_s22  ;;  %1717 = vrot.lane.b32.xlu0 %v5608_v32, %s4859_s30 }
 0x953   :  { %1677 = vrot.lane.b32.xlu2 %v5614_v14, %s4861_s25 }
 0x95a   :  { %1862 = vrot.lane.b32.xlu1 %v1337_v1, %s4862_s26  ;;  %1723 = vrot.lane.b32.xlu0 %v5608_v32, %s4856_s22 }
 0x95b   :  { %1866 = vrot.lane.b32.xlu2 %v5614_v14, %s4862_s26 }
 0x962   :  { %1906 = vrot.lane.b32.xlu1 %v5608_v32, %s4860_s19  ;;  %1864 = vrot.lane.b32.xlu0 %v5608_v32, %s4862_s26 }
 0x963   :  { %1908 = vrot.lane.b32.xlu2 %v5614_v14, %s4860_s19 }
 0x965   :  { %v1344_v43 = vpop.permute.xlu0 %1343 }
 0x966   :  { %v1359_v22 = vsel %vm177_vm2, %v1344_v43, 0 }
 0x96a   :  { %1912 = vrot.lane.b32.xlu1 %v5608_v32, %s4857_s23  ;;  %1904 = vrot.lane.b32.xlu0 %v1337_v1, %s4860_s19 }
 0x96b   :  { %1914 = vrot.lane.b32.xlu2 %v5614_v14, %s4857_s23 }
 0x96d   :  { %v1485_v26 = vpop.permute.xlu0 %1484 }
 0x972   :  { %1910 = vrot.lane.b32.xlu0 %v1337_v1, %s4857_s23 }
 0x975   :  { %v1527_v47 = vpop.permute.xlu0 %1526 }
 0x97a   :  { %2051 = vrot.lane.b32.xlu0 %v1337_v1, %s7229_s5 }
 0x98d   :  { %v1348_v8 = vpop.permute.xlu2 %1347 }
 0x98e   :  { %v1365_v63 = vsel %vm177_vm2, %v1348_v8, 0 }
 0x98f   :  { %1372 = vmatpush.bf16.xpose.msrb.mxu3 %v1365_v63  ;;  %v1399_v63 = vld [vmem:[#allocation2 + $0x10] sm:$0xff] }
 0x994   :  { %v1346_v11 = vpop.permute.xlu1 %1345 }
 0x995   :  { %v1533_v60 = vpop.permute.xlu2 %1532  ;;  %v1362_v39 = vsel %vm177_vm2, %v1346_v11, 0 }
 0x996   :  { %v1548_v48 = vsel %vm177_vm2, %v1533_v60, 0 }
 0x997   :  { %1373 = vmatpush.bf16.xpose.msrb.mxu3 %v1362_v39 }
 0x99c   :  { %v1487_v59 = vpop.permute.xlu1 %1486 }
 0x99d   :  { %v1489_v54 = vpop.permute.xlu2 %1488 }
 0x99e   :  { %1507 = vmatpush.bf16.msrb.mxu2 %v1489_v54 }
 0x99f   :  { %1374 = vmatpush.bf16.xpose.msrb.mxu3 %v1359_v22  ;;  %v5704_v22 = vld [vmem:[%s7206_s1 + $0x10] sm:$0xff] }
 0x9a2   :  { %1508 = vmatpush.bf16.msrb.mxu2 %v1487_v59 }
 0x9a4   :  { %v1529_v36 = vpop.permute.xlu1 %1528  ;;  %v1531_v41 = vpop.permute.xlu0 %1530 }
 0x9a5   :  { %v1722_v49 = vpop.permute.xlu2 %1721 }
 0x9a6   :  { %4008 = vmatmul.msk.bf16.vlgmr.msrb.gmra.mxu3 %vm177_vm2, %v1337_v1  ;;  %1509 = vmatpush.bf16.msrb.mxu2 %v1485_v26  ;;  %v1737_v20 = vsel %vm177_vm2, %v1722_v49, 0 }
 0x9ac   :  { %v1535_v42 = vpop.permute.xlu1 %1534  ;;  %v1537_v15 = vpop.permute.xlu0 %1536 }
 0x9ad   :  { %v1554_v46 = vsel %vm177_vm2, %v1537_v15, 0  ;;  %v1678_v50 = vpop.permute.xlu2 %1677  ;;  %v1551_v6 = vsel %vm177_vm2, %v1535_v42, 0  ;;  %v1398_v42 = vld [vmem:[#allocation2 + $0x8] sm:$0xff] }
 0x9ae   :  { %1696 = vmatpush.bf16.msrb.mxu1 %v1678_v50  ;;  %1561 = vmatpush.bf16.xpose.msra.mxu0 %v1554_v46 }
 0x9b4   :  { %v1676_v19 = vpop.permute.xlu1 %1675  ;;  %v1674_v3 = vpop.permute.xlu0 %1673 }
 0x9b5   :  { %v1867_v25 = vpop.permute.xlu2 %1866  ;;  %1697 = vmatpush.bf16.msrb.mxu1 %v1676_v19 }
 0x9b6   :  { %4009 = vmatmul.msk.bf16.gmra.mxu3 %vm177_vm2, %v5608_v32  ;;  %1885 = vmatpush.bf16.msra.mxu2 %v1867_v25 }
 0x9b7   :  { %1562 = vmatpush.bf16.xpose.msra.mxu0 %v1551_v6  ;;  %v1588_v6 = vld [vmem:[#allocation2 + $0x40] sm:$0xff] }
 0x9b9   :  { %1698 = vmatpush.bf16.msrb.mxu1 %v1674_v3 }
 0x9bc   :  { %v1720_v51 = vpop.permute.xlu1 %1719  ;;  %v1716_v35 = vpop.permute.xlu0 %1715 }
 0x9bd   :  { %v1909_v0 = vpop.permute.xlu2 %1908 }
 0x9bf   :  { %1563 = vmatpush.bf16.xpose.msra.mxu0 %v1548_v48 }
 0x9c4   :  { %v1726_v37 = vpop.permute.xlu1 %1725  ;;  %v1718_v38 = vpop.permute.xlu0 %1717 }
 0x9c5   :  { %v1743_v4 = vsel %vm177_vm2, %v1726_v37, 0  ;;  %v1915_v28 = vpop.permute.xlu2 %1914  ;;  %v1400_v37 = vld [vmem:[#allocation2 + $0x18] sm:$0xff] }
 0x9c6   :  { %v1932_v52 = vsel %vm177_vm2, %v1915_v28, 0  ;;  %4010 = vmatmul.msk.bf16.gmra.mxu3 %vm177_vm2, %v5614_v14  ;;  %4014 = vmatmul.msk.bf16.vlgmr.msra.gmra.mxu0 %vm177_vm2, %v1527_v47  ;;  %v1587_v47 = vld [vmem:[#allocation2 + $0x38] sm:$0xff] }
 0x9c7   :  { %1750 = vmatpush.bf16.xpose.msra.mxu3 %v1743_v4  ;;  %1939 = vmatpush.bf16.xpose.msrb.mxu0 %v1932_v52 }
 0x9cc   :  { %v1863_v29 = vpop.permute.xlu1 %1862  ;;  %v1724_v5 = vpop.permute.xlu0 %1723 }
 0x9cd   :  { %v1740_v45 = vsel %vm177_vm2, %v1724_v5, 0 }
 0x9cf   :  { %1751 = vmatpush.bf16.xpose.msra.mxu3 %v1740_v45  ;;  %v1589_v45 = vld [vmem:[#allocation2 + $0x48] sm:$0xff] }
 0x9d4   :  { %v1907_v9 = vpop.permute.xlu1 %1906  ;;  %v1865_v17 = vpop.permute.xlu0 %1864 }
 0x9d5   :  { %1886 = vmatpush.bf16.msra.mxu2 %v1865_v17  ;;  %v5734_v17 = vld [vmem:[%s7206_s1 + $0x18] sm:$0xff] }
 0x9d6   :  { %4015 = vmatmul.msk.bf16.gmra.mxu0 %vm177_vm2, %v1529_v36 }
 0x9d7   :  { %1752 = vmatpush.bf16.xpose.msra.mxu3 %v1737_v20 }
 0x9d9   :  { %1887 = vmatpush.bf16.msra.mxu2 %v1863_v29 }
 0x9dc   :  { %v1913_v62 = vpop.permute.xlu1 %1912  ;;  %v1905_v10 = vpop.permute.xlu0 %1904 }
 0x9dd   :  { %v1929_v57 = vsel %vm177_vm2, %v1913_v62, 0 }
 0x9de   :  { %4020 = vmatmul.msk.bf16.vlgmr.msra.gmra.mxu3 %vm177_vm2, %v1716_v35  ;;  %1940 = vmatpush.bf16.xpose.msrb.mxu0 %v1929_v57 }
 0x9e4   :  { %v1911_v2 = vpop.permute.xlu0 %1910 }
 0x9e5   :  { %v1926_v12 = vsel %vm177_vm2, %v1911_v2, 0 }
 0x9e6   :  { %4016 = vmatmul.msk.bf16.gmra.mxu0 %vm177_vm2, %v1531_v41  ;;  %v5712_v41 = vld [vmem:[%s7206_s1 + $0x8] sm:$0xff] }
 0x9e7   :  { %1941 = vmatpush.bf16.xpose.msrb.mxu0 %v1926_v12 }
 0x9ee   :  { %4021 = vmatmul.msk.bf16.gmra.mxu3 %vm177_vm2, %v1718_v38 }
 0x9f6   :  { %4026 = vmatmul.msk.bf16.vlgmr.msrb.gmra.mxu0 %vm177_vm2, %v1905_v10 }
 0x9fe   :  { %4022 = vmatmul.msk.bf16.gmra.mxu3 %vm177_vm2, %v1720_v51 }
 0xa06   :  { %4027 = vmatmul.msk.bf16.gmra.mxu0 %vm177_vm2, %v1907_v9 }
 0xa16   :  { %4028 = vmatmul.msk.bf16.gmra.mxu0 %vm177_vm2, %v1909_v0 }
 0xa29   :  { %v1376_v58 = vpop.f32.mrf.mxu3 }
 0xa2a   :  { %v1391_v34 = vmul.f32 0.35355338, %v1376_v58 }
 0xa2c   :  { %v1403_v24 = vadd.f32 %v1397_v23, %v1391_v34  ;;  %v1590_v34 = vld [vmem:[#allocation2 + $0x50] sm:$0xff] }
 0xa2e   :  { %v5692_v1 = vadd.f32 %v5689_v7, %v1403_v24 }
 0xa30   :  { %v1415_v61 = vsel %vm226_vm3, %v5692_v1, -inf }
 0xa31   :  { %1416 = vmax.xlane.f32.xlu0 %v1415_v61  ;;  %v1378_v53 = vpop.f32.mrf.mxu3  ;;  %v5749_v61 = vld [vmem:[%s7206_s1 + $0x20] sm:$0xff] }
 0xa32   :  { %v1392_v59 = vmul.f32 0.35355338, %v1378_v53 }
 0xa34   :  { %v1404_v46 = vadd.f32 %v1398_v42, %v1392_v59 }
 0xa36   :  { %v5722_v0 = vadd.f32 %v5712_v41, %v1404_v46 }
 0xa38   :  { %v1418_v4 = vsel %vm226_vm3, %v5722_v0, -inf }
 0xa39   :  { %v1381_v27 = vpop.f32.mrf.mxu3 }
 0xa3a   :  { %v1393_v44 = vmul.f32 0.35355338, %v1381_v27  ;;  %v1401_v27 = vld [vmem:[#allocation2 + $0x20] sm:$0xff] }
 0xa3c   :  { %v1405_v26 = vadd.f32 %v1399_v63, %v1393_v44 }
 0xa3e   :  { %v5707_v36 = vadd.f32 %v5704_v22, %v1405_v26 }
 0xa40   :  { %v1421_v50 = vsel %vm226_vm3, %v5707_v36, -inf }
 0xa41   :  { %v1383_v43 = vpop.f32.mrf.mxu3 }
 0xa42   :  { %v1394_v51 = vmul.f32 0.35355338, %v1383_v43  ;;  %v1591_v43 = vld [vmem:[#allocation2 + $0x58] sm:$0xff] }
 0xa43   :  { %v1565_v30 = vpop.f32.mrf.mxu0 }
 0xa44   :  { %v1580_v31 = vmul.f32 0.35355338, %v1565_v30  ;;  %v1406_v38 = vadd.f32 %v1400_v37, %v1394_v51  ;;  %v1775_v37 = vld [vmem:[#allocation2 + $0x60] sm:$0xff] }
 0xa46   :  { %v1592_v33 = vadd.f32 %v1586_v55, %v1580_v31  ;;  %v5737_v20 = vadd.f32 %v5734_v17, %v1406_v38  ;;  %v1776_v38 = vld [vmem:[#allocation2 + $0x68] sm:$0xff] }
 0xa48   :  { %v5697_v8 = vadd.f32 %v5689_v7, %v1592_v33  ;;  %v1424_v10 = vsel %vm226_vm3, %v5737_v20, -inf }
 0xa49   :  { %v1386_v15 = vpop.f32.mrf.mxu3 }
 0xa4a   :  { %v1604_v11 = vsel %vm226_vm3, %v5697_v8, -inf  ;;  %v1395_v23 = vmul.f32 0.35355338, %v1386_v15 }
 0xa4b   :  { %1605 = vmax.xlane.f32.xlu2 %v1604_v11  ;;  %v1567_v60 = vpop.f32.mrf.mxu0 }
 0xa4c   :  { %v1581_v39 = vmul.f32 0.35355338, %v1567_v60  ;;  %v1407_v30 = vadd.f32 %v1401_v27, %v1395_v23  ;;  %v5762_v60 = vld [vmem:[%s7206_s1 + $0x28] sm:$0xff]  ;;  %v1777_v23 = vld [vmem:[#allocation2 + $0x70] sm:$0xff]  ;;  %s7230_s1 = smov 8  }
 0xa4e   :  { %v1593_v54 = vadd.f32 %v1587_v47, %v1581_v39  ;;  %v5757_v11 = vadd.f32 %v5749_v61, %v1407_v30  ;;  %v1402_v47 = vld [vmem:[#allocation2 + $0x28] sm:$0xff] }
 0xa50   :  { %v5715_v49 = vadd.f32 %v5712_v41, %v1593_v54  ;;  %v1427_v54 = vsel %vm226_vm3, %v5757_v11, -inf }
 0xa51   :  { %v1388_v52 = vpop.f32.mrf.mxu3 }
 0xa52   :  { %v1607_v19 = vsel %vm226_vm3, %v5715_v49, -inf  ;;  %v1396_v63 = vmul.f32 0.35355338, %v1388_v52 }
 0xa53   :  { %1422 = vmax.xlane.f32.xlu2 %v1421_v50  ;;  %1608 = vmax.xlane.f32.xlu1 %v1607_v19  ;;  %v1570_v3 = vpop.f32.mrf.mxu0  ;;  %v1964_v50 = vld [vmem:[#allocation2 + $0x90] sm:$0xff] }
 0xa54   :  { %v1582_v25 = vmul.f32 0.35355338, %v1570_v3  ;;  %v1408_v59 = vadd.f32 %v1402_v47, %v1396_v63 }
 0xa56   :  { %v1594_v35 = vadd.f32 %v1588_v6, %v1582_v25  ;;  %v5772_v6 = vadd.f32 %v5762_v60, %v1408_v59 }
 0xa58   :  { %v5725_v48 = vadd.f32 %v5704_v22, %v1594_v35  ;;  %v1430_v52 = vsel %vm226_vm3, %v5772_v6, -inf }
 0xa5a   :  { %v1610_v28 = vsel %vm226_vm3, %v5725_v48, -inf }
 0xa5b   :  { %1419 = vmax.xlane.f32.xlu1 %v1418_v4  ;;  %1611 = vmax.xlane.f32.xlu0 %v1610_v28  ;;  %v1572_v29 = vpop.f32.mrf.mxu0 }
 0xa5c   :  { %v1583_v5 = vmul.f32 0.35355338, %v1572_v29 }
 0xa5e   :  { %v1595_v9 = vadd.f32 %v1589_v45, %v1583_v5 }
 0xa60   :  { %v5740_v62 = vadd.f32 %v5734_v17, %v1595_v9  ;;  %v1965_v9 = vld [vmem:[#allocation2 + $0x98] sm:$0xff] }
 0xa61   :  { %v1754_v2 = vpop.f32.mrf.mxu3 }
 0xa62   :  { %v1613_v57 = vsel %vm226_vm3, %v5740_v62, -inf  ;;  %v1769_v19 = vmul.f32 0.35355338, %v1754_v2 }
 0xa63   :  { %1425 = vmax.xlane.f32.xlu0 %v1424_v10  ;;  %1614 = vmax.xlane.f32.xlu2 %v1613_v57  ;;  %v1575_v12 = vpop.f32.mrf.mxu0 }
 0xa64   :  { %v1584_v58 = vmul.f32 0.35355338, %v1575_v12  ;;  %v1781_v4 = vadd.f32 %v1775_v37, %v1769_v19 }
 0xa66   :  { %v1596_v24 = vadd.f32 %v1590_v34, %v1584_v58  ;;  %v5782_v57 = vadd.f32 %v5689_v7, %v1781_v4 }
 0xa68   :  { %v5752_v53 = vadd.f32 %v5749_v61, %v1596_v24  ;;  %v1793_v24 = vsel %vm226_vm3, %v5782_v57, -inf }
 0xa69   :  { %v1756_v33 = vpop.f32.mrf.mxu3 }
 0xa6a   :  { %v1616_v31 = vsel %vm226_vm3, %v5752_v53, -inf  ;;  %v1770_v3 = vmul.f32 0.35355338, %v1756_v33 }
 0xa6b   :  { %1617 = vmax.xlane.f32.xlu1 %v1616_v31  ;;  %v1577_v55 = vpop.f32.mrf.mxu0 }
 0xa6c   :  { %v1585_v44 = vmul.f32 0.35355338, %v1577_v55  ;;  %v1782_v28 = vadd.f32 %v1776_v38, %v1770_v3 }
 0xa6e   :  { %v1597_v26 = vadd.f32 %v1591_v43, %v1585_v44  ;;  %v5785_v2 = vadd.f32 %v5712_v41, %v1782_v28  ;;  %v1966_v44 = vld [vmem:[#allocation2 + $0xa0] sm:$0xff] }
 0xa70   :  { %v5765_v39 = vadd.f32 %v5762_v60, %v1597_v26  ;;  %v1796_v27 = vsel %vm226_vm3, %v5785_v2, -inf  ;;  %v1778_v26 = vld [vmem:[#allocation2 + $0x78] sm:$0xff] }
 0xa71   :  { %v1759_v51 = vpop.f32.mrf.mxu3 }
 0xa72   :  { %v1619_v42 = vsel %vm226_vm3, %v5765_v39, -inf  ;;  %v1771_v12 = vmul.f32 0.35355338, %v1759_v51  ;;  %v1779_v51 = vld [vmem:[#allocation2 + $0x80] sm:$0xff] }
 0xa73   :  { %1428 = vmax.xlane.f32.xlu1 %v1427_v54  ;;  %1620 = vmax.xlane.f32.xlu2 %v1619_v42  ;;  %v1943_v15 = vpop.f32.mrf.mxu0 }
 0xa74   :  { %v1958_v46 = vmul.f32 0.35355338, %v1943_v15 }
 0xa76   :  { %v1970_v25 = vadd.f32 %v1964_v50, %v1958_v46  ;;  %v1967_v50 = vld [vmem:[#allocation2 + $0xa8] sm:$0xff] }
 0xa78   :  { %v5775_v35 = vadd.f32 %v5689_v7, %v1970_v25  ;;  %v1783_v7 = vadd.f32 %v1777_v23, %v1771_v12 }
 0xa79   :  { %v1761_v34 = vpop.f32.mrf.mxu3 }
 0xa7a   :  { %v1982_v29 = vsel %vm226_vm3, %v5775_v35, -inf  ;;  %v5797_v43 = vadd.f32 %v5704_v22, %v1783_v7 }
 0xa7b   :  { %1431 = vmax.xlane.f32.xlu2 %v1430_v52  ;;  %1983 = vmax.xlane.f32.xlu0 %v1982_v29  ;;  %v1945_v5 = vpop.f32.mrf.mxu0  ;;  %v1968_v29 = vld [vmem:[#allocation2 + $0xb0] sm:$0xff] }
 0xa7c   :  { %v1959_v45 = vmul.f32 0.35355338, %v1945_v5  ;;  %v1799_v42 = vsel %vm226_vm3, %v5797_v43, -inf }
 0xa7e   :  { %v1971_v10 = vadd.f32 %v1965_v9, %v1959_v45 }
 0xa80   :  { %v5788_v58 = vadd.f32 %v5712_v41, %v1971_v10  ;;  %v1772_v41 = vmul.f32 0.35355338, %v1761_v34 }
 0xa81   :  { %v1764_v54 = vpop.f32.mrf.mxu3 }
 0xa82   :  { %v1985_v30 = vsel %vm226_vm3, %v5788_v58, -inf  ;;  %v1784_v47 = vadd.f32 %v1778_v26, %v1772_v41  ;;  %v1773_v19 = vmul.f32 0.35355338, %v1764_v54 }
 0xa83   :  { %1794 = vmax.xlane.f32.xlu2 %v1793_v24  ;;  %1797 = vmax.xlane.f32.xlu0 %v1796_v27  ;;  %v1948_v31 = vpop.f32.mrf.mxu0  ;;  %v1969_v24 = vld [vmem:[#allocation2 + $0xb8] sm:$0xff] }
 0xa84   :  { %1986 = vmax.xlane.f32.xlu1 %v1985_v30  ;;  %v1960_v55 = vmul.f32 0.35355338, %v1948_v31  ;;  %v5807_v25 = vadd.f32 %v5734_v17, %v1784_v47  ;;  %v1785_v37 = vadd.f32 %v1779_v51, %v1773_v19  ;;  %v1780_v31 = vld [vmem:[#allocation2 + $0x88] sm:$0xff] }
 0xa86   :  { %v1972_v33 = vadd.f32 %v1966_v44, %v1960_v55  ;;  %v1802_v38 = vsel %vm226_vm3, %v5807_v25, -inf  ;;  %v5817_v45 = vadd.f32 %v5749_v61, %v1785_v37 }
 0xa88   :  { %v5800_v63 = vadd.f32 %v5704_v22, %v1972_v33  ;;  %v1805_v9 = vsel %vm226_vm3, %v5817_v45, -inf  ;;  %v5836_v33 = vpop.permute.xlu0 %2051 }
 0xa89   :  { %v1766_v12 = vpop.f32.mrf.mxu3 }
 0xa8a   :  { %v1988_v59 = vsel %vm226_vm3, %v5800_v63, -inf  ;;  %v1774_v27 = vmul.f32 0.35355338, %v1766_v12 }
 0xa8b   :  { %1989 = vmax.xlane.f32.xlu2 %v1988_v59  ;;  %v1950_v15 = vpop.f32.mrf.mxu0 }
 0xa8c   :  { %1800 = vmax.xlane.f32.xlu1 %v1799_v42  ;;  %v1961_v46 = vmul.f32 0.35355338, %v1950_v15 }
 0xa8e   :  { %v1973_v3 = vadd.f32 %v1967_v50, %v1961_v46 }
 0xa90   :  { %v5810_v22 = vadd.f32 %v5734_v17, %v1973_v3 }
 0xa92   :  { %v1991_v4 = vsel %vm226_vm3, %v5810_v22, -inf }
 0xa93   :  { %1803 = vmax.xlane.f32.xlu2 %v1802_v38  ;;  %1992 = vmax.xlane.f32.xlu0 %v1991_v4  ;;  %v1953_v28 = vpop.f32.mrf.mxu0 }
 0xa94   :  { %v1962_v52 = vmul.f32 0.35355338, %v1953_v28 }
 0xa96   :  { %v1974_v5 = vadd.f32 %v1968_v29, %v1962_v52 }
 0xa98   :  { %v5820_v17 = vadd.f32 %v5749_v61, %v1974_v5  ;;  %v1786_v61 = vadd.f32 %v1780_v31, %v1774_v27 }
 0xa9a   :  { %v1994_v10 = vsel %vm226_vm3, %v5820_v17, -inf  ;;  %v5832_v44 = vadd.f32 %v5762_v60, %v1786_v61 }
 0xa9b   :  { %1806 = vmax.xlane.f32.xlu0 %v1805_v9  ;;  %1995 = vmax.xlane.f32.xlu1 %v1994_v10  ;;  %v1955_v34 = vpop.f32.mrf.mxu0 }
 0xa9c   :  { %v1963_v23 = vmul.f32 0.35355338, %v1955_v34  ;;  %v1808_v41 = vsel %vm226_vm3, %v5832_v44, -inf }
 0xa9e   :  { %v1975_v30 = vadd.f32 %v1969_v24, %v1963_v23 }
 0xaa0   :  { %v5827_v7 = vadd.f32 %v5762_v60, %v1975_v30 }
 0xaa2   :  { %v1997_v55 = vsel %vm226_vm3, %v5827_v7, -inf }
 0xaa3   :  { %1998 = vmax.xlane.f32.xlu2 %v1997_v55 }
 0xaa4   :  { %v1417_v26 = vpop.xlane.xlu0 %1416 }
 0xaa5   :  { %v1433_v54 = vsub.f32 %v5692_v1, %v1417_v26 }
 0xaa7   :  { %v1439_v15 = vmul.f32 1.442695, %v1433_v54 }
 0xaab   :  { %1809 = vmax.xlane.f32.xlu2 %v1808_v41 }
 0xabe   :  { %v1606_v47 = vpop.xlane.xlu2 %1605 }
 0xabf   :  { %v1622_v59 = vsub.f32 %v5697_v8, %v1606_v47 }
 0xac1   :  { %v1628_v42 = vmul.f32 1.442695, %v1622_v59 }
 0xac3   :  { %4739 = vpow2.f32 %v1628_v42 }
 0xac4   :  { %4741 = vpow2.f32 %v1439_v15 }
 0xac6   :  { %v1609_v46 = vpop.xlane.xlu1 %1608  ;;  %v1423_v51 = vpop.xlane.xlu2 %1422 }
 0xac7   :  { %v1623_v50 = vsub.f32 %v5715_v49, %v1609_v46  ;;  %v1435_v29 = vsub.f32 %v5707_v36, %v1423_v51 }
 0xac9   :  { %v5841_v60 = vpop.eup %4739  ;;  %v1630_v19 = vmul.f32 1.442695, %v1623_v50  ;;  %v1443_v10 = vmul.f32 1.442695, %v1435_v29 }
 0xaca   :  { %v1640_v3 = vsel %vm226_vm3, %v5841_v60, 0.0  ;;  %v5845_v38 = vpop.eup %4741 }
 0xacb   :  { %4743 = vpow2.f32 %v1630_v19  ;;  %1641 = vadd.xlane.f32.xlu0 %v1640_v3  ;;  %v1451_v9 = vsel %vm226_vm3, %v5845_v38, 0.0 }
 0xace   :  { %v1420_v37 = vpop.xlane.xlu1 %1419  ;;  %v1612_v8 = vpop.xlane.xlu0 %1611 }
 0xacf   :  { %v1434_v1 = vsub.f32 %v5722_v0, %v1420_v37  ;;  %v1624_v4 = vsub.f32 %v5725_v48, %v1612_v8 }
 0xad1   :  { %v5849_v28 = vpop.eup %4743  ;;  %v1441_v49 = vmul.f32 1.442695, %v1434_v1  ;;  %v1632_v52 = vmul.f32 1.442695, %v1624_v4 }
 0xad2   :  { %v1643_v5 = vsel %vm226_vm3, %v5849_v28, 0.0 }
 0xad3   :  { %4745 = vpow2.f32 %v1441_v49  ;;  %1644 = vadd.xlane.f32.xlu1 %v1643_v5  ;;  %1452 = vadd.xlane.f32.xlu0 %v1451_v9 }
 0xad4   :  { %4747 = vpow2.f32 %v1632_v52 }
 0xad5   :  { %4749 = vpow2.f32 %v1443_v10 }
 0xad6   :  { %v1615_v0 = vpop.xlane.xlu2 %1614  ;;  %v1426_v12 = vpop.xlane.xlu0 %1425 }
 0xad7   :  { %v1625_v48 = vsub.f32 %v5740_v62, %v1615_v0  ;;  %v1436_v36 = vsub.f32 %v5737_v20, %v1426_v12 }
 0xad9   :  { %v5857_v34 = vpop.eup %4745  ;;  %v1634_v23 = vmul.f32 1.442695, %v1625_v48  ;;  %v1445_v31 = vmul.f32 1.442695, %v1436_v36 }
 0xada   :  { %v5859_v24 = vpop.eup %4747  ;;  %v1454_v27 = vsel %vm226_vm3, %v5857_v34, 0.0 }
 0xadb   :  { %1455 = vadd.xlane.f32.xlu1 %v1454_v27  ;;  %v1646_v30 = vsel %vm226_vm3, %v5859_v24, 0.0  ;;  %4751 = vpow2.f32 %v1634_v23  ;;  %v5867_v55 = vpop.eup %4749 }
 0xadc   :  { %1647 = vadd.xlane.f32.xlu2 %v1646_v30  ;;  %4753 = vpow2.f32 %v1445_v31  ;;  %v1457_v20 = vsel %vm226_vm3, %v5867_v55, 0.0 }
 0xade   :  { %v1618_v61 = vpop.xlane.xlu1 %1617 }
 0xadf   :  { %v1626_v62 = vsub.f32 %v5752_v53, %v1618_v61 }
 0xae1   :  { %v1636_v41 = vmul.f32 1.442695, %v1626_v62  ;;  %v5869_v26 = vpop.eup %4751 }
 0xae2   :  { %v1649_v47 = vsel %vm226_vm3, %v5869_v26, 0.0  ;;  %v5877_v15 = vpop.eup %4753 }
 0xae3   :  { %4755 = vpow2.f32 %v1636_v41  ;;  %1650 = vadd.xlane.f32.xlu0 %v1649_v47  ;;  %v1460_v51 = vsel %vm226_vm3, %v5877_v15, 0.0 }
 0xae4   :  { %1458 = vadd.xlane.f32.xlu2 %v1457_v20 }
 0xae6   :  { %v1429_v59 = vpop.xlane.xlu1 %1428  ;;  %v1621_v54 = vpop.xlane.xlu2 %1620 }
 0xae7   :  { %v1437_v42 = vsub.f32 %v5757_v11, %v1429_v59  ;;  %v1627_v53 = vsub.f32 %v5765_v39, %v1621_v54 }
 0xae9   :  { %v5879_v46 = vpop.eup %4755  ;;  %v1447_v50 = vmul.f32 1.442695, %v1437_v42  ;;  %v1638_v19 = vmul.f32 1.442695, %v1627_v53 }
 0xaea   :  { %v1652_v3 = vsel %vm226_vm3, %v5879_v46, 0.0 }
 0xaeb   :  { %4757 = vpow2.f32 %v1447_v50  ;;  %1653 = vadd.xlane.f32.xlu1 %v1652_v3  ;;  %1461 = vadd.xlane.f32.xlu0 %v1460_v51 }
 0xaec   :  { %4759 = vpow2.f32 %v1638_v19 }
 0xaee   :  { %v1984_v37 = vpop.xlane.xlu0 %1983  ;;  %v1432_v11 = vpop.xlane.xlu2 %1431 }
 0xaef   :  { %v2000_v39 = vsub.f32 %v5775_v35, %v1984_v37  ;;  %v1438_v8 = vsub.f32 %v5772_v6, %v1432_v11 }
 0xaf1   :  { %v5887_v1 = vpop.eup %4757  ;;  %v2006_v4 = vmul.f32 1.442695, %v2000_v39  ;;  %v1449_v49 = vmul.f32 1.442695, %v1438_v8 }
 0xaf2   :  { %v5889_v52 = vpop.eup %4759  ;;  %v1463_v29 = vsel %vm226_vm3, %v5887_v1, 0.0 }
 0xaf3   :  { %4761 = vpow2.f32 %v2006_v4  ;;  %1464 = vadd.xlane.f32.xlu1 %v1463_v29  ;;  %v1655_v5 = vsel %vm226_vm3, %v5889_v52, 0.0 }
 0xaf4   :  { %4763 = vpow2.f32 %v1449_v49  ;;  %1656 = vadd.xlane.f32.xlu2 %v1655_v5 }
 0xaf6   :  { %v1798_v9 = vpop.xlane.xlu0 %1797  ;;  %v1795_v35 = vpop.xlane.xlu2 %1794 }
 0xaf7   :  { %v1812_v6 = vsub.f32 %v5785_v2, %v1798_v9  ;;  %v1987_v10 = vpop.xlane.xlu1 %1986  ;;  %v1811_v0 = vsub.f32 %v5782_v57, %v1795_v35 }
 0xaf8   :  { %v2001_v27 = vsub.f32 %v5788_v58, %v1987_v10 }
 0xaf9   :  { %v5897_v12 = vpop.eup %4761  ;;  %v1819_v48 = vmul.f32 1.442695, %v1812_v6  ;;  %v1817_v23 = vmul.f32 1.442695, %v1811_v0 }
 0xafa   :  { %v5899_v36 = vpop.eup %4763  ;;  %v2018_v30 = vsel %vm226_vm3, %v5897_v12, 0.0  ;;  %v2008_v2 = vmul.f32 1.442695, %v2001_v27 }
 0xafb   :  { %4765 = vpow2.f32 %v1819_v48  ;;  %2019 = vadd.xlane.f32.xlu0 %v2018_v30  ;;  %v1466_v31 = vsel %vm226_vm3, %v5899_v36, 0.0 }
 0xafc   :  { %1467 = vadd.xlane.f32.xlu2 %v1466_v31  ;;  %4767 = vpow2.f32 %v1817_v23 }
 0xafd   :  { %4769 = vpow2.f32 %v2008_v2 }
 0xafe   :  { %v1990_v57 = vpop.xlane.xlu2 %1989 }
 0xaff   :  { %v1801_v61 = vpop.xlane.xlu1 %1800  ;;  %v2002_v62 = vsub.f32 %v5800_v63, %v1990_v57 }
 0xb00   :  { %v1813_v20 = vsub.f32 %v5797_v43, %v1801_v61 }
 0xb01   :  { %v5907_v41 = vpop.eup %4765  ;;  %v2010_v58 = vmul.f32 1.442695, %v2002_v62 }
 0xb02   :  { %v1832_v47 = vsel %vm226_vm3, %v5907_v41, 0.0  ;;  %v5912_v59 = vpop.eup %4767  ;;  %v1821_v42 = vmul.f32 1.442695, %v1813_v20 }
 0xb03   :  { %4771 = vpow2.f32 %v2010_v58  ;;  %1833 = vadd.xlane.f32.xlu0 %v1832_v47  ;;  %v1829_v54 = vsel %vm226_vm3, %v5912_v59, 0.0  ;;  %v5918_v19 = vpop.eup %4769 }
 0xb04   :  { %1830 = vadd.xlane.f32.xlu1 %v1829_v54  ;;  %4773 = vpow2.f32 %v1821_v42  ;;  %v2021_v39 = vsel %vm226_vm3, %v5918_v19, 0.0 }
 0xb06   :  { %v1993_v53 = vpop.xlane.xlu0 %1992  ;;  %v1804_v63 = vpop.xlane.xlu2 %1803 }
 0xb07   :  { %v2003_v50 = vsub.f32 %v5810_v22, %v1993_v53  ;;  %v1814_v43 = vsub.f32 %v5807_v25, %v1804_v63 }
 0xb09   :  { %v5920_v3 = vpop.eup %4771  ;;  %v2012_v51 = vmul.f32 1.442695, %v2003_v50  ;;  %v1823_v37 = vmul.f32 1.442695, %v1814_v43 }
 0xb0a   :  { %v2024_v11 = vsel %vm226_vm3, %v5920_v3, 0.0  ;;  %v5926_v25 = vpop.eup %4773 }
 0xb0b   :  { %4775 = vpow2.f32 %v2012_v51  ;;  %2025 = vadd.xlane.f32.xlu2 %v2024_v11  ;;  %v1835_v10 = vsel %vm226_vm3, %v5926_v25, 0.0 }
 0xb0c   :  { %4777 = vpow2.f32 %v1823_v37  ;;  %2022 = vadd.xlane.f32.xlu1 %v2021_v39 }
 0xb0e   :  { %v1807_v22 = vpop.xlane.xlu0 %1806  ;;  %v1996_v8 = vpop.xlane.xlu1 %1995 }
 0xb0f   :  { %v1815_v4 = vsub.f32 %v5817_v45, %v1807_v22  ;;  %v2004_v49 = vsub.f32 %v5820_v17, %v1996_v8 }
 0xb11   :  { %v5930_v29 = vpop.eup %4775  ;;  %v1825_v5 = vmul.f32 1.442695, %v1815_v4  ;;  %v2014_v9 = vmul.f32 1.442695, %v2004_v49 }
 0xb12   :  { %v5932_v35 = vpop.eup %4777  ;;  %v2027_v6 = vsel %vm226_vm3, %v5930_v29, 0.0 }
 0xb13   :  { %4779 = vpow2.f32 %v1825_v5  ;;  %2028 = vadd.xlane.f32.xlu0 %v2027_v6  ;;  %1836 = vadd.xlane.f32.xlu2 %v1835_v10  ;;  %v1838_v45 = vsel %vm226_vm3, %v5932_v35, 0.0 }
 0xb14   :  { %4781 = vpow2.f32 %v2014_v9  ;;  %1839 = vadd.xlane.f32.xlu1 %v1838_v45 }
 0xb16   :  { %v1999_v17 = vpop.xlane.xlu2 %1998 }
 0xb17   :  { %v2005_v0 = vsub.f32 %v5827_v7, %v1999_v17 }
 0xb19   :  { %v5941_v48 = vpop.eup %4779  ;;  %v2016_v23 = vmul.f32 1.442695, %v2005_v0 }
 0xb1a   :  { %v5943_v27 = vpop.eup %4781  ;;  %v1841_v30 = vsel %vm226_vm3, %v5941_v48, 0.0 }
 0xb1b   :  { %4783 = vpow2.f32 %v2016_v23  ;;  %1842 = vadd.xlane.f32.xlu0 %v1841_v30  ;;  %v2030_v31 = vsel %vm226_vm3, %v5943_v27, 0.0 }
 0xb1c   :  { %2031 = vadd.xlane.f32.xlu1 %v2030_v31 }
 0xb1e   :  { %v1810_v2 = vpop.xlane.xlu2 %1809 }
 0xb1f   :  { %v1816_v57 = vsub.f32 %v5832_v44, %v1810_v2 }
 0xb21   :  { %v5950_v61 = vpop.eup %4783  ;;  %v1827_v7 = vmul.f32 1.442695, %v1816_v57 }
 0xb22   :  { %v2033_v62 = vsel %vm226_vm3, %v5950_v61, 0.0 }
 0xb23   :  { %4785 = vpow2.f32 %v1827_v7  ;;  %2034 = vadd.xlane.f32.xlu2 %v2033_v62 }
 0xb29   :  { %v5954_v20 = vpop.eup %4785 }
 0xb2a   :  { %v1844_v58 = vsel %vm226_vm3, %v5954_v20, 0.0 }
 0xb2b   :  { %1845 = vadd.xlane.f32.xlu2 %v1844_v58 }
 0xb35   :  { %2053 = vrot.lane.b32.xlu1 %v5608_v32, %s7229_s5 }
 0xb3e   :  { %v1642_v47 = vpop.xlane.xlu0 %1641 }
 0xb3f   :  { %4787 = vrcp.f32 %v1642_v47 }
 0xb43   :  { %2055 = vrot.lane.b32.xlu2 %v5614_v14, %s7229_s5 }
 0xb45   :  { %v4788_v42 = vpop.eup %4787 }
 0xb46   :  { %v1645_v44 = vpop.xlane.xlu1 %1644  ;;  %v1453_v54 = vpop.xlane.xlu0 %1452  ;;  %v1664_v63 = vmul.f32 %v4788_v42, %v5841_v60 }
 0xb47   :  { %4789 = vrcp.f32 %v1645_v44 }
 0xb48   :  { %4791 = vrcp.f32 %v1453_v54 }
 0xb4d   :  { %v4790_v53 = vpop.eup %4789 }
 0xb4e   :  { %v1665_v50 = vmul.f32 %v4790_v53, %v5849_v28  ;;  %v1456_v43 = vpop.xlane.xlu1 %1455  ;;  %v4792_v32 = vpop.eup %4791 }
 0xb4f   :  { %4793 = vrcp.f32 %v1456_v43  ;;  %v1648_v37 = vpop.xlane.xlu2 %1647  ;;  %v1475_v14 = vmul.f32 %v4792_v32, %v5845_v38 }
 0xb50   :  { %v1670_v51 = vpack.c.bf16 %v1665_v50, %v1664_v63  ;;  %4795 = vrcp.f32 %v1648_v37 }
 0xb52   :  { %4017 = vmatmul.msk.bf16.vlgmr.msrb.gmra.mxu1 %vm226_vm3, %v1670_v51 }
 0xb55   :  { %v4794_v11 = vpop.eup %4793 }
 0xb56   :  { %v1476_v39 = vmul.f32 %v4794_v11, %v5857_v34  ;;  %v1651_v22 = vpop.xlane.xlu0 %1650  ;;  %v4796_v28 = vpop.eup %4795 }
 0xb57   :  { %4797 = vrcp.f32 %v1651_v22  ;;  %v1459_v60 = vpop.xlane.xlu2 %1458  ;;  %v1666_v49 = vmul.f32 %v4796_v28, %v5859_v24 }
 0xb58   :  { %v1481_v8 = vpack.c.bf16 %v1476_v39, %v1475_v14  ;;  %4799 = vrcp.f32 %v1459_v60 }
 0xb5a   :  { %4011 = vmatmul.msk.bf16.vlgmr.msrb.gmra.mxu2 %vm226_vm3, %v1481_v8 }
 0xb5d   :  { %v4798_v4 = vpop.eup %4797 }
 0xb5e   :  { %v1667_v5 = vmul.f32 %v4798_v4, %v5869_v26  ;;  %v1462_v9 = vpop.xlane.xlu0 %1461  ;;  %v1654_v6 = vpop.xlane.xlu1 %1653 }
 0xb5f   :  { %4801 = vrcp.f32 %v1462_v9  ;;  %v4800_v34 = vpop.eup %4799 }
 0xb60   :  { %v1671_v38 = vpack.c.bf16 %v1667_v5, %v1666_v49  ;;  %4803 = vrcp.f32 %v1654_v6  ;;  %v1477_v17 = vmul.f32 %v4800_v34, %v5867_v55 }
 0xb62   :  { %4018 = vmatmul.msk.bf16.gmra.mxu1 %vm226_vm3, %v1671_v38 }
 0xb65   :  { %v4802_v10 = vpop.eup %4801 }
 0xb66   :  { %v1478_v0 = vmul.f32 %v4802_v10, %v5877_v15  ;;  %v1465_v30 = vpop.xlane.xlu1 %1464  ;;  %v4804_v24 = vpop.eup %4803 }
 0xb67   :  { %v1657_v45 = vpop.xlane.xlu2 %1656  ;;  %v1668_v2 = vmul.f32 %v4804_v24, %v5879_v46 }
 0xb68   :  { %4805 = vrcp.f32 %v1657_v45  ;;  %v1482_v23 = vpack.c.bf16 %v1478_v0, %v1477_v17 }
 0xb69   :  { %4807 = vrcp.f32 %v1465_v30 }
 0xb6a   :  { %4012 = vmatmul.msk.bf16.gmra.mxu2 %vm226_vm3, %v1482_v23 }
 0xb6e   :  { %v4806_v26 = vpop.eup %4805  ;;  %v2020_v31 = vpop.xlane.xlu0 %2019 }
 0xb6f   :  { %v1669_v57 = vmul.f32 %v4806_v26, %v5889_v52  ;;  %v1468_v7 = vpop.xlane.xlu2 %1467  ;;  %v4808_v55 = vpop.eup %4807 }
 0xb70   :  { %4809 = vrcp.f32 %v1468_v7  ;;  %v1479_v58 = vmul.f32 %v4808_v55, %v5887_v1 }
 0xb71   :  { %v1672_v62 = vpack.c.bf16 %v1669_v57, %v1668_v2 }
 0xb73   :  { %4019 = vmatmul.msk.bf16.gmra.mxu1 %vm226_vm3, %v1672_v62 }
 0xb76   :  { %v4810_v15 = vpop.eup %4809  ;;  %v1834_v44 = vpop.xlane.xlu0 %1833 }
 0xb77   :  { %v1480_v47 = vmul.f32 %v4810_v15, %v5899_v36  ;;  %v1831_v54 = vpop.xlane.xlu1 %1830  ;;  %4811 = vrcp.f32 %v1834_v44 }
 0xb78   :  { %4813 = vrcp.f32 %v1831_v54 }
 0xb79   :  { %v1483_v42 = vpack.c.bf16 %v1480_v47, %v1479_v58 }
 0xb7b   :  { %4013 = vmatmul.msk.bf16.gmra.mxu2 %vm226_vm3, %v1483_v42 }
 0xb7d   :  { %v4812_v53 = vpop.eup %4811 }
 0xb7e   :  { %v2026_v46 = vpop.xlane.xlu2 %2025  ;;  %v4814_v63 = vpop.eup %4813  ;;  %v1854_v50 = vmul.f32 %v4812_v53, %v5907_v41 }
 0xb7f   :  { %v2023_v52 = vpop.xlane.xlu1 %2022  ;;  %v1853_v43 = vmul.f32 %v4814_v63, %v5912_v59 }
 0xb81   :  { %v1859_v37 = vpack.c.bf16 %v1854_v50, %v1853_v43 }
 0xb86   :  { %v1837_v51 = vpop.xlane.xlu2 %1836  ;;  %v2029_v36 = vpop.xlane.xlu0 %2028 }
 0xb87   :  { %v1840_v1 = vpop.xlane.xlu1 %1839  ;;  %4815 = vrcp.f32 %v1837_v51 }
 0xb88   :  { %4817 = vrcp.f32 %v1840_v1 }
 0xb8b   :  { %4023 = vmatmul.msk.bf16.vlgmr.msra.gmra.mxu2 %vm226_vm3, %v1859_v37 }
 0xb8d   :  { %v4816_v32 = vpop.eup %4815 }
 0xb8e   :  { %v4818_v11 = vpop.eup %4817  ;;  %v1855_v39 = vmul.f32 %v4816_v32, %v5926_v25  ;;  %v1843_v60 = vpop.xlane.xlu0 %1842 }
 0xb8f   :  { %v1856_v14 = vmul.f32 %v4818_v11, %v5932_v35  ;;  %4819 = vrcp.f32 %v1843_v60  ;;  %v2032_v59 = vpop.xlane.xlu1 %2031  ;;  %v4291_v60 = vld [vmem:[%s7207_s6 + $0x18] sm:$0xff] }
 0xb90   :  { %2218 = vmatpush.bf16.msrb.mxu3 %v4291_v60 }
 0xb91   :  { %v1860_v8 = vpack.c.bf16 %v1856_v14, %v1855_v39 }
 0xb95   :  { %v4820_v28 = vpop.eup %4819 }
 0xb96   :  { %v2035_v22 = vpop.xlane.xlu2 %2034  ;;  %v1857_v49 = vmul.f32 %v4820_v28, %v5941_v48 }
 0xb9b   :  { %4024 = vmatmul.msk.bf16.gmra.mxu2 %vm226_vm3, %v1860_v8 }
 0xb9e   :  { %v1846_v41 = vpop.xlane.xlu2 %1845 }
 0xb9f   :  { %4821 = vrcp.f32 %v1846_v41  ;;  %v4290_v41 = vld [vmem:[%s7207_s6 + $0x10] sm:$0xff] }
 0xba0   :  { %4823 = vrcp.f32 %v2023_v52  ;;  %2219 = vmatpush.bf16.msrb.mxu3 %v4290_v41 }
 0xba1   :  { %4825 = vrcp.f32 %v2020_v31 }
 0xba2   :  { %4827 = vrcp.f32 %v2029_v36 }
 0xba3   :  { %4829 = vrcp.f32 %v2026_v46 }
 0xba4   :  { %4831 = vrcp.f32 %v2035_v22 }
 0xba5   :  { %v4822_v4 = vpop.eup %4821  ;;  %4833 = vrcp.f32 %v2032_v59 }
 0xba6   :  { %v1858_v5 = vmul.f32 %v4822_v4, %v5954_v20  ;;  %v2056_v35 = vpop.permute.xlu2 %2055  ;;  %v4824_v9 = vpop.eup %4823 }
 0xba7   :  { %2074 = vmatpush.bf16.msra.mxu1 %v2056_v35  ;;  %v2054_v6 = vpop.permute.xlu1 %2053  ;;  %v4826_v38 = vpop.eup %4825  ;;  %v2043_v34 = vmul.f32 %v4824_v9, %v5918_v19 }
 0xba8   :  { %v1861_v25 = vpack.c.bf16 %v1858_v5, %v1857_v49  ;;  %v2042_v10 = vmul.f32 %v4826_v38, %v5897_v12  ;;  %v4828_v48 = vpop.eup %4827 }
 0xba9   :  { %v4830_v20 = vpop.eup %4829  ;;  %v2045_v17 = vmul.f32 %v4828_v48, %v5930_v29 }
 0xbaa   :  { %v2048_v45 = vpack.c.bf16 %v2043_v34, %v2042_v10  ;;  %v2044_v0 = vmul.f32 %v4830_v20, %v5920_v3  ;;  %v4832_v19 = vpop.eup %4831 }
 0xbab   :  { %4025 = vmatmul.msk.bf16.gmra.mxu2 %vm226_vm3, %v1861_v25  ;;  %2075 = vmatpush.bf16.msra.mxu1 %v2054_v6  ;;  %v4834_v12 = vpop.eup %4833 }
 0xbac   :  { %v2049_v23 = vpack.c.bf16 %v2045_v17, %v2044_v0  ;;  %v2046_v30 = vmul.f32 %v4834_v12, %v5943_v27 }
 0xbaf   :  { %2076 = vmatpush.bf16.msra.mxu1 %v5836_v33  ;;  %v2047_v33 = vmul.f32 %v4832_v19, %v5950_v61 }
 0xbb1   :  { %v2050_v26 = vpack.c.bf16 %v2047_v33, %v2046_v30 }
 0xbb2   :  { %4029 = vmatmul.msk.bf16.vlgmr.msra.gmra.mxu1 %vm226_vm3, %v2048_v45 }
 0xbc2   :  { %4030 = vmatmul.msk.bf16.gmra.mxu1 %vm226_vm3, %v2049_v23 }
 0xbcf   :  { %v1700_v24 = vpop.f32.mrf.mxu1 }
 0xbd2   :  { %4031 = vmatmul.msk.bf16.gmra.mxu1 %vm226_vm3, %v2050_v26 }
 0xbd7   :  { %v1702_v31 = vpop.f32.mrf.mxu1 }
 0xbd8   :  { %v4390_v2 = vpack.i.bf16 %v1702_v31, %v1700_v24 }
 0xbda   :  { %4391 = vrot.lane.b32.xlu0 %v4390_v2, %s7230_s1 }
 0xbdd   :  { %v1511_v7 = vpop.f32.mrf.mxu2 }
 0xbdf   :  { %v1705_v3 = vpop.f32.mrf.mxu1 }
 0xbe5   :  { %v1513_v15 = vpop.f32.mrf.mxu2 }
 0xbe7   :  { %v1707_v29 = vpop.f32.mrf.mxu1 }
 0xbe8   :  { %v4395_v57 = vpack.i.bf16 %v1707_v29, %v1705_v3 }
 0xbea   :  { %4396 = vrot.lane.b32.xlu1 %v4395_v57, %s7230_s1 }
 0xbed   :  { %v1516_v27 = vpop.f32.mrf.mxu2 }
 0xbf0   :  { %v1710_v62 = vpop.f32.mrf.mxu1 }
 0xbf5   :  { %v1518_v58 = vpop.f32.mrf.mxu2 }
 0xbf8   :  { %v1712_v55 = vpop.f32.mrf.mxu1 }
 0xbf9   :  { %v4400_v61 = vpack.i.bf16 %v1712_v55, %v1710_v62 }
 0xbfb   :  { %4401 = vrot.lane.b32.xlu0 %v4400_v61, %s7230_s1 }
 0xbfe   :  { %v6002_v47 = vpop.f32.mrf.mxu2 }
 0xc06   :  { %v6004_v44 = vpop.f32.mrf.mxu2 }
 0xc0e   :  { %v1889_v54 = vpop.f32.mrf.mxu2 }
 0xc16   :  { %v1891_v46 = vpop.f32.mrf.mxu2 }
 0xc17   :  { %v4410_v43 = vpack.i.bf16 %v1891_v46, %v1889_v54 }
 0xc1e   :  { %v1894_v63 = vpop.f32.mrf.mxu2 }
 0xc26   :  { %v1896_v1 = vpop.f32.mrf.mxu2 }
 0xc27   :  { %v4420_v32 = vpack.i.bf16 %v1896_v1, %v1894_v63 }
 0xc2e   :  { %v1899_v11 = vpop.f32.mrf.mxu2 }
 0xc2f   :  { %v2078_v42 = vpop.f32.mrf.mxu1 }
 0xc36   :  { %v1901_v22 = vpop.f32.mrf.mxu2 }
 0xc37   :  { %v2080_v52 = vpop.f32.mrf.mxu1  ;;  %v4430_v8 = vpack.i.bf16 %v1901_v22, %v1899_v11  ;;  %v6050_v11 = vld [vmem:[%s7210_s7 + $0x8] sm:$0x3f] }
 0xc38   :  { %v4405_v53 = vpack.i.bf16 %v2080_v52, %v2078_v42 }
 0xc3a   :  { %4406 = vrot.lane.b32.xlu2 %v4405_v53, %s7231_s15 }
 0xc3f   :  { %v2083_v50 = vpop.f32.mrf.mxu1 }
 0xc42   :  { %4411 = vrot.lane.b32.xlu2 %v4410_v43, %s7232_s16 }
 0xc47   :  { %v2085_v51 = vpop.f32.mrf.mxu1 }
 0xc48   :  { %v4415_v37 = vpack.i.bf16 %v2085_v51, %v2083_v50 }
 0xc4a   :  { %4416 = vrot.lane.b32.xlu1 %v4415_v37, %s7231_s15 }
 0xc4c   :  { %v4392_v28 = vpop.permute.xlu0 %4391 }
 0xc4d   :  { %v4394_v4 = vunpack.i.h.bf16 %v4392_v28  ;;  %v4393_v49 = vunpack.i.l.bf16 %v4392_v28  ;;  %v2258_v28 = vperm.slane %v6050_v11, 2 }
 0xc4f   :  { %v2088_v36 = vpop.f32.mrf.mxu1  ;;  %v2166_v9 = vsel %vm177_vm2, %v1513_v15, %v4394_v4  ;;  %v2165_v6 = vsel %vm177_vm2, %v1511_v7, %v4393_v49 }
 0xc52   :  { %4421 = vrot.lane.b32.xlu1 %v4420_v32, %s7232_s16 }
 0xc57   :  { %v2090_v14 = vpop.f32.mrf.mxu1 }
 0xc58   :  { %v4425_v39 = vpack.i.bf16 %v2090_v14, %v2088_v36 }
 0xc5a   :  { %4426 = vrot.lane.b32.xlu0 %v4425_v39, %s7231_s15  ;;  %v2244_v39 = vperm.slane %v6050_v11, 0 }
 0xc5c   :  { %v4397_v0 = vpop.permute.xlu1 %4396 }
 0xc5d   :  { %v4399_v19 = vunpack.i.h.bf16 %v4397_v0  ;;  %v4398_v12 = vunpack.i.l.bf16 %v4397_v0 }
 0xc5f   :  { %v2167_v31 = vsel %vm177_vm2, %v1516_v27, %v4398_v12  ;;  %v2168_v2 = vsel %vm177_vm2, %v1518_v58, %v4399_v19 }
 0xc62   :  { %4431 = vrot.lane.b32.xlu0 %v4430_v8, %s7232_s16  ;;  %v2251_v8 = vperm.slane %v6050_v11, 1 }
 0xc6d   :  { %v4402_v33 = vpop.permute.xlu0 %4401 }
 0xc6e   :  { %v4404_v54 = vunpack.i.h.bf16 %v4402_v33  ;;  %v4403_v42 = vunpack.i.l.bf16 %v4402_v33 }
 0xc70   :  { %v2169_v58 = vsel %vm177_vm2, %v6002_v47, %v4403_v42  ;;  %v2170_v53 = vsel %vm177_vm2, %v6004_v44, %v4404_v54  ;;  %v4293_v47 = vld [vmem:[%s7209_s8 + $0x18] sm:$0xff]  ;;  %v4292_v44 = vld [vmem:[%s7209_s8 + $0x10] sm:$0xff] }
 0xc71   :  { %2305 = vmatpush.bf16.msrb.mxu2 %v4293_v47 }
 0xc75   :  { %2306 = vmatpush.bf16.msrb.mxu2 %v4292_v44 }
 0xc94   :  { %v4407_v59 = vpop.permute.xlu2 %4406 }
 0xc95   :  { %v4409_v38 = vunpack.i.h.bf16 %v4407_v59  ;;  %v4408_v34 = vunpack.i.l.bf16 %v4407_v59 }
 0xc9c   :  { %v4412_v5 = vpop.permute.xlu2 %4411 }
 0xc9d   :  { %v4414_v35 = vunpack.i.h.bf16 %v4412_v5  ;;  %v4413_v25 = vunpack.i.l.bf16 %v4412_v5 }
 0xc9f   :  { %v2172_v10 = vsel %vm74_vm0, %v2166_v9, %v4414_v35  ;;  %v2171_v45 = vsel %vm74_vm0, %v2165_v6, %v4413_v25 }
 0xca0   :  { %v2177_v48 = vsel %vm986_vm4, %v2171_v45, %v4408_v34  ;;  %v2178_v20 = vsel %vm986_vm4, %v2172_v10, %v4409_v38 }
 0xca1   :  { %v2183_v17 = vpack.c.bf16 %v2178_v20, %v2177_v48 }
 0xca3   :  { %4044 = vmatmul.msk.bf16.vlgmr.msrb.gmra.mxu3 %vm131_vm1, %v2183_v17 }
 0xcbc   :  { %v4417_v23 = vpop.permute.xlu1 %4416 }
 0xcbd   :  { %v4419_v3 = vunpack.i.h.bf16 %v4417_v23  ;;  %v4418_v29 = vunpack.i.l.bf16 %v4417_v23 }
 0xcc4   :  { %v4422_v30 = vpop.permute.xlu1 %4421 }
 0xcc5   :  { %v4424_v24 = vunpack.i.h.bf16 %v4422_v30  ;;  %v4423_v26 = vunpack.i.l.bf16 %v4422_v30 }
 0xcc7   :  { %v2174_v57 = vsel %vm74_vm0, %v2168_v2, %v4424_v24  ;;  %v2173_v7 = vsel %vm74_vm0, %v2167_v31, %v4423_v26  ;;  %v4630_v2 = vld [vmem:[%s7208_s9 + $0x1] ss:$0 sm:$0xff] }
 0xcc8   :  { %v2179_v62 = vsel %vm986_vm4, %v2173_v7, %v4418_v29  ;;  %v2180_v55 = vsel %vm986_vm4, %v2174_v57, %v4419_v3  ;;  %v4295_v3 = vld [vmem:[%s7211_s10 + $0x28] sm:$0xff]  ;;  %v4294_v7 = vld [vmem:[%s7211_s10 + $0x20] sm:$0xff] }
 0xcc9   :  { %v2184_v15 = vpack.c.bf16 %v2180_v55, %v2179_v62 }
 0xccb   :  { %4045 = vmatmul.msk.bf16.gmra.mxu3 %vm131_vm1, %v2184_v15 }
 0xccc   :  { %v4427_v61 = vpop.permute.xlu0 %4426 }
 0xccd   :  { %v4429_v63 = vunpack.i.h.bf16 %v4427_v61  ;;  %v4428_v50 = vunpack.i.l.bf16 %v4427_v61 }
 0xcd4   :  { %v4432_v46 = vpop.permute.xlu0 %4431 }
 0xcd5   :  { %v4434_v27 = vunpack.i.h.bf16 %v4432_v46  ;;  %v4433_v52 = vunpack.i.l.bf16 %v4432_v46 }
 0xcd7   :  { %v2176_v43 = vsel %vm74_vm0, %v2170_v53, %v4434_v27  ;;  %v2175_v51 = vsel %vm74_vm0, %v2169_v58, %v4433_v52 }
 0xcd8   :  { %v2181_v37 = vsel %vm986_vm4, %v2175_v51, %v4428_v50  ;;  %v2182_v1 = vsel %vm986_vm4, %v2176_v43, %v4429_v63 }
 0xcd9   :  { %v2185_v36 = vpack.c.bf16 %v2182_v1, %v2181_v37 }
 0xcdb   :  { %4046 = vmatmul.msk.bf16.gmra.mxu3 %vm131_vm1, %v2185_v36 }
 0xd26   :  { %v2221_v32 = vpop.f32.mrf.mxu3 }
 0xd27   :  { %v2238_v14 = vadd.f32 %v2221_v32, %v5577_v56 }
 0xd29   :  { %v2245_v22 = vadd.f32 %v2244_v39, %v2238_v14 }
 0xd2b   :  { %v2252_v59 = vmul.f32 %v2251_v8, %v2245_v22 }
 0xd2d   :  { %v6057_v5 = vadd.f32 %v2258_v28, %v2252_v59 }
 0xd2e   :  { %v2223_v60 = vpop.f32.mrf.mxu3 }
 0xd2f   :  { %v2239_v41 = vadd.f32 %v2223_v60, %v5579_v13 }
 0xd31   :  { %v2246_v4 = vadd.f32 %v2244_v39, %v2239_v41 }
 0xd33   :  { %v2253_v49 = vmul.f32 %v2251_v8, %v2246_v4 }
 0xd35   :  { %v6059_v35 = vadd.f32 %v2258_v28, %v2253_v49 }
 0xd37   :  { %v2265_v56 = vpack.c.bf16 %v6059_v35, %v6057_v5 }
 0xd39   :  { %4061 = vmatmul.msk.bf16.vlgmr.msrb.gmra.mxu2 %vm131_vm1, %v2265_v56 }
 0xd4e   :  { %v2226_v25 = vpop.f32.mrf.mxu3 }
 0xd4f   :  { %v2240_v9 = vadd.f32 %v2226_v25, %v5586_v16 }
 0xd51   :  { %v2247_v6 = vadd.f32 %v2244_v39, %v2240_v9 }
 0xd53   :  { %v2254_v34 = vmul.f32 %v2251_v8, %v2247_v6 }
 0xd55   :  { %v6066_v48 = vadd.f32 %v2258_v28, %v2254_v34 }
 0xd56   :  { %v2228_v38 = vpop.f32.mrf.mxu3 }
 0xd57   :  { %v2241_v13 = vadd.f32 %v2228_v38, %v5588_v21 }
 0xd59   :  { %v2248_v10 = vadd.f32 %v2244_v39, %v2241_v13 }
 0xd5b   :  { %v2255_v45 = vmul.f32 %v2251_v8, %v2248_v10 }
 0xd5d   :  { %v6068_v20 = vadd.f32 %v2258_v28, %v2255_v45 }
 0xd5e   :  { %v2231_v17 = vpop.f32.mrf.mxu3 }
 0xd5f   :  { %v2266_v0 = vpack.c.bf16 %v6068_v20, %v6066_v48  ;;  %v2242_v23 = vadd.f32 %v2231_v17, %v5594_v18  ;;  %v4297_v18 = vld [vmem:[%s7211_s10 + $0x38] sm:$0xff] }
 0xd60   :  { %2426 = vmatpush.bf16.msra.mxu0 %v4297_v18 }
 0xd61   :  { %4062 = vmatmul.msk.bf16.gmra.mxu2 %vm131_vm1, %v2266_v0  ;;  %v2249_v16 = vadd.f32 %v2244_v39, %v2242_v23 }
 0xd63   :  { %v2256_v21 = vmul.f32 %v2251_v8, %v2249_v16 }
 0xd65   :  { %v6075_v24 = vadd.f32 %v2258_v28, %v2256_v21 }
 0xd66   :  { %v2233_v19 = vpop.f32.mrf.mxu3 }
 0xd67   :  { %v2243_v12 = vadd.f32 %v2233_v19, %v5597_v40  ;;  %v4296_v40 = vld [vmem:[%s7211_s10 + $0x30] sm:$0xff] }
 0xd68   :  { %2427 = vmatpush.bf16.msra.mxu0 %v4296_v40 }
 0xd69   :  { %v2250_v33 = vadd.f32 %v2244_v39, %v2243_v12 }
 0xd6b   :  { %v2257_v30 = vmul.f32 %v2251_v8, %v2250_v33 }
 0xd6c   :  { %2428 = vmatpush.bf16.msra.mxu0 %v4295_v3 }
 0xd6d   :  { %v6077_v26 = vadd.f32 %v2258_v28, %v2257_v30 }
 0xd6f   :  { %v2267_v31 = vpack.c.bf16 %v6077_v26, %v6075_v24 }
 0xd70   :  { %2429 = vmatpush.bf16.msra.mxu0 %v4294_v7 }
 0xd71   :  { %4063 = vmatmul.msk.bf16.gmra.mxu2 %vm131_vm1, %v2267_v31 }
 0xdbc   :  { %v2308_v29 = vpop.f32.mrf.mxu2 }
 0xdbd   :  { %v2309_v57 = vadd.f32 %v4630_v2, %v2308_v29 }
 0xdbf   :  { %v2323_v62 = vmul.f32 %v2309_v57, %v2309_v57 }
 0xdc1   :  { %v2329_v55 = vmul.f32 %v2323_v62, %v2309_v57 }
 0xdc3   :  { %v2335_v15 = vmul.f32 0.044715, %v2329_v55 }
 0xdc4   :  { %v2310_v61 = vpop.f32.mrf.mxu2 }
 0xdc5   :  { %v2341_v54 = vadd.f32 %v2335_v15, %v2309_v57  ;;  %v2311_v42 = vadd.f32 %v4630_v2, %v2310_v61 }
 0xdc7   :  { %v2347_v46 = vmul.f32 0.7978846, %v2341_v54  ;;  %v2324_v27 = vmul.f32 %v2311_v42, %v2311_v42 }
 0xdc9   :  { %v2330_v52 = vmul.f32 %v2324_v27, %v2311_v42  ;;  %4835 = vtanh.f32 %v2347_v46 }
 0xdcb   :  { %v2336_v58 = vmul.f32 0.044715, %v2330_v52 }
 0xdcd   :  { %v2342_v53 = vadd.f32 %v2336_v58, %v2311_v42 }
 0xdcf   :  { %v2348_v63 = vmul.f32 0.7978846, %v2342_v53  ;;  %v4836_v50 = vpop.eup %4835  ;;  %v4867_v53 = vmov 2  }
 0xdd0   :  { %v2359_v43 = vadd.f32 1.0, %v4836_v50  ;;  %4437 = vset.pattern.permute.xlu0 %v4867_v53  ;;  %v4869_v50 = vmov 0  }
 0xdd1   :  { %4837 = vtanh.f32 %v2348_v63  ;;  %v7225_v63 = vmov 1   ;;  %4435 = vset.pattern.permute.xlu2 %v4869_v50 }
 0xdd2   :  { %v2365_v37 = vmul.f32 0.5, %v2359_v43  ;;  %4436 = vset.pattern.permute.xlu1 %v7225_v63  ;;  %v6104_v43 = vperm.slane %v6050_v11, 3 }
 0xdd4   :  { %v2371_v47 = vmul.f32 %v2365_v37, %v2309_v57 }
 0xdd7   :  { %v4838_v51 = vpop.eup %4837 }
 0xdd8   :  { %v2360_v1 = vadd.f32 1.0, %v4838_v51 }
 0xdda   :  { %v2366_v36 = vmul.f32 0.5, %v2360_v1  ;;  %v6108_v1 = vperm.slane %v6050_v11, 4 }
 0xddc   :  { %v2372_v44 = vmul.f32 %v2366_v36, %v2311_v42  ;;  %v6111_v36 = vperm.slane %v6050_v11, 5 }
 0xdde   :  { %v2377_v32 = vpack.c.bf16 %v2372_v44, %v2371_v47 }
 0xde0   :  { %4088 = vmatmul.msk.bf16.vlgmr.msra.gmra.mxu0 %vm1218_vm5, %v2377_v32 }
 0xde4   :  { %v2313_v14 = vpop.f32.mrf.mxu2 }
 0xde5   :  { %v2314_v39 = vadd.f32 %v4630_v2, %v2313_v14 }
 0xde7   :  { %v2325_v22 = vmul.f32 %v2314_v39, %v2314_v39 }
 0xde9   :  { %v2331_v8 = vmul.f32 %v2325_v22, %v2314_v39 }
 0xdeb   :  { %v2337_v60 = vmul.f32 0.044715, %v2331_v8  ;;  %v4870_v8 = vmov 3  }
 0xdec   :  { %v2315_v41 = vpop.f32.mrf.mxu2 }
 0xded   :  { %v2343_v59 = vadd.f32 %v2337_v60, %v2314_v39  ;;  %v2316_v28 = vadd.f32 %v4630_v2, %v2315_v41  ;;  %v4871_v60 = vmov 4   ;;  %v4873_v41 = vmov 6  }
 0xdef   :  { %v2349_v4 = vmul.f32 0.7978846, %v2343_v59  ;;  %v2326_v49 = vmul.f32 %v2316_v28, %v2316_v28  ;;  %v4874_v59 = vmov 7  }
 0xdf1   :  { %v2332_v56 = vmul.f32 %v2326_v49, %v2316_v28  ;;  %4839 = vtanh.f32 %v2349_v4  ;;  %v4876_v4 = vmov 9   ;;  %v4877_v49 = vmov 10  }
 0xdf3   :  { %v2338_v25 = vmul.f32 0.044715, %v2332_v56  ;;  %v4878_v56 = vmov 11  }
 0xdf4   :  { %v2318_v9 = vpop.f32.mrf.mxu2 }
 0xdf5   :  { %v2344_v6 = vadd.f32 %v2338_v25, %v2316_v28  ;;  %v2319_v38 = vadd.f32 %v4630_v2, %v2318_v9 }
 0xdf7   :  { %v2350_v13 = vmul.f32 0.7978846, %v2344_v6  ;;  %v2327_v34 = vmul.f32 %v2319_v38, %v2319_v38  ;;  %v4840_v10 = vpop.eup %4839 }
 0xdf8   :  { %v2361_v0 = vadd.f32 1.0, %v4840_v10  ;;  %v4881_v10 = vmov 14  }
 0xdf9   :  { %4841 = vtanh.f32 %v2350_v13  ;;  %v2333_v45 = vmul.f32 %v2327_v34, %v2319_v38  ;;  %v4879_v13 = vmov 12   ;;  %v4880_v34 = vmov 13  }
 0xdfa   :  { %v2367_v30 = vmul.f32 0.5, %v2361_v0 }
 0xdfb   :  { %v2339_v17 = vmul.f32 0.044715, %v2333_v45 }
 0xdfc   :  { %v2320_v23 = vpop.f32.mrf.mxu2  ;;  %v2373_v29 = vmul.f32 %v2367_v30, %v2314_v39 }
 0xdfd   :  { %v2345_v16 = vadd.f32 %v2339_v17, %v2319_v38  ;;  %v2321_v19 = vadd.f32 %v4630_v2, %v2320_v23 }
 0xdff   :  { %v4842_v12 = vpop.eup %4841  ;;  %v2351_v21 = vmul.f32 0.7978846, %v2345_v16  ;;  %v2328_v33 = vmul.f32 %v2321_v19, %v2321_v19 }
 0xe00   :  { %v2362_v31 = vadd.f32 1.0, %v4842_v12  ;;  %v4883_v12 = vmov 16  }
 0xe01   :  { %v2334_v18 = vmul.f32 %v2328_v33, %v2321_v19  ;;  %4843 = vtanh.f32 %v2351_v21  ;;  %v4884_v21 = vmov 17  }
 0xe02   :  { %v2368_v40 = vmul.f32 0.5, %v2362_v31 }
 0xe03   :  { %v2340_v3 = vmul.f32 0.044715, %v2334_v18 }
 0xe04   :  { %v2374_v57 = vmul.f32 %v2368_v40, %v2316_v28  ;;  %v4875_v28 = vmov 8   ;;  %v4885_v40 = vmov 18  }
 0xe05   :  { %v2346_v7 = vadd.f32 %v2340_v3, %v2321_v19 }
 0xe06   :  { %v2378_v62 = vpack.c.bf16 %v2374_v57, %v2373_v29  ;;  %v4886_v29 = vmov 19   ;;  %v4887_v57 = vmov 20  }
 0xe07   :  { %v2352_v55 = vmul.f32 0.7978846, %v2346_v7  ;;  %v4844_v15 = vpop.eup %4843 }
 0xe08   :  { %4089 = vmatmul.msk.bf16.gmra.mxu0 %vm1218_vm5, %v2378_v62  ;;  %v2363_v61 = vadd.f32 1.0, %v4844_v15  ;;  %v4888_v15 = vmov 21  }
 0xe09   :  { %4845 = vtanh.f32 %v2352_v55 }
 0xe0a   :  { %v2369_v54 = vmul.f32 0.5, %v2363_v61  ;;  %v4889_v61 = vmov 22  }
 0xe0c   :  { %v2375_v27 = vmul.f32 %v2369_v54, %v2319_v38  ;;  %v4892_v54 = vmov 25  }
 0xe0f   :  { %v4846_v2 = vpop.eup %4845 }
 0xe10   :  { %v2364_v42 = vadd.f32 1.0, %v4846_v2  ;;  %v4891_v2 = vmov 24  }
 0xe12   :  { %v2370_v46 = vmul.f32 0.5, %v2364_v42  ;;  %v4893_v42 = vmov 26  }
 0xe14   :  { %v2376_v52 = vmul.f32 %v2370_v46, %v2321_v19  ;;  %v4882_v19 = vmov 15   ;;  %v4894_v46 = vmov 27  }
 0xe16   :  { %v2379_v58 = vpack.c.bf16 %v2376_v52, %v2375_v27  ;;  %v7227_v27 = vmov 28   ;;  %v4896_v52 = vmov 31  }
 0xe18   :  { %4090 = vmatmul.msk.bf16.gmra.mxu0 %vm1218_vm5, %v2379_v58 }
 0xe5d   :  { %v2431_v51 = vpop.f32.mrf.mxu0 }
 0xe5e   :  { %v2446_v37 = vadd.f32 %v2431_v51, %v6057_v5 }
 0xe60   :  { %v2453_v47 = vadd.f32 %v6104_v43, %v2446_v37  ;;  %v7223_v37 = vmov 30  }
 0xe62   :  { %v2460_v44 = vmul.f32 %v6108_v1, %v2453_v47 }
 0xe64   :  { %v6116_v32 = vadd.f32 %v6111_v36, %v2460_v44 }
 0xe65   :  { %v2433_v14 = vpop.f32.mrf.mxu0 }
 0xe66   :  { %v2447_v39 = vadd.f32 %v2433_v14, %v6059_v35  ;;  %2481 = vperm.xlu2 %4435, %v6116_v32   ;;  %2523 = vperm.xlu1 %4436, %v6116_v32   ;;  %v4872_v35 = vmov 5  }
 0xe67   :  { %2560 = vperm.xlu0 %4437, %v6116_v32  }
 0xe68   :  { %v2454_v5 = vadd.f32 %v6104_v43, %v2447_v39  ;;  %v4091_v39 = vld [vmem:[%s7212_s11 + $0x30] sm:$0xff] }
 0xe6a   :  { %v2461_v11 = vmul.f32 %v6108_v1, %v2454_v5  ;;  %v4097_v5 = vld [vmem:[%s7212_s11 + $0x60] sm:$0xff] }
 0xe6c   :  { %v6125_v22 = vadd.f32 %v6111_v36, %v2461_v11  ;;  %v2473_v11 = vld [vmem:[%s7212_s11] sm:$0xff] }
 0xe6e   :  { %4438 = vset.pattern.permute.xlu2 %v4870_v8  ;;  %4439 = vset.pattern.permute.xlu1 %v4871_v60 }
 0xe6f   :  { %4440 = vset.pattern.permute.xlu0 %v4872_v35  ;;  %2597 = vperm.xlu2 %4438, %v6116_v32  }
 0xe70   :  { %2634 = vperm.xlu1 %4439, %v6116_v32   ;;  %2671 = vperm.xlu0 %4440, %v6116_v32  }
 0xe77   :  { %4441 = vset.pattern.permute.xlu2 %v4873_v41 }
 0xe78   :  { %4442 = vset.pattern.permute.xlu1 %v4874_v59  ;;  %4443 = vset.pattern.permute.xlu0 %v4875_v28 }
 0xe79   :  { %2708 = vperm.xlu2 %4441, %v6116_v32   ;;  %2745 = vperm.xlu1 %4442, %v6116_v32  }
 0xe7a   :  { %2782 = vperm.xlu0 %4443, %v6116_v32  }
 0xe81   :  { %4444 = vset.pattern.permute.xlu2 %v4876_v4  ;;  %4445 = vset.pattern.permute.xlu1 %v4877_v49 }
 0xe82   :  { %4446 = vset.pattern.permute.xlu0 %v4878_v56  ;;  %2819 = vperm.xlu2 %4444, %v6116_v32  }
 0xe83   :  { %2856 = vperm.xlu1 %4445, %v6116_v32   ;;  %2893 = vperm.xlu0 %4446, %v6116_v32  }
 0xe85   :  { %v2436_v25 = vpop.f32.mrf.mxu0 }
 0xe86   :  { %v2448_v9 = vadd.f32 %v2436_v25, %v6066_v48 }
 0xe88   :  { %v2455_v6 = vadd.f32 %v6104_v43, %v2448_v9  ;;  %v4103_v9 = vld [vmem:[%s7212_s11 + $0x90] sm:$0xff] }
 0xe8a   :  { %v2462_v38 = vmul.f32 %v6108_v1, %v2455_v6  ;;  %4447 = vset.pattern.permute.xlu2 %v4879_v13  ;;  %v4109_v6 = vld [vmem:[%s7212_s11 + $0xc0] sm:$0xff] }
 0xe8b   :  { %4448 = vset.pattern.permute.xlu1 %v4880_v34  ;;  %4449 = vset.pattern.permute.xlu0 %v4881_v10 }
 0xe8c   :  { %v6152_v45 = vadd.f32 %v6111_v36, %v2462_v38  ;;  %2930 = vperm.xlu2 %4447, %v6116_v32   ;;  %2967 = vperm.xlu1 %4448, %v6116_v32   ;;  %v4115_v38 = vld [vmem:[%s7212_s11 + $0xf0] sm:$0xff] }
 0xe8d   :  { %3004 = vperm.xlu0 %4449, %v6116_v32   ;;  %v2438_v48 = vpop.f32.mrf.mxu0 }
 0xe8e   :  { %v2449_v17 = vadd.f32 %v2438_v48, %v6068_v20 }
 0xe90   :  { %v2456_v0 = vadd.f32 %v6104_v43, %v2449_v17 }
 0xe92   :  { %v2463_v23 = vmul.f32 %v6108_v1, %v2456_v0 }
 0xe94   :  { %v6161_v16 = vadd.f32 %v6111_v36, %v2463_v23  ;;  %4450 = vset.pattern.permute.xlu2 %v4882_v19  ;;  %4451 = vset.pattern.permute.xlu1 %v4883_v12  ;;  %v4121_v23 = vld [vmem:[%s7212_s11 + $0x120] sm:$0xff] }
 0xe95   :  { %4452 = vset.pattern.permute.xlu0 %v4884_v21  ;;  %3041 = vperm.xlu2 %4450, %v6116_v32   ;;  %v2441_v33 = vpop.f32.mrf.mxu0 }
 0xe96   :  { %3078 = vperm.xlu1 %4451, %v6116_v32   ;;  %3115 = vperm.xlu0 %4452, %v6116_v32   ;;  %v2450_v20 = vadd.f32 %v2441_v33, %v6075_v24  ;;  %v4127_v33 = vld [vmem:[%s7212_s11 + $0x150] sm:$0xff] }
 0xe98   :  { %v2457_v30 = vadd.f32 %v6104_v43, %v2450_v20 }
 0xe9a   :  { %v2464_v31 = vmul.f32 %v6108_v1, %v2457_v30 }
 0xe9c   :  { %v6173_v18 = vadd.f32 %v6111_v36, %v2464_v31 }
 0xe9d   :  { %4453 = vset.pattern.permute.xlu2 %v4885_v40  ;;  %v2443_v3 = vpop.f32.mrf.mxu0 }
 0xe9e   :  { %4454 = vset.pattern.permute.xlu1 %v4886_v29  ;;  %4455 = vset.pattern.permute.xlu0 %v4887_v57  ;;  %v2451_v7 = vadd.f32 %v2443_v3, %v6077_v26  ;;  %v4890_v26 = vmov 23  }
 0xe9f   :  { %3152 = vperm.xlu2 %4453, %v6116_v32   ;;  %3189 = vperm.xlu1 %4454, %v6116_v32  }
 0xea0   :  { %3226 = vperm.xlu0 %4455, %v6116_v32   ;;  %v2458_v24 = vadd.f32 %v6104_v43, %v2451_v7  ;;  %v4897_v43 = vmov 29  }
 0xea2   :  { %v2465_v62 = vmul.f32 %v6108_v1, %v2458_v24 }
 0xea4   :  { %v6185_v55 = vadd.f32 %v6111_v36, %v2465_v62 }
 0xea7   :  { %4456 = vset.pattern.permute.xlu2 %v4888_v15  ;;  %4457 = vset.pattern.permute.xlu1 %v4889_v61 }
 0xea8   :  { %4458 = vset.pattern.permute.xlu0 %v4890_v26  ;;  %3263 = vperm.xlu2 %4456, %v6116_v32  }
 0xea9   :  { %3300 = vperm.xlu1 %4457, %v6116_v32   ;;  %3337 = vperm.xlu0 %4458, %v6116_v32  }
 0xeb0   :  { %4459 = vset.pattern.permute.xlu2 %v4891_v2 }
 0xeb1   :  { %4460 = vset.pattern.permute.xlu1 %v4892_v54  ;;  %4461 = vset.pattern.permute.xlu0 %v4893_v42 }
 0xeb2   :  { %3374 = vperm.xlu2 %4459, %v6116_v32   ;;  %3411 = vperm.xlu1 %4460, %v6116_v32  }
 0xeb3   :  { %3448 = vperm.xlu0 %4461, %v6116_v32  }
 0xeba   :  { %4462 = vset.pattern.permute.xlu2 %v4894_v46  ;;  %4463 = vset.pattern.permute.xlu1 %v7227_v27 }
 0xebb   :  { %4466 = vset.pattern.permute.xlu0 %v4896_v52  ;;  %3485 = vperm.xlu2 %4462, %v6116_v32  }
 0xebc   :  { %3522 = vperm.xlu1 %4463, %v6116_v32   ;;  %3633 = vperm.xlu0 %4466, %v6116_v32  }
 0xec0   :  { %v2482_v58 = vpop.permute.xlu2 %2481 }
 0xec1   :  { %v2509_v0 = vmul.f32 %v2482_v58, %v2473_v11 }
 0xec3   :  { %4464 = vset.pattern.permute.xlu2 %v4897_v43 }
 0xec4   :  { %4467 = vset.pattern.permute.xlu1 %v4869_v50  ;;  %4468 = vset.pattern.permute.xlu0 %v7225_v63 }
 0xec5   :  { %3559 = vperm.xlu2 %4464, %v6116_v32   ;;  %2486 = vperm.xlu1 %4467, %v6125_v22  }
 0xec6   :  { %2527 = vperm.xlu0 %4468, %v6125_v22  }
 0xec9   :  { %v2598_v51 = vpop.permute.xlu2 %2597 }
 0xeca   :  { %v2620_v20 = vmul.f32 %v4103_v9, %v2598_v51  ;;  %v4145_v9 = vld [vmem:[%s7212_s11 + $0x1e0] sm:$0xff] }
 0xecd   :  { %4465 = vset.pattern.permute.xlu2 %v7223_v37  ;;  %4470 = vset.pattern.permute.xlu1 %v4870_v8 }
 0xece   :  { %4471 = vset.pattern.permute.xlu0 %v4871_v60  ;;  %3596 = vperm.xlu2 %4465, %v6116_v32  }
 0xecf   :  { %2601 = vperm.xlu1 %4470, %v6125_v22   ;;  %2638 = vperm.xlu0 %4471, %v6125_v22  }
 0xed3   :  { %v2709_v1 = vpop.permute.xlu2 %2708 }
 0xed4   :  { %v2731_v7 = vmul.f32 %v4121_v23, %v2709_v1  ;;  %v4139_v1 = vld [vmem:[%s7212_s11 + $0x1b0] sm:$0xff] }
 0xed6   :  { %4469 = vset.pattern.permute.xlu2 %v4867_v53 }
 0xed7   :  { %4473 = vset.pattern.permute.xlu1 %v4873_v41  ;;  %4474 = vset.pattern.permute.xlu0 %v4874_v59 }
 0xed8   :  { %2564 = vperm.xlu2 %4469, %v6125_v22   ;;  %2712 = vperm.xlu1 %4473, %v6125_v22   ;;  %v2524_v36 = vpop.permute.xlu1 %2523 }
 0xed9   :  { %2749 = vperm.xlu0 %4474, %v6125_v22   ;;  %v2561_v47 = vpop.permute.xlu0 %2560  ;;  %v2546_v48 = vmul.f32 %v4091_v39, %v2524_v36 }
 0xeda   :  { %v2583_v17 = vmul.f32 %v4097_v5, %v2561_v47  ;;  %v4133_v5 = vld [vmem:[%s7212_s11 + $0x180] sm:$0xff] }
 0xedb   :  { %v3662_v24 = vadd.f32 %v2546_v48, %v2509_v0 }
 0xedc   :  { %v2820_v44 = vpop.permute.xlu2 %2819  ;;  %v3668_v62 = vadd.f32 %v2620_v20, %v2583_v17 }
 0xedd   :  { %v2842_v0 = vmul.f32 %v4139_v1, %v2820_v44  ;;  %v4175_v44 = vld [vmem:[%s7212_s11 + $0x2d0] sm:$0xff] }
 0xee0   :  { %4472 = vset.pattern.permute.xlu2 %v4872_v35  ;;  %4476 = vset.pattern.permute.xlu1 %v4876_v4 }
 0xee1   :  { %4477 = vset.pattern.permute.xlu0 %v4877_v49  ;;  %2675 = vperm.xlu2 %4472, %v6125_v22  }
 0xee2   :  { %2823 = vperm.xlu1 %4476, %v6125_v22   ;;  %2860 = vperm.xlu0 %4477, %v6125_v22   ;;  %v2635_v32 = vpop.permute.xlu1 %2634  ;;  %v2672_v14 = vpop.permute.xlu0 %2671 }
 0xee3   :  { %v2657_v30 = vmul.f32 %v4109_v6, %v2635_v32  ;;  %v2694_v31 = vmul.f32 %v4115_v38, %v2672_v14  ;;  %v3758_v14 = vadd.f32 %v3668_v62, %v3662_v24  ;;  %v4151_v6 = vld [vmem:[%s7212_s11 + $0x210] sm:$0xff]  ;;  %v4169_v62 = vld [vmem:[%s7212_s11 + $0x2a0] sm:$0xff] }
 0xee4   :  { %v4163_v24 = vld [vmem:[%s7212_s11 + $0x270] sm:$0xff] }
 0xee5   :  { %v3674_v47 = vadd.f32 %v2694_v31, %v2657_v30 }
 0xee6   :  { %v2931_v25 = vpop.permute.xlu2 %2930 }
 0xee9   :  { %4475 = vset.pattern.permute.xlu2 %v4875_v28 }
 0xeea   :  { %4479 = vset.pattern.permute.xlu1 %v4879_v13  ;;  %4480 = vset.pattern.permute.xlu0 %v4880_v34 }
 0xeeb   :  { %2786 = vperm.xlu2 %4475, %v6125_v22   ;;  %2934 = vperm.xlu1 %4479, %v6125_v22   ;;  %v2746_v3 = vpop.permute.xlu1 %2745 }
 0xeec   :  { %2971 = vperm.xlu0 %4480, %v6125_v22   ;;  %v2768_v58 = vmul.f32 %v4127_v33, %v2746_v3  ;;  %v2783_v36 = vpop.permute.xlu0 %2782 }
 0xeed   :  { %v2805_v38 = vmul.f32 %v4133_v5, %v2783_v36 }
 0xeee   :  { %v3680_v51 = vadd.f32 %v2768_v58, %v2731_v7  ;;  %v4157_v7 = vld [vmem:[%s7212_s11 + $0x240] sm:$0xff] }
 0xeef   :  { %v3042_v32 = vpop.permute.xlu2 %3041  ;;  %v3686_v20 = vadd.f32 %v2842_v0, %v2805_v38  ;;  %v2953_v36 = vmul.f32 %v4157_v7, %v2931_v25  ;;  %v4205_v7 = vld [vmem:[%s7212_s11 + $0x3c0] sm:$0xff] }
 0xef0   :  { %v3764_v39 = vadd.f32 %v3680_v51, %v3674_v47 }
 0xef2   :  { %v3806_v11 = vadd.f32 %v3764_v39, %v3758_v14  ;;  %v3064_v14 = vmul.f32 %v4175_v44, %v3042_v32 }
 0xef3   :  { %4478 = vset.pattern.permute.xlu2 %v4878_v56  ;;  %4482 = vset.pattern.permute.xlu1 %v4882_v19 }
 0xef4   :  { %4483 = vset.pattern.permute.xlu0 %v4883_v12  ;;  %2897 = vperm.xlu2 %4478, %v6125_v22  }
 0xef5   :  { %3045 = vperm.xlu1 %4482, %v6125_v22   ;;  %3082 = vperm.xlu0 %4483, %v6125_v22   ;;  %v2857_v48 = vpop.permute.xlu1 %2856  ;;  %v2894_v17 = vpop.permute.xlu0 %2893 }
 0xef6   :  { %v2879_v23 = vmul.f32 %v4145_v9, %v2857_v48  ;;  %v2916_v33 = vmul.f32 %v4151_v6, %v2894_v17 }
 0xef8   :  { %v3692_v30 = vadd.f32 %v2916_v33, %v2879_v23  ;;  %v4199_v23 = vld [vmem:[%s7212_s11 + $0x390] sm:$0xff] }
 0xef9   :  { %v3153_v31 = vpop.permute.xlu2 %3152 }
 0xefa   :  { %v3770_v3 = vadd.f32 %v3692_v30, %v3686_v20  ;;  %v4193_v20 = vld [vmem:[%s7212_s11 + $0x360] sm:$0xff] }
 0xefb   :  { %v4181_v30 = vld [vmem:[%s7212_s11 + $0x300] sm:$0xff]  ;;  %v3175_v44 = vmul.f32 %v4193_v20, %v3153_v31 }
 0xefc   :  { %4481 = vset.pattern.permute.xlu2 %v4881_v10 }
 0xefd   :  { %4485 = vset.pattern.permute.xlu1 %v4885_v40  ;;  %4486 = vset.pattern.permute.xlu0 %v4886_v29 }
 0xefe   :  { %3008 = vperm.xlu2 %4481, %v6125_v22   ;;  %3156 = vperm.xlu1 %4485, %v6125_v22   ;;  %v2968_v58 = vpop.permute.xlu1 %2967 }
 0xeff   :  { %3193 = vperm.xlu0 %4486, %v6125_v22   ;;  %v2990_v47 = vmul.f32 %v4163_v24, %v2968_v58  ;;  %v3005_v51 = vpop.permute.xlu0 %3004  ;;  %v4217_v58 = vld [vmem:[%s7212_s11 + $0x420] sm:$0xff] }
 0xf00   :  { %v3027_v39 = vmul.f32 %v4169_v62, %v3005_v51  ;;  %v4211_v62 = vld [vmem:[%s7212_s11 + $0x3f0] sm:$0xff] }
 0xf01   :  { %v3698_v5 = vadd.f32 %v2990_v47, %v2953_v36  ;;  %v4223_v36 = vld [vmem:[%s7212_s11 + $0x450] sm:$0xff] }
 0xf02   :  { %v3704_v1 = vadd.f32 %v3064_v14, %v3027_v39  ;;  %v3264_v9 = vpop.permute.xlu2 %3263 }
 0xf04   :  { %v3776_v6 = vadd.f32 %v3704_v1, %v3698_v5  ;;  %v3286_v5 = vmul.f32 %v4211_v62, %v3264_v9  ;;  %v4229_v62 = vld [vmem:[%s7212_s11 + $0x480] sm:$0xff] }
 0xf06   :  { %v3812_v38 = vadd.f32 %v3776_v6, %v3770_v3  ;;  %4484 = vset.pattern.permute.xlu2 %v4884_v21  ;;  %4488 = vset.pattern.permute.xlu1 %v4888_v15  ;;  %v4187_v3 = vld [vmem:[%s7212_s11 + $0x330] sm:$0xff] }
 0xf07   :  { %4489 = vset.pattern.permute.xlu0 %v4889_v61  ;;  %3119 = vperm.xlu2 %4484, %v6125_v22  }
 0xf08   :  { %v6299_v25 = vadd.f32 %v3812_v38, %v3806_v11  ;;  %3267 = vperm.xlu1 %4488, %v6125_v22   ;;  %3304 = vperm.xlu0 %4489, %v6125_v22   ;;  %v3079_v32 = vpop.permute.xlu1 %3078  ;;  %v3116_v48 = vpop.permute.xlu0 %3115 }
 0xf09   :  { %v3101_v47 = vmul.f32 %v4181_v30, %v3079_v32  ;;  %v3138_v51 = vmul.f32 %v4187_v3, %v3116_v48 }
 0xf0c   :  { %v3375_v17 = vpop.permute.xlu2 %3374 }
 0xf0f   :  { %4487 = vset.pattern.permute.xlu2 %v4887_v57 }
 0xf10   :  { %4491 = vset.pattern.permute.xlu1 %v4891_v2  ;;  %4492 = vset.pattern.permute.xlu0 %v4892_v54 }
 0xf11   :  { %3230 = vperm.xlu2 %4487, %v6125_v22   ;;  %3378 = vperm.xlu1 %4491, %v6125_v22   ;;  %v3190_v0 = vpop.permute.xlu1 %3189 }
 0xf12   :  { %3415 = vperm.xlu0 %4492, %v6125_v22   ;;  %v3227_v11 = vpop.permute.xlu0 %3226  ;;  %v3212_v24 = vmul.f32 %v4199_v23, %v3190_v0  ;;  %v3710_v0 = vadd.f32 %v3138_v51, %v3101_v47  ;;  %v4259_v47 = vld [vmem:[%s7212_s11 + $0x570] sm:$0xff] }
 0xf13   :  { %v3249_v14 = vmul.f32 %v4205_v7, %v3227_v11  ;;  %v4235_v7 = vld [vmem:[%s7212_s11 + $0x4b0] sm:$0xff] }
 0xf14   :  { %v3716_v1 = vadd.f32 %v3212_v24, %v3175_v44  ;;  %v4241_v24 = vld [vmem:[%s7212_s11 + $0x4e0] sm:$0xff] }
 0xf15   :  { %v3486_v33 = vpop.permute.xlu2 %3485  ;;  %v3722_v23 = vadd.f32 %v3286_v5, %v3249_v14  ;;  %v3397_v14 = vmul.f32 %v4229_v62, %v3375_v17  ;;  %v4271_v5 = vld [vmem:[%s7212_s11 + $0x5d0] sm:$0xff] }
 0xf16   :  { %v3782_v48 = vadd.f32 %v3716_v1, %v3710_v0 }
 0xf19   :  { %4490 = vset.pattern.permute.xlu2 %v4890_v26  ;;  %4494 = vset.pattern.permute.xlu1 %v4894_v46 }
 0xf1a   :  { %4495 = vset.pattern.permute.xlu0 %v7227_v27  ;;  %3341 = vperm.xlu2 %4490, %v6125_v22  }
 0xf1b   :  { %3489 = vperm.xlu1 %4494, %v6125_v22   ;;  %3526 = vperm.xlu0 %4495, %v6125_v22   ;;  %v3301_v31 = vpop.permute.xlu1 %3300  ;;  %v3338_v39 = vpop.permute.xlu0 %3337 }
 0xf1c   :  { %v3323_v6 = vmul.f32 %v4217_v58, %v3301_v31  ;;  %v3360_v38 = vmul.f32 %v4223_v36, %v3338_v39  ;;  %v4247_v58 = vld [vmem:[%s7212_s11 + $0x510] sm:$0xff]  ;;  %v4265_v31 = vld [vmem:[%s7212_s11 + $0x5a0] sm:$0xff] }
 0xf1d   :  { %v4253_v39 = vld [vmem:[%s7212_s11 + $0x540] sm:$0xff]  ;;  %v3508_v1 = vmul.f32 %v4247_v58, %v3486_v33 }
 0xf1e   :  { %v3728_v20 = vadd.f32 %v3360_v38, %v3323_v6 }
 0xf1f   :  { %v3560_v32 = vpop.permute.xlu2 %3559 }
 0xf20   :  { %v3788_v11 = vadd.f32 %v3728_v20, %v3722_v23  ;;  %v3582_v17 = vmul.f32 %v4259_v47, %v3560_v32 }
 0xf22   :  { %v3818_v30 = vadd.f32 %v3788_v11, %v3782_v48  ;;  %4493 = vset.pattern.permute.xlu2 %v4893_v42 }
 0xf23   :  { %4496 = vset.pattern.permute.xlu1 %v4897_v43  ;;  %4499 = vset.pattern.permute.xlu0 %v4869_v50 }
 0xf24   :  { %3452 = vperm.xlu2 %4493, %v6125_v22   ;;  %3563 = vperm.xlu1 %4496, %v6125_v22   ;;  %v3412_v9 = vpop.permute.xlu1 %3411 }
 0xf25   :  { %2491 = vperm.xlu0 %4499, %v6152_v45   ;;  %v3449_v3 = vpop.permute.xlu0 %3448  ;;  %v3434_v36 = vmul.f32 %v4235_v7, %v3412_v9 }
 0xf26   :  { %v3471_v51 = vmul.f32 %v4241_v24, %v3449_v3 }
 0xf27   :  { %v3734_v6 = vadd.f32 %v3434_v36, %v3397_v14  ;;  %v4098_v14 = vld [vmem:[%s7212_s11 + $0x68] sm:$0xff] }
 0xf28   :  { %v3597_v44 = vpop.permute.xlu2 %3596  ;;  %v3740_v23 = vadd.f32 %v3508_v1, %v3471_v51 }
 0xf29   :  { %v3619_v20 = vmul.f32 %v4265_v31, %v3597_v44  ;;  %v2474_v31 = vld [vmem:[%s7212_s11 + $0x8] sm:$0xff] }
 0xf2a   :  { %v3794_v33 = vadd.f32 %v3740_v23, %v3734_v6 }
 0xf2c   :  { %4498 = vset.pattern.permute.xlu2 %v4896_v52  ;;  %4497 = vset.pattern.permute.xlu1 %v7223_v37 }
 0xf2d   :  { %4502 = vset.pattern.permute.xlu0 %v4870_v8  ;;  %3637 = vperm.xlu2 %4498, %v6125_v22  }
 0xf2e   :  { %3600 = vperm.xlu1 %4497, %v6125_v22   ;;  %2605 = vperm.xlu0 %4502, %v6152_v45   ;;  %v3523_v38 = vpop.permute.xlu1 %3522  ;;  %v3634_v0 = vpop.permute.xlu0 %3633 }
 0xf2f   :  { %v3545_v48 = vmul.f32 %v4253_v39, %v3523_v38  ;;  %v3656_v11 = vmul.f32 %v4271_v5, %v3634_v0  ;;  %v4092_v39 = vld [vmem:[%s7212_s11 + $0x38] sm:$0xff]  ;;  %v4110_v5 = vld [vmem:[%s7212_s11 + $0xc8] sm:$0xff] }
 0xf30   :  { %v4116_v38 = vld [vmem:[%s7212_s11 + $0xf8] sm:$0xff] }
 0xf31   :  { %v3746_v9 = vadd.f32 %v3582_v17, %v3545_v48  ;;  %v3752_v3 = vadd.f32 %v3656_v11, %v3619_v20  ;;  %v4122_v17 = vld [vmem:[%s7212_s11 + $0x128] sm:$0xff]  ;;  %v4128_v0 = vld [vmem:[%s7212_s11 + $0x158] sm:$0xff] }
 0xf32   :  { %v2565_v7 = vpop.permute.xlu2 %2564 }
 0xf33   :  { %v3800_v24 = vadd.f32 %v3752_v3, %v3746_v9  ;;  %v2584_v6 = vmul.f32 %v4098_v14, %v2565_v7 }
 0xf35   :  { %v3824_v62 = vadd.f32 %v3800_v24, %v3794_v33  ;;  %4500 = vset.pattern.permute.xlu2 %v7225_v63 }
 0xf36   :  { %4501 = vset.pattern.permute.xlu1 %v4867_v53  ;;  %4505 = vset.pattern.permute.xlu0 %v4873_v41 }
 0xf37   :  { %v3836_v22 = vadd.f32 %v3824_v62, %v3818_v30  ;;  %2568 = vperm.xlu1 %4501, %v6152_v45   ;;  %2531 = vperm.xlu2 %4500, %v6152_v45   ;;  %v2487_v32 = vpop.permute.xlu1 %2486 }
 0xf38   :  { %2716 = vperm.xlu0 %4505, %v6152_v45   ;;  %v2528_v44 = vpop.permute.xlu0 %2527  ;;  %v2510_v23 = vmul.f32 %v2487_v32, %v2474_v31 }
 0xf39   :  { %v6382_v58 = vadd.f32 %v3836_v22, %v6299_v25  ;;  %v4104_v25 = vld [vmem:[%s7212_s11 + $0x98] sm:$0xff]  ;;  %v2547_v20 = vmul.f32 %v4092_v39, %v2528_v44 }
 0xf3b   :  { %v2676_v36 = vpop.permute.xlu2 %2675  ;;  %v3663_v62 = vadd.f32 %v2547_v20, %v2510_v23  ;;  %v4158_v23 = vld [vmem:[%s7212_s11 + $0x248] sm:$0xff]  ;;  %v4164_v20 = vld [vmem:[%s7212_s11 + $0x278] sm:$0xff] }
 0xf3c   :  { %v2695_v7 = vmul.f32 %v4116_v38, %v2676_v36  ;;  %v4134_v38 = vld [vmem:[%s7212_s11 + $0x188] sm:$0xff] }
 0xf3f   :  { %4504 = vset.pattern.permute.xlu1 %v4872_v35  ;;  %4503 = vset.pattern.permute.xlu2 %v4871_v60 }
 0xf40   :  { %4508 = vset.pattern.permute.xlu0 %v4876_v4  ;;  %2679 = vperm.xlu1 %4504, %v6152_v45  }
 0xf41   :  { %2642 = vperm.xlu2 %4503, %v6152_v45   ;;  %2827 = vperm.xlu0 %4508, %v6152_v45   ;;  %v2602_v30 = vpop.permute.xlu1 %2601  ;;  %v2639_v47 = vpop.permute.xlu0 %2638 }
 0xf42   :  { %v2621_v1 = vmul.f32 %v4104_v25, %v2602_v30  ;;  %v2658_v48 = vmul.f32 %v4110_v5, %v2639_v47 }
 0xf44   :  { %v3669_v33 = vadd.f32 %v2621_v1, %v2584_v6  ;;  %v3675_v22 = vadd.f32 %v2695_v7, %v2658_v48  ;;  %v4140_v1 = vld [vmem:[%s7212_s11 + $0x1b8] sm:$0xff] }
 0xf45   :  { %v2787_v51 = vpop.permute.xlu2 %2786  ;;  %v4176_v7 = vld [vmem:[%s7212_s11 + $0x2d8] sm:$0xff] }
 0xf46   :  { %v3759_v14 = vadd.f32 %v3669_v33, %v3663_v62 }
 0xf48   :  { %4507 = vset.pattern.permute.xlu1 %v4875_v28 }
 0xf49   :  { %4506 = vset.pattern.permute.xlu2 %v4874_v59  ;;  %4511 = vset.pattern.permute.xlu0 %v4879_v13 }
 0xf4a   :  { %2790 = vperm.xlu1 %4507, %v6152_v45   ;;  %2753 = vperm.xlu2 %4506, %v6152_v45   ;;  %v2713_v11 = vpop.permute.xlu1 %2712 }
 0xf4b   :  { %2938 = vperm.xlu0 %4511, %v6152_v45   ;;  %v2732_v9 = vmul.f32 %v4122_v17, %v2713_v11  ;;  %v2750_v3 = vpop.permute.xlu0 %2749  ;;  %v4146_v17 = vld [vmem:[%s7212_s11 + $0x1e8] sm:$0xff] }
 0xf4c   :  { %v2769_v24 = vmul.f32 %v4128_v0, %v2750_v3  ;;  %v4152_v0 = vld [vmem:[%s7212_s11 + $0x218] sm:$0xff]  ;;  %v4170_v3 = vld [vmem:[%s7212_s11 + $0x2a8] sm:$0xff] }
 0xf4e   :  { %v3681_v30 = vadd.f32 %v2769_v24, %v2732_v9  ;;  %v2898_v25 = vpop.permute.xlu2 %2897  ;;  %v2806_v9 = vmul.f32 %v4134_v38, %v2787_v51 }
 0xf4f   :  { %v2917_v33 = vmul.f32 %v4152_v0, %v2898_v25  ;;  %v4194_v0 = vld [vmem:[%s7212_s11 + $0x368] sm:$0xff] }
 0xf50   :  { %v3765_v32 = vadd.f32 %v3681_v30, %v3675_v22 }
 0xf52   :  { %v3807_v44 = vadd.f32 %v3765_v32, %v3759_v14  ;;  %4510 = vset.pattern.permute.xlu1 %v4878_v56  ;;  %4509 = vset.pattern.permute.xlu2 %v4877_v49 }
 0xf53   :  { %4514 = vset.pattern.permute.xlu0 %v4882_v19  ;;  %2901 = vperm.xlu1 %4510, %v6152_v45  }
 0xf54   :  { %2864 = vperm.xlu2 %4509, %v6152_v45   ;;  %3049 = vperm.xlu0 %4514, %v6152_v45   ;;  %v2824_v36 = vpop.permute.xlu1 %2823  ;;  %v2861_v47 = vpop.permute.xlu0 %2860 }
 0xf55   :  { %v2843_v48 = vmul.f32 %v4140_v1, %v2824_v36  ;;  %v2880_v11 = vmul.f32 %v4146_v17, %v2861_v47 }
 0xf57   :  { %v3687_v30 = vadd.f32 %v2843_v48, %v2806_v9  ;;  %v3693_v14 = vadd.f32 %v2917_v33, %v2880_v11 }
 0xf58   :  { %v3009_v31 = vpop.permute.xlu2 %3008 }
 0xf59   :  { %v3028_v32 = vmul.f32 %v4170_v3, %v3009_v31  ;;  %v3771_v25 = vadd.f32 %v3693_v14, %v3687_v30  ;;  %v4188_v31 = vld [vmem:[%s7212_s11 + $0x338] sm:$0xff]  ;;  %v4218_v14 = vld [vmem:[%s7212_s11 + $0x428] sm:$0xff] }
 0xf5b   :  { %4513 = vset.pattern.permute.xlu1 %v4881_v10 }
 0xf5c   :  { %4512 = vset.pattern.permute.xlu2 %v4880_v34  ;;  %4517 = vset.pattern.permute.xlu0 %v4885_v40 }
 0xf5d   :  { %3012 = vperm.xlu1 %4513, %v6152_v45   ;;  %2975 = vperm.xlu2 %4512, %v6152_v45   ;;  %v2935_v39 = vpop.permute.xlu1 %2934 }
 0xf5e   :  { %3160 = vperm.xlu0 %4517, %v6152_v45   ;;  %v2972_v5 = vpop.permute.xlu0 %2971  ;;  %v2954_v24 = vmul.f32 %v4158_v23, %v2935_v39  ;;  %v4200_v23 = vld [vmem:[%s7212_s11 + $0x398] sm:$0xff] }
 0xf5f   :  { %v2991_v62 = vmul.f32 %v4164_v20, %v2972_v5  ;;  %v4182_v5 = vld [vmem:[%s7212_s11 + $0x308] sm:$0xff] }
 0xf61   :  { %v3120_v6 = vpop.permute.xlu2 %3119  ;;  %v3699_v47 = vadd.f32 %v2991_v62, %v2954_v24 }
 0xf65   :  { %4516 = vset.pattern.permute.xlu1 %v4884_v21  ;;  %4515 = vset.pattern.permute.xlu2 %v4883_v12 }
 0xf66   :  { %4520 = vset.pattern.permute.xlu0 %v4888_v15  ;;  %3123 = vperm.xlu1 %4516, %v6152_v45  }
 0xf67   :  { %3086 = vperm.xlu2 %4515, %v6152_v45   ;;  %3271 = vperm.xlu0 %4520, %v6152_v45   ;;  %v3046_v51 = vpop.permute.xlu1 %3045  ;;  %v3083_v22 = vpop.permute.xlu0 %3082 }
 0xf68   :  { %v3065_v36 = vmul.f32 %v4176_v7, %v3046_v51  ;;  %v3102_v48 = vmul.f32 %v4182_v5, %v3083_v22  ;;  %v3139_v7 = vmul.f32 %v4188_v31, %v3120_v6  ;;  %v4224_v22 = vld [vmem:[%s7212_s11 + $0x458] sm:$0xff] }
 0xf69   :  { %v4212_v6 = vld [vmem:[%s7212_s11 + $0x3f8] sm:$0xff] }
 0xf6a   :  { %v3705_v1 = vadd.f32 %v3065_v36, %v3028_v32  ;;  %v3711_v24 = vadd.f32 %v3139_v7, %v3102_v48 }
 0xf6b   :  { %v3231_v17 = vpop.permute.xlu2 %3230 }
 0xf6c   :  { %v3777_v39 = vadd.f32 %v3705_v1, %v3699_v47 }
 0xf6e   :  { %v3813_v38 = vadd.f32 %v3777_v39, %v3771_v25  ;;  %4519 = vset.pattern.permute.xlu1 %v4887_v57 }
 0xf6f   :  { %4518 = vset.pattern.permute.xlu2 %v4886_v29  ;;  %4523 = vset.pattern.permute.xlu0 %v4891_v2 }
 0xf70   :  { %v6477_v20 = vadd.f32 %v3813_v38, %v3807_v44  ;;  %3234 = vperm.xlu1 %4519, %v6152_v45   ;;  %3197 = vperm.xlu2 %4518, %v6152_v45   ;;  %v3157_v11 = vpop.permute.xlu1 %3156  ;;  %v4206_v44 = vld [vmem:[%s7212_s11 + $0x3c8] sm:$0xff] }
 0xf71   :  { %3382 = vperm.xlu0 %4523, %v6152_v45   ;;  %v3176_v9 = vmul.f32 %v4194_v0, %v3157_v11  ;;  %v3194_v3 = vpop.permute.xlu0 %3193  ;;  %v3250_v47 = vmul.f32 %v4206_v44, %v3231_v17  ;;  %v4236_v44 = vld [vmem:[%s7212_s11 + $0x4b8] sm:$0xff] }
 0xf72   :  { %v3213_v33 = vmul.f32 %v4200_v23, %v3194_v3 }
 0xf74   :  { %v3717_v62 = vadd.f32 %v3213_v33, %v3176_v9  ;;  %v3342_v51 = vpop.permute.xlu2 %3341 }
 0xf75   :  { %v3361_v1 = vmul.f32 %v4224_v22, %v3342_v51  ;;  %v4242_v51 = vld [vmem:[%s7212_s11 + $0x4e8] sm:$0xff]  ;;  %v4260_v22 = vld [vmem:[%s7212_s11 + $0x578] sm:$0xff] }
 0xf76   :  { %v3783_v30 = vadd.f32 %v3717_v62, %v3711_v24  ;;  %v4248_v62 = vld [vmem:[%s7212_s11 + $0x518] sm:$0xff] }
 0xf78   :  { %4522 = vset.pattern.permute.xlu1 %v4890_v26  ;;  %4521 = vset.pattern.permute.xlu2 %v4889_v61 }
 0xf79   :  { %4526 = vset.pattern.permute.xlu0 %v4894_v46  ;;  %3345 = vperm.xlu1 %4522, %v6152_v45  }
 0xf7a   :  { %3308 = vperm.xlu2 %4521, %v6152_v45   ;;  %3493 = vperm.xlu0 %4526, %v6152_v45   ;;  %v3268_v32 = vpop.permute.xlu1 %3267  ;;  %v3305_v36 = vpop.permute.xlu0 %3304 }
 0xf7b   :  { %v3287_v25 = vmul.f32 %v4212_v6, %v3268_v32  ;;  %v3324_v39 = vmul.f32 %v4218_v14, %v3305_v36  ;;  %v4272_v32 = vld [vmem:[%s7212_s11 + $0x5d8] sm:$0xff]  ;;  %v4254_v36 = vld [vmem:[%s7212_s11 + $0x548] sm:$0xff] }
 0xf7d   :  { %v3723_v5 = vadd.f32 %v3287_v25, %v3250_v47  ;;  %v3729_v38 = vadd.f32 %v3361_v1, %v3324_v39  ;;  %v4266_v47 = vld [vmem:[%s7212_s11 + $0x5a8] sm:$0xff] }
 0xf7e   :  { %v3453_v0 = vpop.permute.xlu2 %3452 }
 0xf7f   :  { %v3789_v31 = vadd.f32 %v3729_v38, %v3723_v5  ;;  %v3472_v14 = vmul.f32 %v4242_v51, %v3453_v0  ;;  %v3849_v5 = vsel %vm3848_vm6, %v6382_v58, 0.0  ;;  %v2475_v58 = vld [vmem:[%s7212_s11 + $0x10] sm:$0xff] }
 0xf81   :  { %v6500_v23 = vadd.f32 %v3789_v31, %v3783_v30  ;;  %4525 = vset.pattern.permute.xlu1 %v4893_v42 }
 0xf82   :  { %4524 = vset.pattern.permute.xlu2 %v4892_v54  ;;  %4530 = vset.pattern.permute.xlu0 %v4896_v52 }
 0xf83   :  { %3456 = vperm.xlu1 %4525, %v6152_v45   ;;  %3419 = vperm.xlu2 %4524, %v6152_v45   ;;  %v3379_v17 = vpop.permute.xlu1 %3378 }
 0xf84   :  { %3641 = vperm.xlu0 %4530, %v6152_v45   ;;  %v3416_v48 = vpop.permute.xlu0 %3415 }
 0xf85   :  { %v3435_v25 = vmul.f32 %v4236_v44, %v3416_v48 }
 0xf87   :  { %v3638_v11 = vpop.permute.xlu2 %3637 }
 0xf88   :  { %v3657_v31 = vmul.f32 %v4272_v32, %v3638_v11  ;;  %v4105_v11 = vld [vmem:[%s7212_s11 + $0xa0] sm:$0xff] }
 0xf8b   :  { %4527 = vset.pattern.permute.xlu1 %v7227_v27  ;;  %4528 = vset.pattern.permute.xlu2 %v4897_v43 }
 0xf8c   :  { %4561 = vset.pattern.permute.xlu0 %v7223_v37  ;;  %3530 = vperm.xlu1 %4527, %v6152_v45  }
 0xf8d   :  { %3567 = vperm.xlu2 %4528, %v6152_v45   ;;  %3608 = vperm.xlu0 %4561, %v6161_v16   ;;  %v3490_v9 = vpop.permute.xlu1 %3489  ;;  %v3527_v3 = vpop.permute.xlu0 %3526 }
 0xf8e   :  { %v3509_v6 = vmul.f32 %v4248_v62, %v3490_v9  ;;  %v3546_v62 = vmul.f32 %v4254_v36, %v3527_v3  ;;  %v4099_v3 = vld [vmem:[%s7212_s11 + $0x70] sm:$0xff] }
 0xf90   :  { %v3741_v9 = vadd.f32 %v3509_v6, %v3472_v14 }
 0xf91   :  { %v2532_v7 = vpop.permute.xlu2 %2531 }
 0xf94   :  { %4529 = vset.pattern.permute.xlu1 %v7223_v37 }
 0xf95   :  { %4531 = vset.pattern.permute.xlu2 %v4869_v50  ;;  %4596 = vset.pattern.permute.xlu0 %v4867_v53 }
 0xf96   :  { %3604 = vperm.xlu1 %4529, %v6152_v45   ;;  %2496 = vperm.xlu2 %4531, %v6161_v16   ;;  %v3564_v33 = vpop.permute.xlu1 %3563  ;;  %v4230_v45 = vld [vmem:[%s7212_s11 + $0x488] sm:$0xff] }
 0xf97   :  { %2580 = vperm.xlu0 %4596, %v6185_v55   ;;  %v2492_v24 = vpop.permute.xlu0 %2491  ;;  %v3398_v1 = vmul.f32 %v4230_v45, %v3379_v17  ;;  %v3583_v39 = vmul.f32 %v4260_v22, %v3564_v33  ;;  %v3850_v45 = vrot.slane %v3849_v5, 4 }
 0xf98   :  { %v2511_v14 = vmul.f32 %v2492_v24, %v2475_v58 }
 0xf99   :  { %v3735_v17 = vadd.f32 %v3435_v25, %v3398_v1  ;;  %v3747_v48 = vadd.f32 %v3583_v39, %v3546_v62  ;;  %v3851_v6 = vadd.f32 %v3850_v45, %v3849_v5 }
 0xf9b   :  { %v6526_v30 = vpop.permute.xlu2 %2642  ;;  %v3795_v22 = vadd.f32 %v3741_v9, %v3735_v17  ;;  %v3852_v24 = vrot.slane %v3851_v6, 2 }
 0xf9e   :  { %4532 = vset.pattern.permute.xlu1 %v7225_v63  ;;  %4533 = vset.pattern.permute.xlu2 %v4867_v53  ;;  %v4093_v63 = vld [vmem:[%s7212_s11 + $0x40] sm:$0xff] }
 0xf9f   :  { %4599 = vset.pattern.permute.xlu0 %v4872_v35  ;;  %2535 = vperm.xlu1 %4532, %v6161_v16   ;;  %v2548_v36 = vmul.f32 %v4093_v63, %v2532_v7  ;;  %v3853_v63 = vadd.f32 %v3852_v24, %v3851_v6  ;;  %v4111_v7 = vld [vmem:[%s7212_s11 + $0xd0] sm:$0xff] }
 0xfa0   :  { %2572 = vperm.xlu2 %4533, %v6161_v16   ;;  %2691 = vperm.xlu0 %4599, %v6185_v55   ;;  %v3601_v38 = vpop.permute.xlu1 %3600  ;;  %v2606_v0 = vpop.permute.xlu0 %2605  ;;  %v2659_v45 = vmul.f32 %v4111_v7, %v6526_v30  ;;  %v4165_v30 = vld [vmem:[%s7212_s11 + $0x280] sm:$0xff] }
 0xfa1   :  { %v3620_v51 = vmul.f32 %v4266_v47, %v3601_v38  ;;  %v2622_v47 = vmul.f32 %v4105_v11, %v2606_v0  ;;  %v3664_v5 = vadd.f32 %v2548_v36, %v2511_v14 }
 0xfa3   :  { %v3753_v33 = vadd.f32 %v3657_v31, %v3620_v51  ;;  %v4117_v51 = vld [vmem:[%s7212_s11 + $0x100] sm:$0xff] }
 0xfa4   :  { %v2754_v44 = vpop.permute.xlu2 %2753 }
 0xfa5   :  { %v3801_v37 = vadd.f32 %v3753_v33, %v3747_v48 }
 0xfa7   :  { %v3825_v27 = vadd.f32 %v3801_v37, %v3795_v22  ;;  %4535 = vset.pattern.permute.xlu1 %v4871_v60 }
 0xfa8   :  { %4534 = vset.pattern.permute.xlu2 %v4870_v8  ;;  %4602 = vset.pattern.permute.xlu0 %v4875_v28 }
 0xfa9   :  { %v3837_v32 = vadd.f32 %v3825_v27, %v6500_v23  ;;  %2646 = vperm.xlu1 %4535, %v6161_v16   ;;  %2609 = vperm.xlu2 %4534, %v6161_v16   ;;  %v2569_v37 = vpop.permute.xlu1 %2568  ;;  %v4123_v23 = vld [vmem:[%s7212_s11 + $0x130] sm:$0xff] }
 0xfaa   :  { %2802 = vperm.xlu0 %4602, %v6185_v55   ;;  %v2585_v1 = vmul.f32 %v4099_v3, %v2569_v37  ;;  %v2717_v25 = vpop.permute.xlu0 %2716  ;;  %v3854_v3 = vrot.slane %v3853_v63, 1 }
 0xfab   :  { %v3843_v39 = vadd.f32 %v3837_v32, %v6477_v20  ;;  %v4129_v20 = vld [vmem:[%s7212_s11 + $0x160] sm:$0xff]  ;;  %v2733_v17 = vmul.f32 %v4123_v23, %v2717_v25 }
 0xfac   :  { %v3670_v38 = vadd.f32 %v2622_v47, %v2585_v1  ;;  %v2770_v22 = vmul.f32 %v4129_v20, %v2754_v44  ;;  %v3855_v1 = vadd.f32 %v3854_v3, %v3853_v63  ;;  %v4159_v44 = vld [vmem:[%s7212_s11 + $0x250] sm:$0xff] }
 0xfad   :  { %v3856_v31 = vsel %vm3848_vm6, %v3843_v39, 0.0 }
 0xfae   :  { %v3857_v9 = vrot.slane %v3856_v31, 4  ;;  %v3760_v27 = vadd.f32 %v3670_v38, %v3664_v5  ;;  %v2865_v62 = vpop.permute.xlu2 %2864  ;;  %v3682_v14 = vadd.f32 %v2770_v22, %v2733_v17  ;;  %v4135_v17 = vld [vmem:[%s7212_s11 + $0x190] sm:$0xff] }
 0xfaf   :  { %v4171_v22 = vld [vmem:[%s7212_s11 + $0x2b0] sm:$0xff] }
 0xfb0   :  { %v3858_v0 = vadd.f32 %v3857_v9, %v3856_v31 }
 0xfb1   :  { %4538 = vset.pattern.permute.xlu1 %v4874_v59  ;;  %4536 = vset.pattern.permute.xlu2 %v4872_v35 }
 0xfb2   :  { %v3859_v48 = vrot.slane %v3858_v0, 2  ;;  %4605 = vset.pattern.permute.xlu0 %v4878_v56  ;;  %2757 = vperm.xlu1 %4538, %v6161_v16   ;;  %v2680_v33 = vpop.permute.xlu1 %2679 }
 0xfb3   :  { %2683 = vperm.xlu2 %4536, %v6161_v16   ;;  %2913 = vperm.xlu0 %4605, %v6185_v55   ;;  %v2696_v58 = vmul.f32 %v4117_v51, %v2680_v33  ;;  %v2828_v11 = vpop.permute.xlu0 %2827  ;;  %v4147_v51 = vld [vmem:[%s7212_s11 + $0x1f0] sm:$0xff]  ;;  %v4141_v33 = vld [vmem:[%s7212_s11 + $0x1c0] sm:$0xff] }
 0xfb4   :  { %v3860_v6 = vadd.f32 %v3859_v48, %v3858_v0  ;;  %v4153_v0 = vld [vmem:[%s7212_s11 + $0x220] sm:$0xff] }
 0xfb5   :  { %v3676_v32 = vadd.f32 %v2696_v58, %v2659_v45  ;;  %v4177_v45 = vld [vmem:[%s7212_s11 + $0x2e0] sm:$0xff]  ;;  %v2881_v58 = vmul.f32 %v4147_v51, %v2865_v62 }
 0xfb6   :  { %v3861_v37 = vrot.slane %v3860_v6, 1 }
 0xfb7   :  { %v3766_v36 = vadd.f32 %v3682_v14, %v3676_v32  ;;  %v2976_v47 = vpop.permute.xlu2 %2975  ;;  %v4195_v14 = vld [vmem:[%s7212_s11 + $0x370] sm:$0xff] }
 0xfb8   :  { %v3862_v25 = vadd.f32 %v3861_v37, %v3860_v6  ;;  %v2992_v31 = vmul.f32 %v4165_v30, %v2976_v47  ;;  %v4201_v6 = vld [vmem:[%s7212_s11 + $0x3a0] sm:$0xff]  ;;  %v2844_v37 = vmul.f32 %v4141_v33, %v2828_v11 }
 0xfb9   :  { %v3808_v39 = vadd.f32 %v3766_v36, %v3760_v27  ;;  %v4189_v11 = vld [vmem:[%s7212_s11 + $0x340] sm:$0xff] }
 0xfba   :  { %v6594_v24 = vsel %vm3891_vm7, %v3855_v1, %v3862_v25  ;;  %4541 = vset.pattern.permute.xlu1 %v4877_v49 }
 0xfbb   :  { %4537 = vset.pattern.permute.xlu2 %v4873_v41  ;;  %4608 = vset.pattern.permute.xlu0 %v4881_v10 }
 0xfbc   :  { %2868 = vperm.xlu1 %4541, %v6161_v16   ;;  %2720 = vperm.xlu2 %4537, %v6161_v16   ;;  %v2791_v5 = vpop.permute.xlu1 %2790 }
 0xfbd   :  { %3024 = vperm.xlu0 %4608, %v6185_v55   ;;  %v2939_v38 = vpop.permute.xlu0 %2938  ;;  %v2807_v3 = vmul.f32 %v4135_v17, %v2791_v5 }
 0xfbe   :  { %v2955_v9 = vmul.f32 %v4159_v44, %v2939_v38 }
 0xfbf   :  { %v3688_v44 = vadd.f32 %v2844_v37, %v2807_v3  ;;  %v4231_v3 = vld [vmem:[%s7212_s11 + $0x490] sm:$0xff] }
 0xfc0   :  { %v3700_v27 = vadd.f32 %v2992_v31, %v2955_v9 }
 0xfc1   :  { %v3087_v23 = vpop.permute.xlu2 %3086 }
 0xfc4   :  { %4544 = vset.pattern.permute.xlu1 %v4880_v34  ;;  %4539 = vset.pattern.permute.xlu2 %v4875_v28 }
 0xfc5   :  { %4611 = vset.pattern.permute.xlu0 %v4884_v21  ;;  %2979 = vperm.xlu1 %4544, %v6161_v16   ;;  %v2902_v63 = vpop.permute.xlu1 %2901 }
 0xfc6   :  { %2794 = vperm.xlu2 %4539, %v6161_v16   ;;  %3135 = vperm.xlu0 %4611, %v6185_v55   ;;  %v3050_v7 = vpop.permute.xlu0 %3049  ;;  %v2918_v48 = vmul.f32 %v4153_v0, %v2902_v63  ;;  %v4183_v0 = vld [vmem:[%s7212_s11 + $0x310] sm:$0xff] }
 0xfc7   :  { %v3066_v36 = vmul.f32 %v4177_v45, %v3050_v7 }
 0xfc8   :  { %v3694_v62 = vadd.f32 %v2918_v48, %v2881_v58  ;;  %v4207_v58 = vld [vmem:[%s7212_s11 + $0x3d0] sm:$0xff] }
 0xfca   :  { %v3198_v20 = vpop.permute.xlu2 %3197  ;;  %v3772_v31 = vadd.f32 %v3694_v62, %v3688_v44  ;;  %v4225_v44 = vld [vmem:[%s7212_s11 + $0x460] sm:$0xff] }
 0xfcb   :  { %v3214_v25 = vmul.f32 %v4201_v6, %v3198_v20  ;;  %v3103_v20 = vmul.f32 %v4183_v0, %v3087_v23  ;;  %v4237_v23 = vld [vmem:[%s7212_s11 + $0x4c0] sm:$0xff] }
 0xfcd   :  { %4547 = vset.pattern.permute.xlu1 %v4883_v12 }
 0xfce   :  { %4540 = vset.pattern.permute.xlu2 %v4876_v4  ;;  %4614 = vset.pattern.permute.xlu0 %v4887_v57 }
 0xfcf   :  { %3090 = vperm.xlu1 %4547, %v6161_v16   ;;  %2831 = vperm.xlu2 %4540, %v6161_v16   ;;  %v3013_v32 = vpop.permute.xlu1 %3012 }
 0xfd0   :  { %3246 = vperm.xlu0 %4614, %v6185_v55   ;;  %v3029_v47 = vmul.f32 %v4171_v22, %v3013_v32  ;;  %v3161_v1 = vpop.permute.xlu0 %3160 }
 0xfd1   :  { %v3177_v30 = vmul.f32 %v4195_v14, %v3161_v1 }
 0xfd2   :  { %v3706_v5 = vadd.f32 %v3066_v36, %v3029_v47 }
 0xfd3   :  { %v3718_v38 = vadd.f32 %v3214_v25, %v3177_v30  ;;  %v4219_v30 = vld [vmem:[%s7212_s11 + $0x430] sm:$0xff] }
 0xfd4   :  { %v3778_v9 = vadd.f32 %v3706_v5, %v3700_v27  ;;  %v3309_v63 = vpop.permute.xlu2 %3308 }
 0xfd6   :  { %v3814_v51 = vadd.f32 %v3778_v9, %v3772_v31 }
 0xfd7   :  { %4550 = vset.pattern.permute.xlu1 %v4886_v29  ;;  %4542 = vset.pattern.permute.xlu2 %v4878_v56 }
 0xfd8   :  { %v6652_v7 = vadd.f32 %v3814_v51, %v3808_v39  ;;  %4617 = vset.pattern.permute.xlu0 %v4890_v26  ;;  %3201 = vperm.xlu1 %4550, %v6161_v16   ;;  %v3124_v27 = vpop.permute.xlu1 %3123  ;;  %v4213_v39 = vld [vmem:[%s7212_s11 + $0x400] sm:$0xff] }
 0xfd9   :  { %2905 = vperm.xlu2 %4542, %v6161_v16   ;;  %3357 = vperm.xlu0 %4617, %v6185_v55   ;;  %v3140_v17 = vmul.f32 %v4189_v11, %v3124_v27  ;;  %v3272_v48 = vpop.permute.xlu0 %3271  ;;  %v4249_v27 = vld [vmem:[%s7212_s11 + $0x520] sm:$0xff] }
 0xfda   :  { %v3288_v14 = vmul.f32 %v4213_v39, %v3272_v48 }
 0xfdb   :  { %v3712_v33 = vadd.f32 %v3140_v17, %v3103_v20 }
 0xfdd   :  { %v3784_v45 = vadd.f32 %v3718_v38, %v3712_v33  ;;  %v3420_v22 = vpop.permute.xlu2 %3419  ;;  %v3325_v38 = vmul.f32 %v4219_v30, %v3309_v63  ;;  %v4243_v63 = vld [vmem:[%s7212_s11 + $0x4f0] sm:$0xff]  ;;  %v4273_v30 = vld [vmem:[%s7212_s11 + $0x5e0] sm:$0xff] }
 0xfde   :  { %v3436_v62 = vmul.f32 %v4237_v23, %v3420_v22  ;;  %v4255_v23 = vld [vmem:[%s7212_s11 + $0x550] sm:$0xff] }
 0xfe0   :  { %4553 = vset.pattern.permute.xlu1 %v4889_v61 }
 0xfe1   :  { %4543 = vset.pattern.permute.xlu2 %v4879_v13  ;;  %4620 = vset.pattern.permute.xlu0 %v4893_v42 }
 0xfe2   :  { %3312 = vperm.xlu1 %4553, %v6161_v16   ;;  %2942 = vperm.xlu2 %4543, %v6161_v16   ;;  %v3235_v6 = vpop.permute.xlu1 %3234 }
 0xfe3   :  { %3468 = vperm.xlu0 %4620, %v6185_v55   ;;  %v3251_v32 = vmul.f32 %v4207_v58, %v3235_v6  ;;  %v3383_v37 = vpop.permute.xlu0 %3382  ;;  %v4261_v58 = vld [vmem:[%s7212_s11 + $0x580] sm:$0xff] }
 0xfe4   :  { %v3399_v36 = vmul.f32 %v4231_v3, %v3383_v37 }
 0xfe5   :  { %v3724_v47 = vadd.f32 %v3288_v14, %v3251_v32  ;;  %v4100_v32 = vld [vmem:[%s7212_s11 + $0x78] sm:$0xff] }
 0xfe6   :  { %v3736_v1 = vadd.f32 %v3436_v62, %v3399_v36  ;;  %v4106_v62 = vld [vmem:[%s7212_s11 + $0xa8] sm:$0xff] }
 0xfe7   :  { %v3568_v25 = vpop.permute.xlu2 %3567 }
 0xfe8   :  { %v3584_v6 = vmul.f32 %v4261_v58, %v3568_v25 }
 0xfea   :  { %4556 = vset.pattern.permute.xlu1 %v4892_v54  ;;  %4545 = vset.pattern.permute.xlu2 %v4881_v10 }
 0xfeb   :  { %4622 = vset.pattern.permute.xlu0 %v4896_v52  ;;  %3423 = vperm.xlu1 %4556, %v6161_v16   ;;  %v3346_v5 = vpop.permute.xlu1 %3345 }
 0xfec   :  { %3016 = vperm.xlu2 %4545, %v6161_v16   ;;  %3649 = vperm.xlu0 %4622, %v6173_v18   ;;  %v3362_v31 = vmul.f32 %v4225_v44, %v3346_v5  ;;  %v3494_v20 = vpop.permute.xlu0 %3493  ;;  %v4267_v5 = vld [vmem:[%s7212_s11 + $0x5b0] sm:$0xff] }
 0xfed   :  { %v3510_v48 = vmul.f32 %v4249_v27, %v3494_v20  ;;  %v2476_v20 = vld [vmem:[%s7212_s11 + $0x18] sm:$0xff] }
 0xfee   :  { %v3730_v9 = vadd.f32 %v3362_v31, %v3325_v38 }
 0xff0   :  { %v3790_v0 = vadd.f32 %v3730_v9, %v3724_v47  ;;  %v2497_v51 = vpop.permute.xlu2 %2496 }
 0xff2   :  { %v3820_v11 = vadd.f32 %v3790_v0, %v3784_v45 }
 0xff3   :  { %4560 = vset.pattern.permute.xlu1 %v4897_v43 }
 0xff4   :  { %4546 = vset.pattern.permute.xlu2 %v4882_v19  ;;  %3571 = vperm.xlu1 %4560, %v6161_v16  }
 0xff5   :  { %3053 = vperm.xlu2 %4546, %v6161_v16   ;;  %v3457_v17 = vpop.permute.xlu1 %3456 }
 0xff6   :  { %v3473_v33 = vmul.f32 %v4243_v63, %v3457_v17  ;;  %v3642_v25 = vpop.permute.xlu0 %3641  ;;  %v4094_v17 = vld [vmem:[%s7212_s11 + $0x48] sm:$0xff] }
 0xff7   :  { %v3658_v31 = vmul.f32 %v4273_v30, %v3642_v25 }
 0xff8   :  { %v3742_v45 = vadd.f32 %v3510_v48, %v3473_v33 }
 0xffa   :  { %v3796_v22 = vadd.f32 %v3742_v45, %v3736_v1  ;;  %v2573_v39 = vpop.permute.xlu2 %2572  ;;  %v2512_v45 = vmul.f32 %v2497_v51, %v2476_v20  ;;  %v4118_v51 = vld [vmem:[%s7212_s11 + $0x108] sm:$0xff] }
 0xffb   :  { %v2586_v47 = vmul.f32 %v4100_v32, %v2573_v39 }
 0xffc   :  { %4563 = vset.pattern.permute.xlu1 %v4869_v50 }
 0xffd   :  { %4548 = vset.pattern.permute.xlu2 %v4884_v21  ;;  %2501 = vperm.xlu1 %4563, %v6173_v18  }
 0xffe   :  { %3127 = vperm.xlu2 %4548, %v6161_v16   ;;  %v3531_v3 = vpop.permute.xlu1 %3530 }
 0xfff   :  { %v3547_v14 = vmul.f32 %v4255_v23, %v3531_v3 }
0x1001   :  { %v3748_v37 = vadd.f32 %v3584_v6, %v3547_v14 }
0x1003   :  { %v2610_v36 = vpop.permute.xlu2 %2609 }
0x1004   :  { %v2623_v1 = vmul.f32 %v4106_v62, %v2610_v36 }
0x1005   :  { %4565 = vset.pattern.permute.xlu1 %v4867_v53 }
0x1006   :  { %4549 = vset.pattern.permute.xlu2 %v4885_v40  ;;  %v3671_v44 = vadd.f32 %v2623_v1, %v2586_v47  ;;  %2576 = vperm.xlu1 %4565, %v6173_v18  }
0x1007   :  { %3164 = vperm.xlu2 %4549, %v6161_v16  }
0x1008   :  { %v3605_v38 = vpop.permute.xlu1 %3604 }
0x1009   :  { %v3621_v9 = vmul.f32 %v4267_v5, %v3605_v38  ;;  %v4124_v5 = vld [vmem:[%s7212_s11 + $0x138] sm:$0xff]  ;;  %v4130_v38 = vld [vmem:[%s7212_s11 + $0x168] sm:$0xff] }
0x100b   :  { %v3754_v53 = vadd.f32 %v3658_v31, %v3621_v9 }
0x100d   :  { %v3802_v0 = vadd.f32 %v3754_v53, %v3748_v37  ;;  %v2684_v27 = vpop.permute.xlu2 %2683 }
0x100e   :  { %4566 = vset.pattern.permute.xlu1 %v4870_v8  ;;  %v2697_v36 = vmul.f32 %v4118_v51, %v2684_v27  ;;  %v4166_v51 = vld [vmem:[%s7212_s11 + $0x288] sm:$0xff] }
0x100f   :  { %v3826_v63 = vadd.f32 %v3802_v0, %v3796_v22  ;;  %4551 = vset.pattern.permute.xlu2 %v4887_v57  ;;  %2613 = vperm.xlu1 %4566, %v6173_v18   ;;  %v4136_v0 = vld [vmem:[%s7212_s11 + $0x198] sm:$0xff] }
0x1010   :  { %3238 = vperm.xlu2 %4551, %v6161_v16  }
0x1011   :  { %v3838_v48 = vadd.f32 %v3826_v63, %v3820_v11  ;;  %v2536_v33 = vpop.permute.xlu1 %2535 }
0x1012   :  { %v2549_v39 = vmul.f32 %v4094_v17, %v2536_v33 }
0x1013   :  { %v3844_v58 = vadd.f32 %v3838_v48, %v6652_v7  ;;  %v4112_v7 = vld [vmem:[%s7212_s11 + $0xd8] sm:$0xff] }
0x1014   :  { %v3665_v23 = vadd.f32 %v2549_v39, %v2512_v45 }
0x1015   :  { %v3863_v3 = vsel %vm3848_vm6, %v3844_v58, 0.0  ;;  %v4148_v58 = vld [vmem:[%s7212_s11 + $0x1f8] sm:$0xff] }
0x1016   :  { %v3864_v22 = vrot.slane %v3863_v3, 4  ;;  %v3761_v6 = vadd.f32 %v3671_v44, %v3665_v23  ;;  %v2721_v14 = vpop.permute.xlu2 %2720 }
0x1017   :  { %4568 = vset.pattern.permute.xlu1 %v4872_v35  ;;  %v2734_v9 = vmul.f32 %v4124_v5, %v2721_v14 }
0x1018   :  { %v3865_v32 = vadd.f32 %v3864_v22, %v3863_v3  ;;  %4552 = vset.pattern.permute.xlu2 %v4888_v15  ;;  %2687 = vperm.xlu1 %4568, %v6173_v18  }
0x1019   :  { %3275 = vperm.xlu2 %4552, %v6161_v16  }
0x101a   :  { %v3866_v11 = vrot.slane %v3865_v32, 2 }
0x101b   :  { %v2647_v37 = vpop.permute.xlu1 %2646 }
0x101c   :  { %v3867_v62 = vadd.f32 %v3866_v11, %v3865_v32  ;;  %v2660_v35 = vmul.f32 %v4112_v7, %v2647_v37  ;;  %v4160_v7 = vld [vmem:[%s7212_s11 + $0x258] sm:$0xff] }
0x101e   :  { %v3868_v47 = vrot.slane %v3867_v62, 1  ;;  %v3677_v1 = vadd.f32 %v2697_v36, %v2660_v35 }
0x1020   :  { %v3869_v30 = vadd.f32 %v3868_v47, %v3867_v62  ;;  %4569 = vset.pattern.permute.xlu1 %v4873_v41  ;;  %v2795_v25 = vpop.permute.xlu2 %2794  ;;  %v7233_v47 = vmov 28  }
0x1021   :  { %4554 = vset.pattern.permute.xlu2 %v4890_v26  ;;  %2724 = vperm.xlu1 %4569, %v6173_v18   ;;  %v2808_v17 = vmul.f32 %v4136_v0, %v2795_v25  ;;  %v4178_v25 = vld [vmem:[%s7212_s11 + $0x2e8] sm:$0xff] }
0x1022   :  { %v6750_v44 = vsel %vm3893_vm8, %v6594_v24, %v3869_v30  ;;  %3349 = vperm.xlu2 %4554, %v6161_v16   ;;  %v4142_v24 = vld [vmem:[%s7212_s11 + $0x1c8] sm:$0xff]  ;;  %v4172_v30 = vld [vmem:[%s7212_s11 + $0x2b8] sm:$0xff] }
0x1024   :  { %v2758_v31 = vpop.permute.xlu1 %2757 }
0x1025   :  { %v2771_v53 = vmul.f32 %v4130_v38, %v2758_v31 }
0x1027   :  { %v3683_v27 = vadd.f32 %v2771_v53, %v2734_v9 }
0x1029   :  { %v3767_v20 = vadd.f32 %v3683_v27, %v3677_v1  ;;  %4571 = vset.pattern.permute.xlu1 %v4875_v28  ;;  %v2832_v63 = vpop.permute.xlu2 %2831  ;;  %v4154_v28 = vld [vmem:[%s7212_s11 + $0x228] sm:$0xff] }
0x102a   :  { %4555 = vset.pattern.permute.xlu2 %v4891_v2  ;;  %v2845_v48 = vmul.f32 %v4142_v24, %v2832_v63  ;;  %2798 = vperm.xlu1 %4571, %v6173_v18   ;;  %v4190_v24 = vld [vmem:[%s7212_s11 + $0x348] sm:$0xff] }
0x102b   :  { %v3809_v33 = vadd.f32 %v3767_v20, %v3761_v6  ;;  %3386 = vperm.xlu2 %4555, %v6161_v16   ;;  %v7234_v20 = vmov 1  }
0x102c   :  { %v3689_v45 = vadd.f32 %v2845_v48, %v2808_v17 }
0x102e   :  { %v2869_v39 = vpop.permute.xlu1 %2868 }
0x102f   :  { %v2882_v3 = vmul.f32 %v4148_v58, %v2869_v39  ;;  %v4202_v58 = vld [vmem:[%s7212_s11 + $0x3a8] sm:$0xff] }
0x1032   :  { %4572 = vset.pattern.permute.xlu1 %v4876_v4 }
0x1033   :  { %4557 = vset.pattern.permute.xlu2 %v4893_v42  ;;  %v2906_v23 = vpop.permute.xlu2 %2905  ;;  %2835 = vperm.xlu1 %4572, %v6173_v18  }
0x1034   :  { %3460 = vperm.xlu2 %4557, %v6161_v16   ;;  %v2919_v22 = vmul.f32 %v4154_v28, %v2906_v23  ;;  %v4196_v28 = vld [vmem:[%s7212_s11 + $0x378] sm:$0xff] }
0x1036   :  { %v3695_v6 = vadd.f32 %v2919_v22, %v2882_v3 }
0x1037   :  { %v2980_v14 = vpop.permute.xlu1 %2979 }
0x1038   :  { %v3773_v32 = vadd.f32 %v3695_v6, %v3689_v45  ;;  %v2993_v37 = vmul.f32 %v4166_v51, %v2980_v14  ;;  %v4208_v51 = vld [vmem:[%s7212_s11 + $0x3d8] sm:$0xff] }
0x103b   :  { %4574 = vset.pattern.permute.xlu1 %v4878_v56 }
0x103c   :  { %4558 = vset.pattern.permute.xlu2 %v4894_v46  ;;  %v2943_v11 = vpop.permute.xlu2 %2942  ;;  %2909 = vperm.xlu1 %4574, %v6173_v18  }
0x103d   :  { %3497 = vperm.xlu2 %4558, %v6161_v16   ;;  %v2956_v62 = vmul.f32 %v4160_v7, %v2943_v11  ;;  %v4214_v7 = vld [vmem:[%s7212_s11 + $0x408] sm:$0xff] }
0x103f   :  { %v3701_v36 = vadd.f32 %v2993_v37, %v2956_v62 }
0x1041   :  { %v3091_v35 = vpop.permute.xlu1 %3090 }
0x1044   :  { %4575 = vset.pattern.permute.xlu1 %v4879_v13 }
0x1045   :  { %4559 = vset.pattern.permute.xlu2 %v7233_v47  ;;  %2946 = vperm.xlu1 %4575, %v6173_v18  }
0x1046   :  { %3534 = vperm.xlu2 %4559, %v6161_v16   ;;  %v3017_v56 = vpop.permute.xlu2 %3016 }
0x1047   :  { %v3030_v38 = vmul.f32 %v4172_v30, %v3017_v56  ;;  %v4220_v56 = vld [vmem:[%s7212_s11 + $0x438] sm:$0xff] }
0x104a   :  { %v3202_v1 = vpop.permute.xlu1 %3201 }
0x104b   :  { %v3215_v23 = vmul.f32 %v4202_v58, %v3202_v1 }
0x104d   :  { %4577 = vset.pattern.permute.xlu1 %v4881_v10  ;;  %v4184_v10 = vld [vmem:[%s7212_s11 + $0x318] sm:$0xff] }
0x104e   :  { %4562 = vset.pattern.permute.xlu2 %v4896_v52  ;;  %3020 = vperm.xlu1 %4577, %v6173_v18   ;;  %v3104_v17 = vmul.f32 %v4184_v10, %v3091_v35 }
0x104f   :  { %3645 = vperm.xlu2 %4562, %v6161_v16   ;;  %v3054_v5 = vpop.permute.xlu2 %3053 }
0x1050   :  { %v3067_v31 = vmul.f32 %v4178_v25, %v3054_v5  ;;  %v4101_v5 = vld [vmem:[%s7212_s11 + $0x80] sm:$0xff] }
0x1052   :  { %v3707_v9 = vadd.f32 %v3067_v31, %v3030_v38  ;;  %v4107_v31 = vld [vmem:[%s7212_s11 + $0xb0] sm:$0xff] }
0x1054   :  { %v3779_v53 = vadd.f32 %v3707_v9, %v3701_v36  ;;  %v3313_v0 = vpop.permute.xlu1 %3312 }
0x1055   :  { %v3326_v30 = vmul.f32 %v4220_v56, %v3313_v0  ;;  %v4232_v0 = vld [vmem:[%s7212_s11 + $0x498] sm:$0xff]  ;;  %v4137_v56 = vld [vmem:[%s7212_s11 + $0x1a0] sm:$0xff] }
0x1056   :  { %v3815_v27 = vadd.f32 %v3779_v53, %v3773_v32  ;;  %4578 = vset.pattern.permute.xlu1 %v4882_v19 }
0x1057   :  { %4564 = vset.pattern.permute.xlu2 %v7234_v20  ;;  %3057 = vperm.xlu1 %4578, %v6173_v18  }
0x1058   :  { %v6812_v16 = vadd.f32 %v3815_v27, %v3809_v33  ;;  %v3128_v63 = vpop.permute.xlu2 %3127  ;;  %2539 = vperm.xlu2 %4564, %v6173_v18  }
0x1059   :  { %v3141_v48 = vmul.f32 %v4190_v24, %v3128_v63  ;;  %v4238_v24 = vld [vmem:[%s7212_s11 + $0x4c8] sm:$0xff] }
0x105b   :  { %v3713_v45 = vadd.f32 %v3141_v48, %v3104_v17 }
0x105d   :  { %v3424_v39 = vpop.permute.xlu1 %3423 }
0x105f   :  { %4580 = vset.pattern.permute.xlu1 %v4884_v21 }
0x1060   :  { %4567 = vset.pattern.permute.xlu2 %v4871_v60  ;;  %3131 = vperm.xlu1 %4580, %v6173_v18  }
0x1061   :  { %v3165_v33 = vpop.permute.xlu2 %3164  ;;  %2650 = vperm.xlu2 %4567, %v6173_v18  }
0x1062   :  { %v3178_v3 = vmul.f32 %v4196_v28, %v3165_v33 }
0x1064   :  { %v3719_v22 = vadd.f32 %v3215_v23, %v3178_v3  ;;  %v4244_v3 = vld [vmem:[%s7212_s11 + $0x4f8] sm:$0xff] }
0x1066   :  { %v3785_v6 = vadd.f32 %v3719_v22, %v3713_v45  ;;  %v6825_v14 = vpop.permute.xlu1 %3571  ;;  %v3437_v45 = vmul.f32 %v4238_v24, %v3424_v39  ;;  %v4250_v39 = vld [vmem:[%s7212_s11 + $0x528] sm:$0xff] }
0x1068   :  { %4581 = vset.pattern.permute.xlu1 %v4885_v40 }
0x1069   :  { %4570 = vset.pattern.permute.xlu2 %v4874_v59  ;;  %3168 = vperm.xlu1 %4581, %v6173_v18  }
0x106a   :  { %v3239_v21 = vpop.permute.xlu2 %3238  ;;  %2761 = vperm.xlu2 %4570, %v6173_v18  }
0x106b   :  { %v3252_v37 = vmul.f32 %v4208_v51, %v3239_v21 }
0x106f   :  { %v6831_v32 = vpop.permute.xlu1 %2501 }
0x1071   :  { %4583 = vset.pattern.permute.xlu1 %v4887_v57  ;;  %v4226_v57 = vld [vmem:[%s7212_s11 + $0x468] sm:$0xff] }
0x1072   :  { %4573 = vset.pattern.permute.xlu2 %v4877_v49  ;;  %3242 = vperm.xlu1 %4583, %v6173_v18  }
0x1073   :  { %v3276_v11 = vpop.permute.xlu2 %3275  ;;  %2872 = vperm.xlu2 %4573, %v6173_v18  }
0x1074   :  { %v3289_v62 = vmul.f32 %v4214_v7, %v3276_v11 }
0x1076   :  { %v3725_v36 = vadd.f32 %v3289_v62, %v3252_v37  ;;  %v4256_v37 = vld [vmem:[%s7212_s11 + $0x558] sm:$0xff] }
0x1078   :  { %v2577_v35 = vpop.permute.xlu1 %2576 }
0x1079   :  { %v2587_v10 = vmul.f32 %v4101_v5, %v2577_v35 }
0x107a   :  { %4584 = vset.pattern.permute.xlu1 %v4888_v15 }
0x107b   :  { %4576 = vset.pattern.permute.xlu2 %v4880_v34  ;;  %3279 = vperm.xlu1 %4584, %v6173_v18  }
0x107c   :  { %v3350_v1 = vpop.permute.xlu2 %3349  ;;  %2983 = vperm.xlu2 %4576, %v6173_v18  }
0x107d   :  { %v3363_v25 = vmul.f32 %v4226_v57, %v3350_v1  ;;  %v4143_v1 = vld [vmem:[%s7212_s11 + $0x1d0] sm:$0xff] }
0x107f   :  { %v3731_v38 = vadd.f32 %v3363_v25, %v3326_v30 }
0x1081   :  { %v3791_v9 = vadd.f32 %v3731_v38, %v3725_v36  ;;  %v2614_v53 = vpop.permute.xlu1 %2613  ;;  %v4268_v38 = vld [vmem:[%s7212_s11 + $0x5b8] sm:$0xff] }
0x1082   :  { %v2624_v27 = vmul.f32 %v4107_v31, %v2614_v53  ;;  %v3609_v31 = vpop.permute.xlu0 %3608 }
0x1083   :  { %v6862_v63 = vadd.f32 %v3791_v9, %v3785_v6  ;;  %4586 = vset.pattern.permute.xlu1 %v4890_v26 }
0x1084   :  { %v6868_v17 = vadd.f32 %v2624_v27, %v2587_v10  ;;  %4579 = vset.pattern.permute.xlu2 %v4883_v12  ;;  %3353 = vperm.xlu1 %4586, %v6173_v18   ;;  %v3622_v10 = vmul.f32 %v4268_v38, %v3609_v31 }
0x1085   :  { %v3387_v48 = vpop.permute.xlu2 %3386  ;;  %3094 = vperm.xlu2 %4579, %v6173_v18  }
0x1086   :  { %v3400_v58 = vmul.f32 %v4232_v0, %v3387_v48 }
0x1088   :  { %v3737_v28 = vadd.f32 %v3437_v45, %v3400_v58  ;;  %v2477_v45 = vld [vmem:[%s7212_s11 + $0x20] sm:$0xff] }
0x108a   :  { %v6873_v33 = vpop.permute.xlu1 %2687  ;;  %v6960_v38 = vpop.permute.xlu0 %2580 }
0x108c   :  { %4587 = vset.pattern.permute.xlu1 %v4891_v2 }
0x108d   :  { %4582 = vset.pattern.permute.xlu2 %v4886_v29  ;;  %3390 = vperm.xlu1 %4587, %v6173_v18  }
0x108e   :  { %v3461_v26 = vpop.permute.xlu2 %3460  ;;  %3205 = vperm.xlu2 %4582, %v6173_v18  }
0x108f   :  { %v3474_v6 = vmul.f32 %v4244_v3, %v3461_v26  ;;  %v4095_v26 = vld [vmem:[%s7212_s11 + $0x50] sm:$0xff] }
0x1093   :  { %v6879_v23 = vpop.permute.xlu1 %2724 }
0x1095   :  { %4589 = vset.pattern.permute.xlu1 %v4893_v42  ;;  %v4262_v42 = vld [vmem:[%s7212_s11 + $0x588] sm:$0xff] }
0x1096   :  { %4585 = vset.pattern.permute.xlu2 %v4889_v61  ;;  %3464 = vperm.xlu1 %4589, %v6173_v18   ;;  %v3585_v36 = vmul.f32 %v4262_v42, %v6825_v14  ;;  %v4274_v14 = vld [vmem:[%s7212_s11 + $0x5e8] sm:$0xff] }
0x1097   :  { %v3498_v22 = vpop.permute.xlu2 %3497  ;;  %3316 = vperm.xlu2 %4585, %v6173_v18  }
0x1098   :  { %v3511_v21 = vmul.f32 %v4250_v39, %v3498_v22  ;;  %v2513_v22 = vmul.f32 %v6831_v32, %v2477_v45  ;;  %v4113_v32 = vld [vmem:[%s7212_s11 + $0xe0] sm:$0xff] }
0x109a   :  { %v3743_v51 = vadd.f32 %v3511_v21, %v3474_v6 }
0x109c   :  { %v3797_v7 = vadd.f32 %v3743_v51, %v3737_v28  ;;  %v2799_v11 = vpop.permute.xlu1 %2798  ;;  %v7235_v28 = vmov 30  }
0x109d   :  { %v2809_v25 = vmul.f32 %v4137_v56, %v2799_v11 }
0x109e   :  { %4590 = vset.pattern.permute.xlu1 %v4894_v46 }
0x109f   :  { %4588 = vset.pattern.permute.xlu2 %v4892_v54  ;;  %3501 = vperm.xlu1 %4590, %v6173_v18  }
0x10a0   :  { %v3535_v62 = vpop.permute.xlu2 %3534  ;;  %3427 = vperm.xlu2 %4588, %v6173_v18  }
0x10a1   :  { %v3548_v35 = vmul.f32 %v4256_v37, %v3535_v62 }
0x10a3   :  { %v3749_v57 = vadd.f32 %v3585_v36, %v3548_v35 }
0x10a5   :  { %v2836_v30 = vpop.permute.xlu1 %2835 }
0x10a6   :  { %v2846_v5 = vmul.f32 %v4143_v1, %v2836_v30  ;;  %v4125_v1 = vld [vmem:[%s7212_s11 + $0x140] sm:$0xff] }
0x10a7   :  { %4591 = vset.pattern.permute.xlu1 %v7233_v47 }
0x10a8   :  { %v6915_v9 = vadd.f32 %v2846_v5, %v2809_v25  ;;  %4592 = vset.pattern.permute.xlu2 %v4897_v43  ;;  %3538 = vperm.xlu1 %4591, %v6173_v18   ;;  %v2735_v25 = vmul.f32 %v4125_v1, %v6879_v23  ;;  %v4155_v23 = vld [vmem:[%s7212_s11 + $0x230] sm:$0xff] }
0x10a9   :  { %v3646_v53 = vpop.permute.xlu2 %3645  ;;  %3575 = vperm.xlu2 %4592, %v6173_v18  }
0x10aa   :  { %v3659_v27 = vmul.f32 %v4274_v14, %v3646_v53 }
0x10ac   :  { %v3755_v24 = vadd.f32 %v3659_v27, %v3622_v10 }
0x10ae   :  { %v3803_v0 = vadd.f32 %v3755_v24, %v3749_v57  ;;  %v2910_v48 = vpop.permute.xlu1 %2909  ;;  %v4149_v24 = vld [vmem:[%s7212_s11 + $0x200] sm:$0xff] }
0x10b0   :  { %v3827_v58 = vadd.f32 %v3803_v0, %v3797_v7  ;;  %4593 = vset.pattern.permute.xlu1 %v7235_v28 }
0x10b1   :  { %4594 = vset.pattern.permute.xlu2 %v4869_v50  ;;  %3612 = vperm.xlu1 %4593, %v6173_v18   ;;  %v4119_v50 = vld [vmem:[%s7212_s11 + $0x110] sm:$0xff] }
0x10b2   :  { %v3839_v3 = vadd.f32 %v3827_v58, %v6862_v63  ;;  %v2540_v39 = vpop.permute.xlu2 %2539  ;;  %2506 = vperm.xlu2 %4594, %v6185_v55   ;;  %v2920_v58 = vmul.f32 %v4155_v23, %v2910_v48 }
0x10b3   :  { %v2550_v6 = vmul.f32 %v4095_v26, %v2540_v39  ;;  %v6978_v39 = vpop.permute.xlu0 %2691 }
0x10b4   :  { %v3845_v21 = vadd.f32 %v3839_v3, %v6812_v16 }
0x10b5   :  { %v3666_v51 = vadd.f32 %v2550_v6, %v2513_v22  ;;  %v4161_v6 = vld [vmem:[%s7212_s11 + $0x260] sm:$0xff] }
0x10b6   :  { %v3870_v7 = vsel %vm3848_vm6, %v3845_v21, 0.0 }
0x10b7   :  { %v3871_v11 = vrot.slane %v3870_v7, 4  ;;  %v3762_v42 = vadd.f32 %v6868_v17, %v3666_v51  ;;  %v2947_v37 = vpop.permute.xlu1 %2946  ;;  %v2698_v17 = vmul.f32 %v4119_v50, %v6873_v33 }
0x10b8   :  { %v2957_v21 = vmul.f32 %v4161_v6, %v2947_v37  ;;  %v4251_v6 = vld [vmem:[%s7212_s11 + $0x530] sm:$0xff] }
0x10b9   :  { %v3872_v18 = vadd.f32 %v3871_v11, %v3870_v7  ;;  %4595 = vset.pattern.permute.xlu1 %v7234_v20 }
0x10ba   :  { %4597 = vset.pattern.permute.xlu2 %v4870_v8  ;;  %2543 = vperm.xlu1 %4595, %v6185_v55   ;;  %v4131_v8 = vld [vmem:[%s7212_s11 + $0x170] sm:$0xff] }
0x10bb   :  { %v3873_v16 = vrot.slane %v3872_v18, 2  ;;  %v2651_v63 = vpop.permute.xlu2 %2650  ;;  %2617 = vperm.xlu2 %4597, %v6185_v55   ;;  %v6991_v7 = vpop.permute.xlu0 %2802 }
0x10bc   :  { %v2661_v62 = vmul.f32 %v4113_v32, %v2651_v63 }
0x10bd   :  { %v3874_v36 = vadd.f32 %v3873_v16, %v3872_v18 }
0x10be   :  { %v3678_v35 = vadd.f32 %v2698_v17, %v2661_v62 }
0x10bf   :  { %v3875_v56 = vrot.slane %v3874_v36, 1 }
0x10c0   :  { %v3021_v20 = vpop.permute.xlu1 %3020 }
0x10c1   :  { %v3876_v57 = vadd.f32 %v3875_v56, %v3874_v36 }
0x10c2   :  { %4598 = vset.pattern.permute.xlu1 %v4871_v60  ;;  %v4173_v60 = vld [vmem:[%s7212_s11 + $0x2c0] sm:$0xff] }
0x10c3   :  { %v6954_v30 = vsel %vm3895_vm9, %v6750_v44, %v3876_v57  ;;  %4600 = vset.pattern.permute.xlu2 %v4873_v41  ;;  %2654 = vperm.xlu1 %4598, %v6185_v55   ;;  %v4179_v44 = vld [vmem:[%s7212_s11 + $0x2f0] sm:$0xff]  ;;  %v3031_v53 = vmul.f32 %v4173_v60, %v3021_v20  ;;  %v7005_v62 = vpop.permute.xlu0 %2913  ;;  %v4209_v20 = vld [vmem:[%s7212_s11 + $0x3e0] sm:$0xff] }
0x10c4   :  { %v2762_v33 = vpop.permute.xlu2 %2761  ;;  %2728 = vperm.xlu2 %4600, %v6185_v55  }
0x10c5   :  { %v2772_v5 = vmul.f32 %v4131_v8, %v2762_v33 }
0x10c7   :  { %v3684_v31 = vadd.f32 %v2772_v5, %v2735_v25 }
0x10c9   :  { %v3768_v41 = vadd.f32 %v3684_v31, %v3678_v35  ;;  %v3058_v14 = vpop.permute.xlu1 %3057  ;;  %v4221_v31 = vld [vmem:[%s7212_s11 + $0x440] sm:$0xff] }
0x10ca   :  { %v3068_v10 = vmul.f32 %v4179_v44, %v3058_v14  ;;  %v4227_v44 = vld [vmem:[%s7212_s11 + $0x470] sm:$0xff] }
0x10cb   :  { %v3810_v27 = vadd.f32 %v3768_v41, %v3762_v42  ;;  %4601 = vset.pattern.permute.xlu1 %v4874_v59  ;;  %v7023_v25 = vpop.permute.xlu0 %3024 }
0x10cc   :  { %v3708_v0 = vadd.f32 %v3068_v10, %v3031_v53  ;;  %4603 = vset.pattern.permute.xlu2 %v4876_v4  ;;  %2765 = vperm.xlu1 %4601, %v6185_v55   ;;  %v4167_v4 = vld [vmem:[%s7212_s11 + $0x290] sm:$0xff] }
0x10cd   :  { %v2873_v45 = vpop.permute.xlu2 %2872  ;;  %2839 = vperm.xlu2 %4603, %v6185_v55  }
0x10ce   :  { %v2883_v26 = vmul.f32 %v4149_v24, %v2873_v45  ;;  %v4239_v24 = vld [vmem:[%s7212_s11 + $0x4d0] sm:$0xff] }
0x10d0   :  { %v3696_v3 = vadd.f32 %v2920_v58, %v2883_v26 }
0x10d2   :  { %v3774_v22 = vadd.f32 %v3696_v3, %v6915_v9  ;;  %v3132_v59 = vpop.permute.xlu1 %3131 }
0x10d4   :  { %4604 = vset.pattern.permute.xlu1 %v4877_v49  ;;  %v4191_v49 = vld [vmem:[%s7212_s11 + $0x350] sm:$0xff] }
0x10d5   :  { %4606 = vset.pattern.permute.xlu2 %v4879_v13  ;;  %2876 = vperm.xlu1 %4604, %v6185_v55   ;;  %v4185_v13 = vld [vmem:[%s7212_s11 + $0x320] sm:$0xff]  ;;  %v3142_v32 = vmul.f32 %v4191_v49, %v3132_v59 }
0x10d6   :  { %v2984_v48 = vpop.permute.xlu2 %2983  ;;  %2950 = vperm.xlu2 %4606, %v6185_v55  }
0x10d7   :  { %v2994_v9 = vmul.f32 %v4167_v4, %v2984_v48 }
0x10d9   :  { %v3702_v51 = vadd.f32 %v2994_v9, %v2957_v21  ;;  %v4108_v21 = vld [vmem:[%s7212_s11 + $0xb8] sm:$0xff] }
0x10db   :  { %v3780_v11 = vadd.f32 %v3708_v0, %v3702_v51  ;;  %v3169_v42 = vpop.permute.xlu1 %3168 }
0x10dd   :  { %v3816_v50 = vadd.f32 %v3780_v11, %v3774_v22  ;;  %4607 = vset.pattern.permute.xlu1 %v4880_v34  ;;  %v4197_v34 = vld [vmem:[%s7212_s11 + $0x380] sm:$0xff] }
0x10de   :  { %4609 = vset.pattern.permute.xlu2 %v4882_v19  ;;  %2987 = vperm.xlu1 %4607, %v6185_v55   ;;  %v4203_v19 = vld [vmem:[%s7212_s11 + $0x3b0] sm:$0xff]  ;;  %v3179_v35 = vmul.f32 %v4197_v34, %v3169_v42 }
0x10df   :  { %v7002_v37 = vadd.f32 %v3816_v50, %v3810_v27  ;;  %v3095_v18 = vpop.permute.xlu2 %3094  ;;  %3061 = vperm.xlu2 %4609, %v6185_v55  }
0x10e0   :  { %v3105_v16 = vmul.f32 %v4185_v13, %v3095_v18 }
0x10e2   :  { %v3714_v63 = vadd.f32 %v3142_v32, %v3105_v16 }
0x10e4   :  { %v3243_v17 = vpop.permute.xlu1 %3242 }
0x10e5   :  { %v3253_v33 = vmul.f32 %v4209_v20, %v3243_v17  ;;  %v4269_v17 = vld [vmem:[%s7212_s11 + $0x5c0] sm:$0xff]  ;;  %v2478_v20 = vld [vmem:[%s7212_s11 + $0x28] sm:$0xff] }
0x10e6   :  { %4610 = vset.pattern.permute.xlu1 %v4883_v12  ;;  %v4215_v12 = vld [vmem:[%s7212_s11 + $0x410] sm:$0xff] }
0x10e7   :  { %4612 = vset.pattern.permute.xlu2 %v4885_v40  ;;  %3098 = vperm.xlu1 %4610, %v6185_v55  }
0x10e8   :  { %v3206_v36 = vpop.permute.xlu2 %3205  ;;  %3172 = vperm.xlu2 %4612, %v6185_v55  }
0x10e9   :  { %v3216_v56 = vmul.f32 %v4203_v19, %v3206_v36 }
0x10eb   :  { %v3720_v57 = vadd.f32 %v3216_v56, %v3179_v35 }
0x10ed   :  { %v3786_v1 = vadd.f32 %v3720_v57, %v3714_v63  ;;  %v3280_v8 = vpop.permute.xlu1 %3279 }
0x10ee   :  { %v3290_v40 = vmul.f32 %v4215_v12, %v3280_v8 }
0x10ef   :  { %4613 = vset.pattern.permute.xlu1 %v4886_v29  ;;  %v7036_v29 = vpop.permute.xlu0 %3135 }
0x10f0   :  { %v3726_v5 = vadd.f32 %v3290_v40, %v3253_v33  ;;  %4615 = vset.pattern.permute.xlu2 %v4888_v15  ;;  %3209 = vperm.xlu1 %4613, %v6185_v55  }
0x10f1   :  { %v3317_v60 = vpop.permute.xlu2 %3316  ;;  %3283 = vperm.xlu2 %4615, %v6185_v55  }
0x10f2   :  { %v3327_v14 = vmul.f32 %v4221_v31, %v3317_v60 }
0x10f6   :  { %v3354_v41 = vpop.permute.xlu1 %3353 }
0x10f7   :  { %v3364_v53 = vmul.f32 %v4227_v44, %v3354_v41  ;;  %v7050_v26 = vpop.permute.xlu0 %3246 }
0x10f8   :  { %4616 = vset.pattern.permute.xlu1 %v4889_v61  ;;  %v4233_v61 = vld [vmem:[%s7212_s11 + $0x4a0] sm:$0xff] }
0x10f9   :  { %v3732_v15 = vadd.f32 %v3364_v53, %v3327_v14  ;;  %4618 = vset.pattern.permute.xlu2 %v4891_v2  ;;  %3320 = vperm.xlu1 %4616, %v6185_v55   ;;  %v4120_v53 = vld [vmem:[%s7212_s11 + $0x118] sm:$0xff] }
0x10fa   :  { %v3428_v10 = vpop.permute.xlu2 %3427  ;;  %3394 = vperm.xlu2 %4618, %v6185_v55  }
0x10fb   :  { %v3792_v23 = vadd.f32 %v3732_v15, %v3726_v5  ;;  %v3438_v45 = vmul.f32 %v4239_v24, %v3428_v10  ;;  %v4114_v10 = vld [vmem:[%s7212_s11 + $0xe8] sm:$0xff] }
0x10fd   :  { %v3822_v27 = vadd.f32 %v3792_v23, %v3786_v1  ;;  %v4096_v1 = vld [vmem:[%s7212_s11 + $0x58] sm:$0xff] }
0x10ff   :  { %v3391_v0 = vpop.permute.xlu1 %3390  ;;  %v7057_v59 = vpop.permute.xlu0 %3357 }
0x1100   :  { %v3401_v58 = vmul.f32 %v4233_v61, %v3391_v0  ;;  %v2699_v61 = vmul.f32 %v4120_v53, %v6978_v39  ;;  %v4216_v53 = vld [vmem:[%s7212_s11 + $0x418] sm:$0xff] }
0x1101   :  { %4619 = vset.pattern.permute.xlu1 %v4892_v54 }
0x1102   :  { %v3738_v2 = vadd.f32 %v3438_v45, %v3401_v58  ;;  %4621 = vset.pattern.permute.xlu2 %v4894_v46  ;;  %3431 = vperm.xlu1 %4619, %v6185_v55   ;;  %v4245_v46 = vld [vmem:[%s7212_s11 + $0x500] sm:$0xff] }
0x1103   :  { %v3576_v3 = vpop.permute.xlu2 %3575  ;;  %3505 = vperm.xlu2 %4621, %v6185_v55  }
0x1107   :  { %v7076_v50 = vpop.permute.xlu0 %3468 }
0x1108   :  { %v3465_v22 = vpop.permute.xlu1 %3464 }
0x1109   :  { %v3475_v48 = vmul.f32 %v4245_v46, %v3465_v22  ;;  %v4132_v22 = vld [vmem:[%s7212_s11 + $0x178] sm:$0xff] }
0x110a   :  { %4624 = vset.pattern.permute.xlu1 %v4897_v43 }
0x110b   :  { %4623 = vset.pattern.permute.xlu2 %v7233_v47  ;;  %3579 = vperm.xlu1 %4624, %v6185_v55   ;;  %v4102_v47 = vld [vmem:[%s7212_s11 + $0x88] sm:$0xff] }
0x110c   :  { %3542 = vperm.xlu2 %4623, %v6185_v55   ;;  %v2507_v54 = vpop.permute.xlu2 %2506  ;;  %v2588_v11 = vmul.f32 %v4102_v47, %v6960_v38  ;;  %v4275_v38 = vld [vmem:[%s7212_s11 + $0x5f0] sm:$0xff] }
0x110d   :  { %v2514_v40 = vmul.f32 %v2507_v54, %v2478_v20 }
0x110f   :  { %v3650_v63 = vpop.permute.xlu0 %3649 }
0x1110   :  { %v3660_v19 = vmul.f32 %v4275_v38, %v3650_v63 }
0x1111   :  { %v3502_v4 = vpop.permute.xlu1 %3501 }
0x1112   :  { %v3512_v43 = vmul.f32 %v4251_v6, %v3502_v4 }
0x1113   :  { %4626 = vset.pattern.permute.xlu1 %v4896_v52  ;;  %v4263_v52 = vld [vmem:[%s7212_s11 + $0x590] sm:$0xff] }
0x1114   :  { %v3744_v9 = vadd.f32 %v3512_v43, %v3475_v48  ;;  %4625 = vset.pattern.permute.xlu2 %v7235_v28  ;;  %3653 = vperm.xlu1 %4626, %v6185_v55   ;;  %v4257_v28 = vld [vmem:[%s7212_s11 + $0x560] sm:$0xff]  ;;  %v3586_v32 = vmul.f32 %v4263_v52, %v3576_v3  ;;  %v4126_v3 = vld [vmem:[%s7212_s11 + $0x148] sm:$0xff] }
0x1115   :  { %3616 = vperm.xlu2 %4625, %v6185_v55   ;;  %v2618_v51 = vpop.permute.xlu2 %2617 }
0x1116   :  { %v3798_v42 = vadd.f32 %v3744_v9, %v3738_v2  ;;  %v2625_v49 = vmul.f32 %v4108_v21, %v2618_v51  ;;  %v4150_v51 = vld [vmem:[%s7212_s11 + $0x208] sm:$0xff] }
0x1118   :  { %v3673_v13 = vadd.f32 %v2625_v49, %v2588_v11  ;;  %v4156_v11 = vld [vmem:[%s7212_s11 + $0x238] sm:$0xff]  ;;  %v4138_v49 = vld [vmem:[%s7212_s11 + $0x1a8] sm:$0xff] }
0x1119   :  { %v2810_v38 = vmul.f32 %v4138_v49, %v6991_v7 }
0x111a   :  { %v3539_v18 = vpop.permute.xlu1 %3538 }
0x111b   :  { %v3549_v16 = vmul.f32 %v4257_v28, %v3539_v18  ;;  %v4162_v28 = vld [vmem:[%s7212_s11 + $0x268] sm:$0xff]  ;;  %v4168_v18 = vld [vmem:[%s7212_s11 + $0x298] sm:$0xff] }
0x111d   :  { %v3750_v55 = vadd.f32 %v3586_v32, %v3549_v16  ;;  %v2921_v32 = vmul.f32 %v4156_v11, %v7005_v62 }
0x111e   :  { %v2729_v57 = vpop.permute.xlu2 %2728 }
0x111f   :  { %v2736_v39 = vmul.f32 %v4126_v3, %v2729_v57  ;;  %v4264_v3 = vld [vmem:[%s7212_s11 + $0x598] sm:$0xff] }
0x1123   :  { %v3613_v34 = vpop.permute.xlu1 %3612 }
0x1124   :  { %v3623_v36 = vmul.f32 %v4269_v17, %v3613_v34 }
0x1126   :  { %v3756_v35 = vadd.f32 %v3660_v19, %v3623_v36 }
0x1127   :  { %v2840_v23 = vpop.permute.xlu2 %2839 }
0x1128   :  { %v3804_v56 = vadd.f32 %v3756_v35, %v3750_v55 }
0x112a   :  { %v3828_v12 = vadd.f32 %v3804_v56, %v3798_v42  ;;  %v4180_v42 = vld [vmem:[%s7212_s11 + $0x2f8] sm:$0xff] }
0x112c   :  { %v3840_v8 = vadd.f32 %v3828_v12, %v3822_v27  ;;  %v2544_v33 = vpop.permute.xlu1 %2543 }
0x112d   :  { %v2551_v5 = vmul.f32 %v4096_v1, %v2544_v33 }
0x112e   :  { %v3846_v60 = vadd.f32 %v3840_v8, %v7002_v37 }
0x112f   :  { %v3667_v31 = vadd.f32 %v2551_v5, %v2514_v40 }
0x1130   :  { %v3877_v44 = vsel %vm3848_vm6, %v3846_v60, 0.0  ;;  %v2951_v46 = vpop.permute.xlu2 %2950 }
0x1131   :  { %v3878_v41 = vrot.slane %v3877_v44, 4  ;;  %v3763_v14 = vadd.f32 %v3673_v13, %v3667_v31  ;;  %v4174_v13 = vld [vmem:[%s7212_s11 + $0x2c8] sm:$0xff]  ;;  %v2958_v34 = vmul.f32 %v4162_v28, %v2951_v46 }
0x1132   :  { %v3032_v17 = vmul.f32 %v4174_v13, %v7023_v25 }
0x1133   :  { %v3879_v15 = vadd.f32 %v3878_v41, %v3877_v44 }
0x1135   :  { %v3880_v27 = vrot.slane %v3879_v15, 2  ;;  %v2655_v24 = vpop.permute.xlu1 %2654 }
0x1136   :  { %v2662_v37 = vmul.f32 %v4114_v10, %v2655_v24  ;;  %v4228_v10 = vld [vmem:[%s7212_s11 + $0x478] sm:$0xff]  ;;  %v4198_v24 = vld [vmem:[%s7212_s11 + $0x388] sm:$0xff] }
0x1137   :  { %v3881_v0 = vadd.f32 %v3880_v27, %v3879_v15  ;;  %v4204_v15 = vld [vmem:[%s7212_s11 + $0x3b8] sm:$0xff]  ;;  %v4210_v27 = vld [vmem:[%s7212_s11 + $0x3e8] sm:$0xff]  ;;  %v3365_v46 = vmul.f32 %v4228_v10, %v7057_v59 }
0x1138   :  { %v3679_v45 = vadd.f32 %v2699_v61, %v2662_v37  ;;  %v4186_v61 = vld [vmem:[%s7212_s11 + $0x328] sm:$0xff]  ;;  %v4276_v59 = vld [vmem:[%s7212_s11 + $0x5f8] sm:$0xff] }
0x1139   :  { %v3882_v58 = vrot.slane %v3881_v0, 1  ;;  %v3062_v9 = vpop.permute.xlu2 %3061 }
0x113a   :  { %v3069_v55 = vmul.f32 %v4180_v42, %v3062_v9 }
0x113b   :  { %v3883_v2 = vadd.f32 %v3882_v58, %v3881_v0  ;;  %v4252_v58 = vld [vmem:[%s7212_s11 + $0x538] sm:$0xff] }
0x113c   :  { %v3709_v20 = vadd.f32 %v3069_v55, %v3032_v17 }
0x113d   :  { %v7112_v54 = vsel %vm3897_vm10, %v6954_v30, %v3883_v2  ;;  %v4144_v30 = vld [vmem:[%s7212_s11 + $0x1d8] sm:$0xff] }
0x113e   :  { %v2766_v6 = vpop.permute.xlu1 %2765  ;;  %v2847_v16 = vmul.f32 %v4144_v30, %v2840_v23  ;;  %v4240_v23 = vld [vmem:[%s7212_s11 + $0x4d8] sm:$0xff] }
0x113f   :  { %v2773_v4 = vmul.f32 %v4132_v22, %v2766_v6  ;;  %v4192_v22 = vld [vmem:[%s7212_s11 + $0x358] sm:$0xff]  ;;  %v4246_v6 = vld [vmem:[%s7212_s11 + $0x508] sm:$0xff] }
0x1140   :  { %v3691_v56 = vadd.f32 %v2847_v16, %v2810_v38  ;;  %v3476_v49 = vmul.f32 %v4246_v6, %v7076_v50 }
0x1141   :  { %v3685_v48 = vadd.f32 %v2773_v4, %v2736_v39  ;;  %v3254_v4 = vmul.f32 %v4210_v27, %v7050_v26  ;;  %v3143_v26 = vmul.f32 %v4192_v22, %v7036_v29 }
0x1142   :  { %v3173_v35 = vpop.permute.xlu2 %3172 }
0x1143   :  { %v3769_v43 = vadd.f32 %v3685_v48, %v3679_v45  ;;  %v4234_v45 = vld [vmem:[%s7212_s11 + $0x4a8] sm:$0xff]  ;;  %v3180_v48 = vmul.f32 %v4198_v24, %v3173_v35 }
0x1145   :  { %v3811_v47 = vadd.f32 %v3769_v43, %v3763_v14  ;;  %v4222_v14 = vld [vmem:[%s7212_s11 + $0x448] sm:$0xff] }
0x1147   :  { %v2877_v21 = vpop.permute.xlu1 %2876 }
0x1148   :  { %v2884_v52 = vmul.f32 %v4150_v51, %v2877_v21  ;;  %v4270_v21 = vld [vmem:[%s7212_s11 + $0x5c8] sm:$0xff] }
0x114a   :  { %v3697_v19 = vadd.f32 %v2921_v32, %v2884_v52 }
0x114b   :  { %v3284_v62 = vpop.permute.xlu2 %3283 }
0x114c   :  { %v3775_v12 = vadd.f32 %v3697_v19, %v3691_v56  ;;  %v3291_v0 = vmul.f32 %v4216_v53, %v3284_v62 }
0x114e   :  { %v3727_v52 = vadd.f32 %v3291_v0, %v3254_v4 }
0x1150   :  { %v2988_v63 = vpop.permute.xlu1 %2987 }
0x1151   :  { %v2995_v36 = vmul.f32 %v4168_v18, %v2988_v63 }
0x1153   :  { %v3703_v57 = vadd.f32 %v2995_v36, %v2958_v34 }
0x1154   :  { %v3395_v60 = vpop.permute.xlu2 %3394 }
0x1155   :  { %v3781_v1 = vadd.f32 %v3709_v20, %v3703_v57  ;;  %v3402_v51 = vmul.f32 %v4234_v45, %v3395_v60  ;;  %v3901_v60 = vld [vmem:[%s7213_s12] sm:$0x3f] }
0x1157   :  { %v3817_v8 = vadd.f32 %v3781_v1, %v3775_v12 }
0x1159   :  { %v3835_v33 = vadd.f32 %v3817_v8, %v3811_v47  ;;  %v3099_v40 = vpop.permute.xlu1 %3098  ;;  %v4258_v47 = vld [vmem:[%s7212_s11 + $0x568] sm:$0xff] }
0x115a   :  { %v3106_v43 = vmul.f32 %v4186_v61, %v3099_v40 }
0x115c   :  { %v3715_v38 = vadd.f32 %v3143_v26, %v3106_v43 }
0x115d   :  { %v3506_v7 = vpop.permute.xlu2 %3505 }
0x115e   :  { %v3513_v11 = vmul.f32 %v4252_v58, %v3506_v7 }
0x1160   :  { %v3745_v63 = vadd.f32 %v3513_v11, %v3476_v49 }
0x1162   :  { %v3210_v5 = vpop.permute.xlu1 %3209 }
0x1163   :  { %v3217_v2 = vmul.f32 %v4204_v15, %v3210_v5 }
0x1165   :  { %v3721_v13 = vadd.f32 %v3217_v2, %v3180_v48 }
0x1166   :  { %v3543_v41 = vpop.permute.xlu2 %3542 }
0x1167   :  { %v3550_v18 = vmul.f32 %v4258_v47, %v3543_v41  ;;  %v3787_v36 = vadd.f32 %v3721_v13, %v3715_v38 }
0x116b   :  { %v3321_v31 = vpop.permute.xlu1 %3320 }
0x116c   :  { %v3328_v37 = vmul.f32 %v4222_v14, %v3321_v31 }
0x116e   :  { %v3733_v30 = vadd.f32 %v3365_v46, %v3328_v37 }
0x116f   :  { %v3617_v9 = vpop.permute.xlu2 %3616 }
0x1170   :  { %v3624_v32 = vmul.f32 %v4270_v21, %v3617_v9  ;;  %v3793_v17 = vadd.f32 %v3733_v30, %v3727_v52 }
0x1172   :  { %v3823_v20 = vadd.f32 %v3793_v17, %v3787_v36 }
0x1174   :  { %v3432_v44 = vpop.permute.xlu1 %3431 }
0x1175   :  { %v3439_v39 = vmul.f32 %v4240_v23, %v3432_v44 }
0x1177   :  { %v3739_v16 = vadd.f32 %v3439_v39, %v3402_v51 }
0x1179   :  { %v3799_v35 = vadd.f32 %v3745_v63, %v3739_v16 }
0x117d   :  { %v3580_v25 = vpop.permute.xlu1 %3579 }
0x117e   :  { %v3587_v42 = vmul.f32 %v4264_v3, %v3580_v25 }
0x1180   :  { %v3751_v34 = vadd.f32 %v3587_v42, %v3550_v18 }
0x1186   :  { %v3654_v28 = vpop.permute.xlu1 %3653 }
0x1187   :  { %v3661_v55 = vmul.f32 %v4276_v59, %v3654_v28 }
0x1189   :  { %v3757_v19 = vadd.f32 %v3661_v55, %v3624_v32 }
0x118b   :  { %v3805_v56 = vadd.f32 %v3757_v19, %v3751_v34 }
0x118d   :  { %v3829_v57 = vadd.f32 %v3805_v56, %v3799_v35 }
0x118f   :  { %v3841_v29 = vadd.f32 %v3829_v57, %v3823_v20 }
0x1191   :  { %v3847_v12 = vadd.f32 %v3841_v29, %v3835_v33 }
0x1193   :  { %v3884_v50 = vsel %vm3848_vm6, %v3847_v12, 0.0 }
0x1194   :  { %v3885_v1 = vrot.slane %v3884_v50, 4 }
0x1196   :  { %v3886_v8 = vadd.f32 %v3885_v1, %v3884_v50 }
0x1198   :  { %v3887_v40 = vrot.slane %v3886_v8, 2 }
0x119a   :  { %v3888_v62 = vadd.f32 %v3887_v40, %v3886_v8 }
0x119c   :  { %v3889_v5 = vrot.slane %v3888_v62, 1 }
0x119e   :  { %v3890_v31 = vadd.f32 %v3889_v5, %v3888_v62 }
0x11a0   :  { %v3900_v7 = vsel %vm3899_vm11, %v7112_v54, %v3890_v31 }
0x11a1   :  { %v3902_v44 = vadd.f32 %v3901_v60, %v3900_v7 }
0x11a3   :  { %3904 = vst.msk [vmem:[%s7214_s13] sm:$0x3f] %vm3903_vm12, %v3902_v44 }

</bundles_post_ra>
